<compile_context>
chip_gen: v5e
topology: v5e:2x2
jax: 0.10.0
libtpu: 0.0.40
codegen_flags: <defaults>
</compile_context>

<pallas_src>
import functools
import math

import jax
import jax.numpy as jnp
from jax.experimental import pallas as pl
from jax.experimental.pallas import tpu as pltpu


def _encoder_kernel(x_ref, *refs, pool):
    """Fused [Conv1d('same') -> ReLU -> MaxPool1d(pool)] x N for one batch tile.

    Activation layout inside the kernel is channels x (Bt * L_layer) lanes:
    column index = b_local * L_layer + position (batch folded into lanes).

    x_ref : (Cin, Bt*L) input tile
    refs  : n_layers groups of
              w_ref    (K, Cout, Cin)            bf16 per-tap weights
              b_ref    (Cout, 1)                 f32 bias
              mask_ref (2*pad, Bt*L_i)           f32 0/1 conv edge masks (left taps, then right)
              sel_ref  (Bt*L_i, Bt*L_i // pool)  bf16 0/1 MaxPool compaction matrix
            followed by o_ref (C_last, Bt*L_last).
    """
    o_ref = refs[-1]
    layer_refs = refs[:-1]
    assert len(layer_refs) % 4 == 0
    n_layers = len(layer_refs) // 4

    a = x_ref[...].astype(jnp.float32)                         # (Cin, N)
    for i in range(n_layers):
        w_ref, b_ref, mask_ref, sel_ref = layer_refs[4 * i: 4 * i + 4]
        K = w_ref.shape[0]
        pad = (K - 1) // 2
        N = a.shape[1]

        # --- Conv1d(stride=1, 'same'): K shifted taps, each a bf16 MXU matmul
        # with f32 accumulation.  Shifts are lane rotations (XLU slot, ~free);
        # segment-boundary lanes (batch edges) are zeroed by precomputed masks.
        # TODO(synk): fuse the K taps into one (Cout, K*Cin) matmul once the
        # activation can be sublane-stacked cheaply for Cin not a multiple of 8.
        acc = jnp.dot(w_ref[pad], a.astype(jnp.bfloat16),
                      preferred_element_type=jnp.float32)
        for s in range(1, pad + 1):
            left = pltpu.roll(a, s, axis=1) * mask_ref[s - 1: s, :]          # x[:, l-s]
            acc = acc + jnp.dot(w_ref[pad - s], left.astype(jnp.bfloat16),
                                preferred_element_type=jnp.float32)
            right = pltpu.roll(a, N - s, axis=1) * mask_ref[pad + s - 1: pad + s, :]  # x[:, l+s]
            acc = acc + jnp.dot(w_ref[pad + s], right.astype(jnp.bfloat16),
                                preferred_element_type=jnp.float32)
        acc = jnp.maximum(acc + b_ref[...], 0.0)               # bias + ReLU (f32 VPU)

        # --- MaxPool1d(pool), floor mode: windowed max via lane rotations, then
        # an exact 0/1 compaction matmul keeping every pool-th lane per segment.
        m = acc
        for p in range(1, pool):
            m = jnp.maximum(m, pltpu.roll(acc, N - p, axis=1))
        a = jnp.dot(m.astype(jnp.bfloat16), sel_ref[...],
                    preferred_element_type=jnp.float32)        # (Cout, N // pool)

    o_ref[...] = a.astype(o_ref.dtype)


def _pick_batch_tile(batch, length, last_len, lane_target=1024):
    """Smallest batch tile whose input/output lane widths are multiples of 128,
    scaled up toward ~lane_target input lanes, while keeping >= 2 grid steps
    (v7x has two TensorCores) whenever the batch allows it."""
    bt0 = 128 // math.gcd(last_len, 128)          # lane-dense output tile
    bt = bt0 * max(1, lane_target // (bt0 * length))
    while bt > bt0 and -(-batch // bt) < 2:
        bt -= bt0
    return bt


def prepare_encoder(params, *, batch, length, stride, padding, pool):
    """One-time prep (hoisted out of the forward pass): bf16 per-tap weights,
    conv edge masks, MaxPool compaction matrices, and the grid/tile geometry.
    The constant arrays become resident VMEM inputs (constant index_maps)."""
    assert stride == 1, "kernel implements stride=1 convolutions"
    kernel_size = params[0][0].shape[-1]
    assert kernel_size == 2 * padding + 1, "kernel assumes 'same' convs (L_out == L_in)"
    n_layers = len(params)
    assert length % (pool ** n_layers) == 0, "pooling truncation not handled"
    # TODO(synk): general stride / non-'same' padding needs a different shift scheme.

    in_channels = params[0][0].shape[1]
    last_len = length // pool ** n_layers
    bt = _pick_batch_tile(batch, length, last_len)
    batch_padded = -(-batch // bt) * bt
    num_tiles = batch_padded // bt

    layer_args, in_specs = [], []
    L_cur = length
    for w, b in params:                                        # w: (Cout, Cin, K) torch layout
        wk = jnp.transpose(w, (2, 0, 1)).astype(jnp.bfloat16)  # (K, Cout, Cin) bf16 MXU operand
        bk = b.reshape(-1, 1).astype(jnp.float32)              # (Cout, 1)

        N = bt * L_cur
        lane = jnp.arange(N, dtype=jnp.int32)[None, :] % L_cur
        rows = [(lane >= s) for s in range(1, padding + 1)]                  # left-tap valid
        rows += [(lane <= L_cur - 1 - s) for s in range(1, padding + 1)]     # right-tap valid
        if not rows:
            rows = [jnp.ones((1, N), dtype=bool)]              # unused when padding == 0
        mask = jnp.concatenate(rows, axis=0).astype(jnp.float32)

        Lp = L_cur // pool
        r = jnp.arange(N, dtype=jnp.int32)[:, None]
        c = jnp.arange(bt * Lp, dtype=jnp.int32)[None, :]
        sel = (r == (c // Lp) * L_cur + pool * (c % Lp)).astype(jnp.bfloat16)  # exact 0/1

        layer_args += [wk, bk, mask, sel]
        in_specs += [pl.BlockSpec(wk.shape, lambda t: (0, 0, 0)),   # resident, no re-DMA
                     pl.BlockSpec(bk.shape, lambda t: (0, 0)),
                     pl.BlockSpec(mask.shape, lambda t: (0, 0)),
                     pl.BlockSpec(sel.shape, lambda t: (0, 0))]
        L_cur = Lp

    c_last = params[-1][0].shape[0]
    x_spec = pl.BlockSpec((in_channels, bt * length), lambda t: (0, t))
    out_spec = pl.BlockSpec((c_last, bt * last_len), lambda t: (0, t))

    return dict(batch=batch, batch_padded=batch_padded, batch_tile=bt,
                num_tiles=num_tiles, length=length, last_len=last_len,
                in_channels=in_channels, c_last=c_last, pool=pool,
                layer_args=layer_args,
                in_specs=[x_spec] + in_specs, out_spec=out_spec)


def encoder_forward(x_ncl, enc):
    """Fused Pallas Encoder forward. x_ncl: (B, Cin, L) -> (B, C_last * L_last)."""
    B, cin, L = x_ncl.shape
    assert B == enc["batch"] and cin == enc["in_channels"] and L == enc["length"]

    bt, b_pad = enc["batch_tile"], enc["batch_padded"]
    if b_pad != B:
        x_ncl = jnp.pad(x_ncl, ((0, b_pad - B), (0, 0), (0, 0)))
    # Fold batch into the lane axis: (Cin, B*L), column = b*L + pos.  In a real
    # pipeline, store activations in this layout upstream to skip this transpose.
    x_folded = jnp.transpose(x_ncl, (1, 0, 2)).reshape(cin, b_pad * L)

    y = pl.pallas_call(
        functools.partial(_encoder_kernel, pool=enc["pool"]),
        out_shape=jax.ShapeDtypeStruct((enc["c_last"], b_pad * enc["last_len"]),
                                       jnp.float32),
        grid_spec=pltpu.PrefetchScalarGridSpec(
            num_scalar_prefetch=0,
            grid=(enc["num_tiles"],),
            in_specs=enc["in_specs"],
            out_specs=enc["out_spec"]),
        compiler_params=pltpu.CompilerParams(dimension_semantics=("parallel",)),
    )(x_folded, *enc["layer_args"])

    # (C_last, B*L_last) -> torch Flatten order (B, C_last * L_last).
    y = y.reshape(enc["c_last"], b_pad, enc["last_len"]).transpose(1, 0, 2)
    return y[:B].reshape(B, -1)


def encoder_forward_ref(x_ncl, params, *, stride, padding, pool):
    """Pure-JAX reference matching the PyTorch module exactly (f32)."""
    x = x_ncl
    for w, b in params:
        y = jax.lax.conv_general_dilated(
            x, w, window_strides=(stride,), padding=[(padding, padding)],
            dimension_numbers=("NCH", "OIH", "NCH"))
        y = y + b[None, :, None]
        y = jnp.maximum(y, 0.0)
        Lp = y.shape[-1] // pool
        y = y[:, :, :Lp * pool].reshape(y.shape[0], y.shape[1], Lp, pool).max(axis=-1)
        x = y
    return x.reshape(x.shape[0], -1)


def init_params(key, in_channels, out_channels, kernel_size):
    """Deterministic PyTorch-Conv1d-style (kaiming-uniform-ish) init."""
    params = []
    cin = in_channels
    for cout in out_channels:
        key, kw, kb = jax.random.split(key, 3)
        bound = 1.0 / (cin * kernel_size) ** 0.5
        w = jax.random.uniform(kw, (cout, cin, kernel_size), jnp.float32, -bound, bound)
        b = jax.random.uniform(kb, (cout,), jnp.float32, -bound, bound)
        params.append((w, b))
        cin = cout
    return params


if __name__ == "__main__":
    in_channels = 4
    out_channels = [8, 16, 32]
    kernel_size = 3
    stride = 1
    padding = 1
    pooling_kernel = 2
    pooling_padding = 0  # accepted by the torch __init__ but unused in its forward

    # Bt = 8 -> grid of 2 parallel steps (both v7x TCs busy), 1024-lane input
    # tiles, 128-lane (unmasked) output store tiles.
    B, L = 16, 128
    key = jax.random.PRNGKey(0)
    key, kx = jax.random.split(key)
    x = jax.random.normal(kx, (B, in_channels, L), jnp.float32)

    params = init_params(key, in_channels, out_channels, kernel_size)
    enc = prepare_encoder(params, batch=B, length=L, stride=stride,
                          padding=padding, pool=pooling_kernel)   # one-time prep

    out = encoder_forward(x, enc)
    out = jax.block_until_ready(out)

    ref = encoder_forward_ref(x, params, stride=stride, padding=padding,
                              pool=pooling_kernel)
    assert out.shape == (B, out_channels[-1] * (L // pooling_kernel ** 3)), out.shape
    max_err = float(jnp.max(jnp.abs(out - ref)))
    # bf16 MXU operands (weights + activations at the dots) -> relaxed tolerance.
    assert jnp.allclose(out, ref, atol=5e-2, rtol=5e-2), max_err
    print("KERNEL_OK")
</pallas_src>

<mosaic_0001>
module attributes {stable_mosaic.version = 11 : i64} {
  func.func @_encoder_kernel(%arg0: i32, %arg1: memref<4x1024xf32, #tpu.memory_space<vmem>>, %arg2: memref<3x8x4xbf16, #tpu.memory_space<vmem>>, %arg3: memref<8x1xf32, #tpu.memory_space<vmem>>, %arg4: memref<2x1024xf32, #tpu.memory_space<vmem>>, %arg5: memref<1024x512xbf16, #tpu.memory_space<vmem>>, %arg6: memref<3x16x8xbf16, #tpu.memory_space<vmem>>, %arg7: memref<16x1xf32, #tpu.memory_space<vmem>>, %arg8: memref<2x512xf32, #tpu.memory_space<vmem>>, %arg9: memref<512x256xbf16, #tpu.memory_space<vmem>>, %arg10: memref<3x32x16xbf16, #tpu.memory_space<vmem>>, %arg11: memref<32x1xf32, #tpu.memory_space<vmem>>, %arg12: memref<2x256xf32, #tpu.memory_space<vmem>>, %arg13: memref<256x128xbf16, #tpu.memory_space<vmem>>, %arg14: memref<32x128xf32, #tpu.memory_space<vmem>>) attributes {dimension_semantics = [#tpu.dimension_semantics<parallel>], iteration_bounds = array<i64: 2>, scalar_prefetch = 0 : i64, scratch_operands = 0 : i64, tpu.core_type = #tpu.core_type<tc>, window_params = [{transform_indices = @transform_0, window_bounds = array<i64: 4, 1024>}, {pipeline_mode = #tpu.pipeline_mode<synchronous>, transform_indices = @transform_1, window_bounds = array<i64: 3, 8, 4>}, {pipeline_mode = #tpu.pipeline_mode<synchronous>, transform_indices = @transform_2, window_bounds = array<i64: 8, 1>}, {pipeline_mode = #tpu.pipeline_mode<synchronous>, transform_indices = @transform_3, window_bounds = array<i64: 2, 1024>}, {pipeline_mode = #tpu.pipeline_mode<synchronous>, transform_indices = @transform_4, window_bounds = array<i64: 1024, 512>}, {pipeline_mode = #tpu.pipeline_mode<synchronous>, transform_indices = @transform_5, window_bounds = array<i64: 3, 16, 8>}, {pipeline_mode = #tpu.pipeline_mode<synchronous>, transform_indices = @transform_6, window_bounds = array<i64: 16, 1>}, {pipeline_mode = #tpu.pipeline_mode<synchronous>, transform_indices = @transform_7, window_bounds = array<i64: 2, 512>}, {pipeline_mode = #tpu.pipeline_mode<synchronous>, transform_indices = @transform_8, window_bounds = array<i64: 512, 256>}, {pipeline_mode = #tpu.pipeline_mode<synchronous>, transform_indices = @transform_9, window_bounds = array<i64: 3, 32, 16>}, {pipeline_mode = #tpu.pipeline_mode<synchronous>, transform_indices = @transform_10, window_bounds = array<i64: 32, 1>}, {pipeline_mode = #tpu.pipeline_mode<synchronous>, transform_indices = @transform_11, window_bounds = array<i64: 2, 256>}, {pipeline_mode = #tpu.pipeline_mode<synchronous>, transform_indices = @transform_12, window_bounds = array<i64: 256, 128>}, {transform_indices = @transform_13, window_bounds = array<i64: 32, 128>}]} {
    %c0 = arith.constant 0 : index
    %c0_0 = arith.constant 0 : index
    %0 = vector.load %arg1[%c0, %c0_0] : memref<4x1024xf32, #tpu.memory_space<vmem>>, vector<4x1024xf32>
    %c1 = arith.constant 1 : index
    %c0_1 = arith.constant 0 : index
    %c0_2 = arith.constant 0 : index
    %1 = vector.load %arg2[%c1, %c0_1, %c0_2] : memref<3x8x4xbf16, #tpu.memory_space<vmem>>, vector<1x8x4xbf16>
    %2 = vector.shape_cast %1 : vector<1x8x4xbf16> to vector<8x4xbf16>
    %3 = arith.truncf %0 : vector<4x1024xf32> to vector<4x1024xbf16>
    %cst = arith.constant dense<0.000000e+00> : vector<8x1024xf32>
    %4 = tpu.matmul %2, %3, %cst {dimension_numbers = #tpu.dot_dimension_numbers<[1], [0], [0], [1], [0, 0, 1, 1], [], []>} : vector<8x4xbf16>, vector<4x1024xbf16>, vector<8x1024xf32> -> vector<8x1024xf32>
    %c1_i32 = arith.constant 1 : i32
    %5 = tpu.dynamic_rotate %0 by %c1_i32 dim 1 : vector<4x1024xf32>, i32 -> vector<4x1024xf32>
    %c0_3 = arith.constant 0 : index
    %c0_4 = arith.constant 0 : index
    %6 = vector.load %arg4[%c0_3, %c0_4] : memref<2x1024xf32, #tpu.memory_space<vmem>>, vector<1x1024xf32>
    %7 = vector.broadcast %6 : vector<1x1024xf32> to vector<4x1024xf32>
    %8 = arith.mulf %5, %7 : vector<4x1024xf32>
    %c0_5 = arith.constant 0 : index
    %c0_6 = arith.constant 0 : index
    %c0_7 = arith.constant 0 : index
    %9 = vector.load %arg2[%c0_5, %c0_6, %c0_7] : memref<3x8x4xbf16, #tpu.memory_space<vmem>>, vector<1x8x4xbf16>
    %10 = vector.shape_cast %9 : vector<1x8x4xbf16> to vector<8x4xbf16>
    %11 = arith.truncf %8 : vector<4x1024xf32> to vector<4x1024xbf16>
    %cst_8 = arith.constant dense<0.000000e+00> : vector<8x1024xf32>
    %12 = tpu.matmul %10, %11, %cst_8 {dimension_numbers = #tpu.dot_dimension_numbers<[1], [0], [0], [1], [0, 0, 1, 1], [], []>} : vector<8x4xbf16>, vector<4x1024xbf16>, vector<8x1024xf32> -> vector<8x1024xf32>
    %13 = arith.addf %4, %12 : vector<8x1024xf32>
    %c1023_i32 = arith.constant 1023 : i32
    %14 = tpu.dynamic_rotate %0 by %c1023_i32 dim 1 : vector<4x1024xf32>, i32 -> vector<4x1024xf32>
    %c1_9 = arith.constant 1 : index
    %c0_10 = arith.constant 0 : index
    %15 = vector.load %arg4[%c1_9, %c0_10] : memref<2x1024xf32, #tpu.memory_space<vmem>>, vector<1x1024xf32>
    %16 = vector.broadcast %15 : vector<1x1024xf32> to vector<4x1024xf32>
    %17 = arith.mulf %14, %16 : vector<4x1024xf32>
    %c2 = arith.constant 2 : index
    %c0_11 = arith.constant 0 : index
    %c0_12 = arith.constant 0 : index
    %18 = vector.load %arg2[%c2, %c0_11, %c0_12] : memref<3x8x4xbf16, #tpu.memory_space<vmem>>, vector<1x8x4xbf16>
    %19 = vector.shape_cast %18 : vector<1x8x4xbf16> to vector<8x4xbf16>
    %20 = arith.truncf %17 : vector<4x1024xf32> to vector<4x1024xbf16>
    %cst_13 = arith.constant dense<0.000000e+00> : vector<8x1024xf32>
    %21 = tpu.matmul %19, %20, %cst_13 {dimension_numbers = #tpu.dot_dimension_numbers<[1], [0], [0], [1], [0, 0, 1, 1], [], []>} : vector<8x4xbf16>, vector<4x1024xbf16>, vector<8x1024xf32> -> vector<8x1024xf32>
    %22 = arith.addf %13, %21 : vector<8x1024xf32>
    %c0_14 = arith.constant 0 : index
    %c0_15 = arith.constant 0 : index
    %23 = vector.load %arg3[%c0_14, %c0_15] : memref<8x1xf32, #tpu.memory_space<vmem>>, vector<8x1xf32>
    %24 = vector.broadcast %23 : vector<8x1xf32> to vector<8x1024xf32>
    %25 = arith.addf %22, %24 : vector<8x1024xf32>
    %cst_16 = arith.constant 0.000000e+00 : f32
    %26 = vector.broadcast %cst_16 : f32 to vector<8x1024xf32>
    %27 = arith.maximumf %25, %26 : vector<8x1024xf32>
    %c1023_i32_17 = arith.constant 1023 : i32
    %28 = tpu.dynamic_rotate %27 by %c1023_i32_17 dim 1 : vector<8x1024xf32>, i32 -> vector<8x1024xf32>
    %29 = arith.maximumf %27, %28 : vector<8x1024xf32>
    %30 = arith.truncf %29 : vector<8x1024xf32> to vector<8x1024xbf16>
    %c0_18 = arith.constant 0 : index
    %c0_19 = arith.constant 0 : index
    %31 = vector.load %arg5[%c0_18, %c0_19] : memref<1024x512xbf16, #tpu.memory_space<vmem>>, vector<1024x512xbf16>
    %cst_20 = arith.constant dense<0.000000e+00> : vector<8x512xf32>
    %32 = tpu.matmul %30, %31, %cst_20 {dimension_numbers = #tpu.dot_dimension_numbers<[1], [0], [0], [1], [0, 0, 1, 1], [], []>} : vector<8x1024xbf16>, vector<1024x512xbf16>, vector<8x512xf32> -> vector<8x512xf32>
    %c1_21 = arith.constant 1 : index
    %c0_22 = arith.constant 0 : index
    %c0_23 = arith.constant 0 : index
    %33 = vector.load %arg6[%c1_21, %c0_22, %c0_23] : memref<3x16x8xbf16, #tpu.memory_space<vmem>>, vector<1x16x8xbf16>
    %34 = vector.shape_cast %33 : vector<1x16x8xbf16> to vector<16x8xbf16>
    %35 = arith.truncf %32 : vector<8x512xf32> to vector<8x512xbf16>
    %cst_24 = arith.constant dense<0.000000e+00> : vector<16x512xf32>
    %36 = tpu.matmul %34, %35, %cst_24 {dimension_numbers = #tpu.dot_dimension_numbers<[1], [0], [0], [1], [0, 0, 1, 1], [], []>} : vector<16x8xbf16>, vector<8x512xbf16>, vector<16x512xf32> -> vector<16x512xf32>
    %c1_i32_25 = arith.constant 1 : i32
    %37 = tpu.dynamic_rotate %32 by %c1_i32_25 dim 1 : vector<8x512xf32>, i32 -> vector<8x512xf32>
    %c0_26 = arith.constant 0 : index
    %c0_27 = arith.constant 0 : index
    %38 = vector.load %arg8[%c0_26, %c0_27] : memref<2x512xf32, #tpu.memory_space<vmem>>, vector<1x512xf32>
    %39 = vector.broadcast %38 : vector<1x512xf32> to vector<8x512xf32>
    %40 = arith.mulf %37, %39 : vector<8x512xf32>
    %c0_28 = arith.constant 0 : index
    %c0_29 = arith.constant 0 : index
    %c0_30 = arith.constant 0 : index
    %41 = vector.load %arg6[%c0_28, %c0_29, %c0_30] : memref<3x16x8xbf16, #tpu.memory_space<vmem>>, vector<1x16x8xbf16>
    %42 = vector.shape_cast %41 : vector<1x16x8xbf16> to vector<16x8xbf16>
    %43 = arith.truncf %40 : vector<8x512xf32> to vector<8x512xbf16>
    %cst_31 = arith.constant dense<0.000000e+00> : vector<16x512xf32>
    %44 = tpu.matmul %42, %43, %cst_31 {dimension_numbers = #tpu.dot_dimension_numbers<[1], [0], [0], [1], [0, 0, 1, 1], [], []>} : vector<16x8xbf16>, vector<8x512xbf16>, vector<16x512xf32> -> vector<16x512xf32>
    %45 = arith.addf %36, %44 : vector<16x512xf32>
    %c511_i32 = arith.constant 511 : i32
    %46 = tpu.dynamic_rotate %32 by %c511_i32 dim 1 : vector<8x512xf32>, i32 -> vector<8x512xf32>
    %c1_32 = arith.constant 1 : index
    %c0_33 = arith.constant 0 : index
    %47 = vector.load %arg8[%c1_32, %c0_33] : memref<2x512xf32, #tpu.memory_space<vmem>>, vector<1x512xf32>
    %48 = vector.broadcast %47 : vector<1x512xf32> to vector<8x512xf32>
    %49 = arith.mulf %46, %48 : vector<8x512xf32>
    %c2_34 = arith.constant 2 : index
    %c0_35 = arith.constant 0 : index
    %c0_36 = arith.constant 0 : index
    %50 = vector.load %arg6[%c2_34, %c0_35, %c0_36] : memref<3x16x8xbf16, #tpu.memory_space<vmem>>, vector<1x16x8xbf16>
    %51 = vector.shape_cast %50 : vector<1x16x8xbf16> to vector<16x8xbf16>
    %52 = arith.truncf %49 : vector<8x512xf32> to vector<8x512xbf16>
    %cst_37 = arith.constant dense<0.000000e+00> : vector<16x512xf32>
    %53 = tpu.matmul %51, %52, %cst_37 {dimension_numbers = #tpu.dot_dimension_numbers<[1], [0], [0], [1], [0, 0, 1, 1], [], []>} : vector<16x8xbf16>, vector<8x512xbf16>, vector<16x512xf32> -> vector<16x512xf32>
    %54 = arith.addf %45, %53 : vector<16x512xf32>
    %c0_38 = arith.constant 0 : index
    %c0_39 = arith.constant 0 : index
    %55 = vector.load %arg7[%c0_38, %c0_39] : memref<16x1xf32, #tpu.memory_space<vmem>>, vector<16x1xf32>
    %56 = vector.broadcast %55 : vector<16x1xf32> to vector<16x512xf32>
    %57 = arith.addf %54, %56 : vector<16x512xf32>
    %cst_40 = arith.constant 0.000000e+00 : f32
    %58 = vector.broadcast %cst_40 : f32 to vector<16x512xf32>
    %59 = arith.maximumf %57, %58 : vector<16x512xf32>
    %c511_i32_41 = arith.constant 511 : i32
    %60 = tpu.dynamic_rotate %59 by %c511_i32_41 dim 1 : vector<16x512xf32>, i32 -> vector<16x512xf32>
    %61 = arith.maximumf %59, %60 : vector<16x512xf32>
    %62 = arith.truncf %61 : vector<16x512xf32> to vector<16x512xbf16>
    %c0_42 = arith.constant 0 : index
    %c0_43 = arith.constant 0 : index
    %63 = vector.load %arg9[%c0_42, %c0_43] : memref<512x256xbf16, #tpu.memory_space<vmem>>, vector<512x256xbf16>
    %cst_44 = arith.constant dense<0.000000e+00> : vector<16x256xf32>
    %64 = tpu.matmul %62, %63, %cst_44 {dimension_numbers = #tpu.dot_dimension_numbers<[1], [0], [0], [1], [0, 0, 1, 1], [], []>} : vector<16x512xbf16>, vector<512x256xbf16>, vector<16x256xf32> -> vector<16x256xf32>
    %c1_45 = arith.constant 1 : index
    %c0_46 = arith.constant 0 : index
    %c0_47 = arith.constant 0 : index
    %65 = vector.load %arg10[%c1_45, %c0_46, %c0_47] : memref<3x32x16xbf16, #tpu.memory_space<vmem>>, vector<1x32x16xbf16>
    %66 = vector.shape_cast %65 : vector<1x32x16xbf16> to vector<32x16xbf16>
    %67 = arith.truncf %64 : vector<16x256xf32> to vector<16x256xbf16>
    %cst_48 = arith.constant dense<0.000000e+00> : vector<32x256xf32>
    %68 = tpu.matmul %66, %67, %cst_48 {dimension_numbers = #tpu.dot_dimension_numbers<[1], [0], [0], [1], [0, 0, 1, 1], [], []>} : vector<32x16xbf16>, vector<16x256xbf16>, vector<32x256xf32> -> vector<32x256xf32>
    %c1_i32_49 = arith.constant 1 : i32
    %69 = tpu.dynamic_rotate %64 by %c1_i32_49 dim 1 : vector<16x256xf32>, i32 -> vector<16x256xf32>
    %c0_50 = arith.constant 0 : index
    %c0_51 = arith.constant 0 : index
    %70 = vector.load %arg12[%c0_50, %c0_51] : memref<2x256xf32, #tpu.memory_space<vmem>>, vector<1x256xf32>
    %71 = vector.broadcast %70 : vector<1x256xf32> to vector<16x256xf32>
    %72 = arith.mulf %69, %71 : vector<16x256xf32>
    %c0_52 = arith.constant 0 : index
    %c0_53 = arith.constant 0 : index
    %c0_54 = arith.constant 0 : index
    %73 = vector.load %arg10[%c0_52, %c0_53, %c0_54] : memref<3x32x16xbf16, #tpu.memory_space<vmem>>, vector<1x32x16xbf16>
    %74 = vector.shape_cast %73 : vector<1x32x16xbf16> to vector<32x16xbf16>
    %75 = arith.truncf %72 : vector<16x256xf32> to vector<16x256xbf16>
    %cst_55 = arith.constant dense<0.000000e+00> : vector<32x256xf32>
    %76 = tpu.matmul %74, %75, %cst_55 {dimension_numbers = #tpu.dot_dimension_numbers<[1], [0], [0], [1], [0, 0, 1, 1], [], []>} : vector<32x16xbf16>, vector<16x256xbf16>, vector<32x256xf32> -> vector<32x256xf32>
    %77 = arith.addf %68, %76 : vector<32x256xf32>
    %c255_i32 = arith.constant 255 : i32
    %78 = tpu.dynamic_rotate %64 by %c255_i32 dim 1 : vector<16x256xf32>, i32 -> vector<16x256xf32>
    %c1_56 = arith.constant 1 : index
    %c0_57 = arith.constant 0 : index
    %79 = vector.load %arg12[%c1_56, %c0_57] : memref<2x256xf32, #tpu.memory_space<vmem>>, vector<1x256xf32>
    %80 = vector.broadcast %79 : vector<1x256xf32> to vector<16x256xf32>
    %81 = arith.mulf %78, %80 : vector<16x256xf32>
    %c2_58 = arith.constant 2 : index
    %c0_59 = arith.constant 0 : index
    %c0_60 = arith.constant 0 : index
    %82 = vector.load %arg10[%c2_58, %c0_59, %c0_60] : memref<3x32x16xbf16, #tpu.memory_space<vmem>>, vector<1x32x16xbf16>
    %83 = vector.shape_cast %82 : vector<1x32x16xbf16> to vector<32x16xbf16>
    %84 = arith.truncf %81 : vector<16x256xf32> to vector<16x256xbf16>
    %cst_61 = arith.constant dense<0.000000e+00> : vector<32x256xf32>
    %85 = tpu.matmul %83, %84, %cst_61 {dimension_numbers = #tpu.dot_dimension_numbers<[1], [0], [0], [1], [0, 0, 1, 1], [], []>} : vector<32x16xbf16>, vector<16x256xbf16>, vector<32x256xf32> -> vector<32x256xf32>
    %86 = arith.addf %77, %85 : vector<32x256xf32>
    %c0_62 = arith.constant 0 : index
    %c0_63 = arith.constant 0 : index
    %87 = vector.load %arg11[%c0_62, %c0_63] : memref<32x1xf32, #tpu.memory_space<vmem>>, vector<32x1xf32>
    %88 = vector.broadcast %87 : vector<32x1xf32> to vector<32x256xf32>
    %89 = arith.addf %86, %88 : vector<32x256xf32>
    %cst_64 = arith.constant 0.000000e+00 : f32
    %90 = vector.broadcast %cst_64 : f32 to vector<32x256xf32>
    %91 = arith.maximumf %89, %90 : vector<32x256xf32>
    %c255_i32_65 = arith.constant 255 : i32
    %92 = tpu.dynamic_rotate %91 by %c255_i32_65 dim 1 : vector<32x256xf32>, i32 -> vector<32x256xf32>
    %93 = arith.maximumf %91, %92 : vector<32x256xf32>
    %94 = arith.truncf %93 : vector<32x256xf32> to vector<32x256xbf16>
    %c0_66 = arith.constant 0 : index
    %c0_67 = arith.constant 0 : index
    %95 = vector.load %arg13[%c0_66, %c0_67] : memref<256x128xbf16, #tpu.memory_space<vmem>>, vector<256x128xbf16>
    %cst_68 = arith.constant dense<0.000000e+00> : vector<32x128xf32>
    %96 = tpu.matmul %94, %95, %cst_68 {dimension_numbers = #tpu.dot_dimension_numbers<[1], [0], [0], [1], [0, 0, 1, 1], [], []>} : vector<32x256xbf16>, vector<256x128xbf16>, vector<32x128xf32> -> vector<32x128xf32>
    %c0_69 = arith.constant 0 : index
    %c0_70 = arith.constant 0 : index
    %97 = vector.load %arg14[%c0_69, %c0_70] : memref<32x128xf32, #tpu.memory_space<vmem>>, vector<32x128xf32>
    tpu.vector_store %arg14[%c0_69, %c0_70], %96 {strides = array<i32>} : memref<32x128xf32, #tpu.memory_space<vmem>>, vector<32x128xf32>,
    return
  }
  func.func @transform_0(%arg0: i32) -> (i32, i32) {
    %c0_i32 = arith.constant 0 : i32
    %c0_i32_0 = arith.constant 0 : i32
    return %c0_i32, %arg0 : i32, i32
  }
  func.func @transform_1(%arg0: i32) -> (i32, i32, i32) {
    %c0_i32 = arith.constant 0 : i32
    %c0_i32_0 = arith.constant 0 : i32
    %c0_i32_1 = arith.constant 0 : i32
    %c0_i32_2 = arith.constant 0 : i32
    return %c0_i32, %c0_i32_0, %c0_i32_1 : i32, i32, i32
  }
  func.func @transform_2(%arg0: i32) -> (i32, i32) {
    %c0_i32 = arith.constant 0 : i32
    %c0_i32_0 = arith.constant 0 : i32
    %c0_i32_1 = arith.constant 0 : i32
    return %c0_i32, %c0_i32_0 : i32, i32
  }
  func.func @transform_3(%arg0: i32) -> (i32, i32) {
    %c0_i32 = arith.constant 0 : i32
    %c0_i32_0 = arith.constant 0 : i32
    %c0_i32_1 = arith.constant 0 : i32
    return %c0_i32, %c0_i32_0 : i32, i32
  }
  func.func @transform_4(%arg0: i32) -> (i32, i32) {
    %c0_i32 = arith.constant 0 : i32
    %c0_i32_0 = arith.constant 0 : i32
    %c0_i32_1 = arith.constant 0 : i32
    return %c0_i32, %c0_i32_0 : i32, i32
  }
  func.func @transform_5(%arg0: i32) -> (i32, i32, i32) {
    %c0_i32 = arith.constant 0 : i32
    %c0_i32_0 = arith.constant 0 : i32
    %c0_i32_1 = arith.constant 0 : i32
    %c0_i32_2 = arith.constant 0 : i32
    return %c0_i32, %c0_i32_0, %c0_i32_1 : i32, i32, i32
  }
  func.func @transform_6(%arg0: i32) -> (i32, i32) {
    %c0_i32 = arith.constant 0 : i32
    %c0_i32_0 = arith.constant 0 : i32
    %c0_i32_1 = arith.constant 0 : i32
    return %c0_i32, %c0_i32_0 : i32, i32
  }
  func.func @transform_7(%arg0: i32) -> (i32, i32) {
    %c0_i32 = arith.constant 0 : i32
    %c0_i32_0 = arith.constant 0 : i32
    %c0_i32_1 = arith.constant 0 : i32
    return %c0_i32, %c0_i32_0 : i32, i32
  }
  func.func @transform_8(%arg0: i32) -> (i32, i32) {
    %c0_i32 = arith.constant 0 : i32
    %c0_i32_0 = arith.constant 0 : i32
    %c0_i32_1 = arith.constant 0 : i32
    return %c0_i32, %c0_i32_0 : i32, i32
  }
  func.func @transform_9(%arg0: i32) -> (i32, i32, i32) {
    %c0_i32 = arith.constant 0 : i32
    %c0_i32_0 = arith.constant 0 : i32
    %c0_i32_1 = arith.constant 0 : i32
    %c0_i32_2 = arith.constant 0 : i32
    return %c0_i32, %c0_i32_0, %c0_i32_1 : i32, i32, i32
  }
  func.func @transform_10(%arg0: i32) -> (i32, i32) {
    %c0_i32 = arith.constant 0 : i32
    %c0_i32_0 = arith.constant 0 : i32
    %c0_i32_1 = arith.constant 0 : i32
    return %c0_i32, %c0_i32_0 : i32, i32
  }
  func.func @transform_11(%arg0: i32) -> (i32, i32) {
    %c0_i32 = arith.constant 0 : i32
    %c0_i32_0 = arith.constant 0 : i32
    %c0_i32_1 = arith.constant 0 : i32
    return %c0_i32, %c0_i32_0 : i32, i32
  }
  func.func @transform_12(%arg0: i32) -> (i32, i32) {
    %c0_i32 = arith.constant 0 : i32
    %c0_i32_0 = arith.constant 0 : i32
    %c0_i32_1 = arith.constant 0 : i32
    return %c0_i32, %c0_i32_0 : i32, i32
  }
  func.func @transform_13(%arg0: i32) -> (i32, i32) {
    %c0_i32 = arith.constant 0 : i32
    %c0_i32_0 = arith.constant 0 : i32
    return %c0_i32, %arg0 : i32, i32
  }
}

</mosaic_0001>

<bundles_post_ra>
// kernel: tpu_custom_call.1
= control target key start
LH: loop header
LB: loop body
LE: loop exit
PB: predicated region body
PF: predicated region fallthrough
CT: control target
= control target key end

     0   :  { %s7628_s0 = inlined_call_operand.vmem [shape: f32[4,2048], index: 0, kind: input, shape index: {}]   ;;  %s7629_s1 = inlined_call_operand.vmem [shape: bf16[3,8,4], index: 1, kind: input, shape index: {}]   ;;  %s7630_s2 = inlined_call_operand.vmem [shape: f32[8,1], index: 2, kind: input, shape index: {}]   ;;  %s7631_s3 = inlined_call_operand.vmem [shape: f32[2,1024], index: 3, kind: input, shape index: {}]   ;;  %s7632_s4 = inlined_call_operand.hbm [shape: bf16[1024,512], index: 4, kind: input, shape index: {}]   ;;  %s7633_s5 = inlined_call_operand.vmem [shape: bf16[3,16,8], index: 5, kind: input, shape index: {}]   ;;  %s7634_s6 = inlined_call_operand.vmem [shape: f32[16,1], index: 6, kind: input, shape index: {}]   ;;  %s7635_s7 = inlined_call_operand.vmem [shape: f32[2,512], index: 7, kind: input, shape index: {}]   ;;  %s7636_s8 = inlined_call_operand.hbm [shape: bf16[512,256], index: 8, kind: input, shape index: {}]   ;;  %s7637_s9 = inlined_call_operand.vmem [shape: bf16[3,32,16], index: 9, kind: input, shape index: {}]   ;;  %s7638_s10 = inlined_call_operand.vmem [shape: f32[32,1], index: 10, kind: input, shape index: {}]   ;;  %s7639_s11 = inlined_call_operand.vmem [shape: f32[2,256], index: 11, kind: input, shape index: {}]   ;;  %s7640_s12 = inlined_call_operand.hbm [shape: bf16[256,128], index: 12, kind: input, shape index: {}]   ;;  %s7641_s13 = inlined_call_operand.hbm [shape: f32[32,256], index: 13, kind: output, shape index: {}]  }
   0x1   :  { %7651 = sst [smem:[#allocation19_spill]] %s7632_s4 }
   0x2   :  { %7652 = sst [smem:[#allocation20_spill]] %s7636_s8 }
   0x3   :  { %7653 = sst [smem:[#allocation21_spill]] %s7641_s13 }
   0x4   :  { %18 = vsyncpa [#allocation3], 0 }
   0x5   :  { %19 = vsyncpa [#allocation6], 0 }
   0x6   :  { %20 = vsyncpa [#allocation4], 0 }
   0x7   :  { %22 = vsyncpa [#allocation4 + $0x1], 0  ;;  %s6775_s25 = smov 0   ;;  %s6777_s26 = smov 0  }
   0x8   :  { %s6779_s27 = smov 0   ;;  %s6781_s28 = smov 0  }
   0x9 LB: > { %7654 = sst [smem:[#allocation12_spill]] %s6676_s25  ;;  %s6796_s29 = sadd.s32 4294967295, %s6688_s28   ;;  %s6688_s28 = sphi %s6781_s28, %s7672_s28   ;;  %s6684_s27 = sphi %s6779_s27, %s7674_s27   ;;  %s6680_s26 = sphi %s6777_s26, %s7676_s26   ;;  %s6676_s25 = sphi %s6775_s25, %s7675_s25  }
   0xa   : > { %7655 = sst [smem:[#allocation13_spill]] %s6684_s27  ;;  %s4581_s30 = sadd.s32 4294967294, %s6688_s28  }
   0xb   : > { %7656 = sst [smem:[#allocation14_spill]] %s6688_s28  ;;  %s6800_s14 = sadd.s32 1, %s6688_s28  }
   0xc   : > { %7657 = sst [smem:[#allocation15_spill]] %s6800_s14  ;;  %s313_s15 = sadd.s32 1, %s6684_s27 }
   0xd   : > { %s310_s16 = ssub.s32 %s6688_s28, %s6800_s14  ;;  %p323_p0 = scmp.ne.s32.totalorder %s6684_s27, %s6680_s26 }
   0xe   : > { %p311_p1 = scmp.eq.s32.totalorder %s310_s16, 0  ;;  %p324_p2 = scmp.eq.s32.totalorder %s6796_s29, 1 }
   0xf   : > { %p329_p3 = scmp.ne.s32.totalorder %s6680_s26, %s6676_s25  ;;  %p330_p4 = scmp.eq.s32.totalorder %s4581_s30, 1 }
  0x10   : > { %s6811_s17 = scalar_select %p311_p1, %s6684_s27, %s313_s15  }
  0x11   : > { %p6813_p5 = por %p324_p2, %p323_p0  ;;  %p6817_p6 = por %p330_p4, %p329_p3 }
  0x12   : > { %7658 = sst [smem:[#allocation16_spill]] %s6811_s17  ;;  %p4582_p7 = scmp.ge.s32.totalorder %s6688_s28, 1 }
  0x13   : > { %s7659_s18 = scalar_select %p6813_p5, 1, 0 }
  0x14   : > { %s7661_s19 = scalar_select %p6817_p6, 1, 0 }
  0x15   : > { %7660 = sst [smem:[#allocation17_spill]] %s7659_s18  ;;  %p337_p8 = scmp.lt.s32.totalorder %s6688_s28, 3 }
  0x16   : > { %7662 = sst [smem:[#allocation18_spill]] %s7661_s19  ;;  %p6416_p9 = scmp.eq.s32.totalorder %s6796_s29, 0 }
  0x17   : > { %p6824_p10 = pnand %p4582_p7, %p337_p8  ;;  %s7664_s8 = sld [smem:[#allocation20_spill]] }
  0x18   : > { %s6690_s24 = smov [#allocation5]   ;;  %s7666_s4 = sld [smem:[#allocation19_spill]] }
  0x19   : > { %p6402_p11 = pneg %p6824_p10  ;;  %s382_s30 = sshll.u32 %s6690_s24, 4  ;;  %s383_s30 = int_to_ptr.vmem [resolvable:$true] %s382_s30 }
  0x1a   : > { %s6691_s21 = smov 128   ;;  %s6692_s22 = smov 8  }
  0x1b   : > { %p6835_p12 = pnand %p6416_p9, %p6402_p11  ;;  %s6694_s14 = smov 256  }
  0x1c   : > { %s6695_s19 = smov 16   ;;  %s403_s17 = sshll.u32 %s7640_s12, 4  ;;  %s404_s17 = int_to_ptr.hbm [resolvable:$true] %s403_s17 }
  0x1d   : > { %s380_s23 = sshll.u32 %s7664_s8, 4  ;;  %s6693_s8 = smov [#allocation2]   ;;  %s381_s23 = int_to_ptr.hbm [resolvable:$true] %s380_s23 }
  0x1e   : > { %s357_s27 = sshll.u32 %s7666_s4, 4  ;;  %s359_s24 = sshll.u32 %s6693_s8, 4  ;;  %s358_s27 = int_to_ptr.hbm [resolvable:$true] %s357_s27  ;;  %s360_s24 = int_to_ptr.vmem [resolvable:$true] %s359_s24 }
  0x1f   : > { %6408 = dma.hbm_to_vmem [thread:$0]  (!%p6835_p12), %s381_s23, 8192, %s383_s30, [#allocation6], %s6691_s21, %s6691_s21, %s6692_s22  }
  0x20   : > { %6405 = dma.hbm_to_vmem [thread:$0]  (!%p6835_p12), %s358_s27, 32768, %s360_s24, [#allocation3], %s6694_s14, %s6694_s14, %s6695_s19  }
  0x21   : > { %s6696_s16 = smov [#allocation7]   ;;  %s6697_s18 = smov 64  }
  0x22   : > { %s405_s4 = sshll.u32 %s6696_s16, 4  ;;  %s6698_s13 = smov 4   ;;  %s406_s4 = int_to_ptr.vmem [resolvable:$true] %s405_s4 }
  0x23   : > { %6411 = dma.hbm_to_vmem [thread:$0]  (!%p6835_p12), %s404_s17, 2048, %s406_s4, [#allocation6], %s6697_s18, %s6697_s18, %s6698_s13  }
  0x24   : > { %430 = sbr.rel (%p6824_p10) target bundleno = 2027 (0x7eb), region = 72 }
  0x29   : > { %6663 = dma.done.wait (%p6416_p9), [#allocation3], 32768  }
  0x2a   : > { %6665 = vsyncadd (%p6416_p9), [#allocation3], 4294934528 }
  0x2b   : > { %6667 = dma.done.wait (%p6416_p9), [#allocation6], 10240  }
  0x2c   : > { %6669 = vsyncadd (%p6416_p9), [#allocation6], 4294957056  ;;  %s6862_s8 = sshll.u32 %s6796_s29, 3  ;;  %s6699_s29 = smov 1   ;;  %v572_v29 = vlaneseq  ;;  %v583_v31 = vld [vmem:[%s7631_s3] ss:$2 sm:$0xff] }
  0x2d   : > { %p486_p13 = scmp.lt.s32.totalorder %s6862_s8, 15  ;;  %s6700_s14 = smov 127   ;;  %v586_v32 = vperm.slane %v583_v31, 1  ;;  %v589_v37 = vperm.slane %v583_v31, 4  ;;  %vm622_vm1 = vcmask 1041408   ;;  %v585_v43 = vperm.slane %v583_v31, 0 }
  0x2e   : > { %v6901_v30 = vand.u32 127, %v572_v29  ;;  %v587_v44 = vperm.slane %v583_v31, 2  ;;  %v588_v45 = vperm.slane %v583_v31, 3  ;;  %v6915_v46 = vld [vmem:[%s7629_s1] sm:$0xf]  ;;  %vm618_vm2 = vcmask 31744  }
  0x2f   : > { %s487_s4 = scalar_select %p486_p13, %s6862_s8, 15  ;;  %v592_v60 = vperm.slane %v583_v31, 7  ;;  %v590_v61 = vperm.slane %v583_v31, 5  ;;  %vm3168_vm4 = vcmask 1043456   ;;  %vm3164_vm5 = vcmask 64512  }
  0x30   : > { %vm574_vm0 = vcmp.lt.s32.totalorder %v6901_v30, 1  ;;  %vm921_vm3 = vcmp.lt.s32.totalorder %v6901_v30, 127  ;;  %vm4036_vm6 = vcmask 130048   ;;  %s7667_s30 = sld [smem:[#allocation21_spill]] }
  0x31   : > { %s4593_s13 = sshll.u32 %s487_s4, 2 }
  0x32   : > { %s489_s28 = scalar_lea.vmem %s7628_s0, %s4593_s13 }
  0x33   : > { %v492_v0 = vld [vmem:[%s489_s28] sm:$0xff]  ;;  %v493_v1 = vld [vmem:[%s489_s28 + $0x8] sm:$0xff]  ;;  %v495_v2 = vld [vmem:[%s489_s28 + $0x18] sm:$0xff] }
  0x34   : > { %502 = vst [vmem:[#allocation1] ss:$2 sm:$0xff] %v492_v0  ;;  %v494_v3 = vld [vmem:[%s489_s28 + $0x10] sm:$0xff] }
  0x35   : > { %504 = vst [vmem:[#allocation1 + $0x10] ss:$2 sm:$0xff] %v493_v1 }
  0x36   : > { %508 = vst [vmem:[#allocation1 + $0x30] ss:$2 sm:$0xff] %v495_v2  ;;  %s4484_s21 = scalar_lea.hbm %s7667_s30, %s6862_s8  ;;  %s6638_s8 = scalar_lea.hbm %s7667_s30, 64 }
  0x37   : > { %506 = vst [vmem:[#allocation1 + $0x20] ss:$2 sm:$0xff] %v494_v3  ;;  %s4487_s24 = sshll.u32 %s4484_s21, 4  ;;  %s4488_s24 = int_to_ptr.hbm [resolvable:$true] %s4487_s24 }
  0x38   : > { %s6632_s16 = sshra.s32 %s4488_s24, 4  ;;  %s6633_s16 = int_to_ptr.hbm [resolvable:$true] %s6632_s16 }
  0x39   : > { %s6634_s4 = scalar_lea.hbm %s6633_s16, 32  ;;  %p6639_p3 = scmp.lt.s32.totalorder %s6633_s16, %s7667_s30 }
  0x3a   : > { %p6635_p0 = scmp.ne.s32.totalorder %s6633_s16, %s6634_s4  ;;  %p6640_p4 = scmp.lt.s32.totalorder %s6638_s8, %s6634_s4 }
  0x3b   : > { %v6869_v4 = vld.sshfl [vmem:[#allocation1] sm:$0xff pattern:$0x75316420]  ;;  %v6871_v5 = vld.sshfl [vmem:[#allocation1 + $0x8] sm:$0xff pattern:$0x75316420] }
  0x3c   : > { %533 = vst [vmem:[#allocation1] ss:$2 sm:$0xff] %v492_v0  ;;  %v6873_v6 = vld.sshfl [vmem:[#allocation1 + $0x10] sm:$0xff pattern:$0x75316420]  ;;  %v525_v59 = vpack.c.bf16 %v6869_v4, %v6869_v4  ;;  %v526_v4 = vpack.c.bf16 %v6871_v5, %v6871_v5  ;;  %p6636_p1 = pnand %p6635_p0, %p6813_p5  ;;  %p6641_p7 = por %p6640_p4, %p6639_p3 }
  0x3d   : > { %v6875_v7 = vld.sshfl [vmem:[#allocation1 + $0x18] sm:$0xff pattern:$0x75316420]  ;;  %v6877_v8 = vld.sshfl [vmem:[#allocation1 + $0x30] sm:$0xff pattern:$0x75316420] }
  0x3e   : > { %535 = vst [vmem:[#allocation1 + $0x10] ss:$2 sm:$0xff] %v493_v1  ;;  %v6879_v9 = vld.sshfl [vmem:[#allocation1 + $0x38] sm:$0xff pattern:$0x75316420]  ;;  %p6637_p2 = pneg %p6636_p1 }
  0x3f   : > { %539 = vst [vmem:[#allocation1 + $0x30] ss:$2 sm:$0xff] %v495_v2  ;;  %v6881_v10 = vld.sshfl [vmem:[#allocation1 + $0x20] sm:$0xff pattern:$0x75316420] }
  0x40   : > { %v6883_v11 = vld.sshfl [vmem:[#allocation1 + $0x28] sm:$0xff pattern:$0x75316420]  ;;  %p6642_p8 = pnand %p6641_p7, %p6637_p2 }
  0x41   : > { %537 = vst [vmem:[#allocation1 + $0x20] ss:$2 sm:$0xff] %v494_v3 }
  0x43   : > { %v541_v12 = vld.sshfl [vmem:[#allocation1 + $0x8] sm:$0xff pattern:$0x75316420]  ;;  %v540_v13 = vld.sshfl [vmem:[#allocation1] sm:$0xff pattern:$0x75316420] }
  0x44   : > { %558 = vrot.lane.b32.xlu1 %v541_v12, %s6699_s29  ;;  %556 = vrot.lane.b32.xlu0 %v540_v13, %s6699_s29  ;;  %882 = vst [vmem:[#allocation1] ss:$2 sm:$0xff] %v492_v0  ;;  %v755_v13 = vsel %vm622_vm1, %v525_v59, 0 }
  0x45   : > { %v543_v14 = vld.sshfl [vmem:[#allocation1 + $0x18] sm:$0xff pattern:$0x75316420]  ;;  %v542_v17 = vld.sshfl [vmem:[#allocation1 + $0x10] sm:$0xff pattern:$0x75316420] }
  0x46   : > { %v547_v15 = vld.sshfl [vmem:[#allocation1 + $0x38] sm:$0xff pattern:$0x75316420]  ;;  %v546_v16 = vld.sshfl [vmem:[#allocation1 + $0x30] sm:$0xff pattern:$0x75316420]  ;;  %562 = vrot.lane.b32.xlu2 %v543_v14, %s6699_s29  ;;  %v527_v14 = vpack.c.bf16 %v6873_v6, %v6873_v6 }
  0x47   : > { %888 = vst [vmem:[#allocation1 + $0x30] ss:$2 sm:$0xff] %v495_v2  ;;  %v591_v2 = vperm.slane %v583_v31, 6 }
  0x48   : > { %884 = vst [vmem:[#allocation1 + $0x10] ss:$2 sm:$0xff] %v493_v1  ;;  %v545_v18 = vld.sshfl [vmem:[#allocation1 + $0x28] sm:$0xff pattern:$0x75316420] }
  0x49   : > { %v544_v19 = vld.sshfl [vmem:[#allocation1 + $0x20] sm:$0xff pattern:$0x75316420] }
  0x4a   : > { %886 = vst [vmem:[#allocation1 + $0x20] ss:$2 sm:$0xff] %v494_v3 }
  0x4b   : > { %v889_v20 = vld.sshfl [vmem:[#allocation1] sm:$0xff pattern:$0x75316420]  ;;  %v890_v21 = vld.sshfl [vmem:[#allocation1 + $0x8] sm:$0xff pattern:$0x75316420] }
  0x4c   : > { %560 = vrot.lane.b32.xlu1 %v542_v17, %s6699_s29  ;;  %570 = vrot.lane.b32.xlu0 %v547_v15, %s6699_s29 }
  0x4e   : > { %564 = vrot.lane.b32.xlu2 %v544_v19, %s6699_s29  ;;  %v895_v26 = vld.sshfl [vmem:[#allocation1 + $0x30] sm:$0xff pattern:$0x75316420]  ;;  %v896_v27 = vld.sshfl [vmem:[#allocation1 + $0x38] sm:$0xff pattern:$0x75316420] }
  0x4f   : > { %v891_v22 = vld.sshfl [vmem:[#allocation1 + $0x10] sm:$0xff pattern:$0x75316420]  ;;  %v892_v23 = vld.sshfl [vmem:[#allocation1 + $0x18] sm:$0xff pattern:$0x75316420] }
  0x51   : > { %v893_v24 = vld.sshfl [vmem:[#allocation1 + $0x20] sm:$0xff pattern:$0x75316420]  ;;  %v894_v25 = vld.sshfl [vmem:[#allocation1 + $0x28] sm:$0xff pattern:$0x75316420] }
  0x54   : > { %568 = vrot.lane.b32.xlu1 %v546_v16, %s6699_s29  ;;  %566 = vrot.lane.b32.xlu0 %v545_v18, %s6699_s29  ;;  %v528_v18 = vpack.c.bf16 %v6875_v7, %v6875_v7  ;;  %v758_v7 = vsel %vm622_vm1, %v526_v4, 0 }
  0x56   : > { %905 = vrot.lane.b32.xlu2 %v889_v20, %s6700_s14 }
  0x5c   : > { %907 = vrot.lane.b32.xlu0 %v890_v21, %s6700_s14  ;;  %909 = vrot.lane.b32.xlu1 %v891_v22, %s6700_s14 }
  0x5e   : > { %911 = vrot.lane.b32.xlu2 %v892_v23, %s6700_s14  ;;  %v530_v23 = vpack.c.bf16 %v6883_v11, %v6883_v11  ;;  %v6965_v11 = vld [vmem:[%s7631_s3 + $0x1] ss:$2 sm:$0xff] }
  0x5f   : > { %v940_v4 = vperm.slane %v6965_v11, 7 }
  0x60   : > { %v770_v29 = vsel %vm622_vm1, %v530_v23, 0 }
  0x64   : > { %913 = vrot.lane.b32.xlu0 %v893_v24, %s6700_s14  ;;  %915 = vrot.lane.b32.xlu1 %v894_v25, %s6700_s14  ;;  %v761_v24 = vsel %vm622_vm1, %v527_v14, 0  ;;  %v939_v14 = vperm.slane %v6965_v11, 6 }
  0x66   : > { %917 = vrot.lane.b32.xlu2 %v895_v26, %s6700_s14 }
  0x6c   : > { %919 = vrot.lane.b32.xlu0 %v896_v27, %s6700_s14 }
  0xa0   : > { %v563_v28 = vpop.permute.xlu2 %562 }
  0xa8   : > { %v565_v33 = vpop.permute.xlu2 %564 }
  0xa9   : > { %v578_v39 = vsel %vm574_vm0, %v563_v28, %v565_v33 }
  0xaa   : > { %v605_v41 = vmul.f32 %v589_v37, %v578_v39  ;;  %v529_v37 = vpack.c.bf16 %v6881_v10, %v6881_v10 }
  0xac   : > { %v614_v52 = vpack.c.bf16 %v605_v41, %v605_v41 }
  0xae   : > { %v636_v62 = vsel %vm622_vm1, %v614_v52, 0 }
  0xb0   : > { %v6967_v31 = vpop.permute.xlu2 %905 }
  0xb6   : > { %v559_v34 = vpop.permute.xlu1 %558  ;;  %v557_v35 = vpop.permute.xlu0 %556 }
  0xb7   : > { %v581_v36 = vsel %vm574_vm0, %v557_v35, %v559_v34 }
  0xb8   : > { %v602_v38 = vmul.f32 %v586_v32, %v581_v36  ;;  %v532_v36 = vpack.c.bf16 %v6879_v9, %v6879_v9  ;;  %v933_v9 = vperm.slane %v6965_v11, 0 }
  0xba   : > { %v611_v40 = vpack.c.bf16 %v602_v38, %v602_v38  ;;  %v776_v41 = vsel %vm622_vm1, %v532_v36, 0 }
  0xbc   : > { %v627_v42 = vsel %vm622_vm1, %v611_v40, 0 }
  0xbd   : > { %667 = vmatpush.bf16.msra.mxu1 %v627_v42  ;;  %v767_v42 = vsel %vm622_vm1, %v529_v37, 0 }
  0xbe   : > { %v561_v47 = vpop.permute.xlu1 %560  ;;  %v571_v48 = vpop.permute.xlu0 %570 }
  0xbf   : > { %v579_v49 = vsel %vm574_vm0, %v561_v47, %v563_v28  ;;  %v580_v50 = vsel %vm574_vm0, %v559_v34, %v561_v47  ;;  %v582_v51 = vsel %vm574_vm0, %v571_v48, %v557_v35  ;;  %v764_v28 = vsel %vm622_vm1, %v528_v18, 0 }
  0xc0   : > { %4596 = vmatmul.msk.bf16.vlgmr.msra.gmra.mxu1 %vm618_vm2, %v6915_v46  ;;  %v601_v53 = vmul.f32 %v585_v43, %v582_v51  ;;  %v603_v54 = vmul.f32 %v587_v44, %v580_v50  ;;  %v604_v55 = vmul.f32 %v588_v45, %v579_v49  ;;  %v531_v34 = vpack.c.bf16 %v6877_v8, %v6877_v8  ;;  %v912_v8 = vpop.permute.xlu2 %911  ;;  %v4594_v49 = vld [vmem:[%s7629_s1 + $0x4] sm:$0xf] }
  0xc1   : > { %v934_v35 = vperm.slane %v6965_v11, 1  ;;  %v935_v45 = vperm.slane %v6965_v11, 2  ;;  %v936_v47 = vperm.slane %v6965_v11, 3 }
  0xc2   : > { %v610_v56 = vpack.c.bf16 %v601_v53, %v601_v53  ;;  %v612_v57 = vpack.c.bf16 %v603_v54, %v603_v54  ;;  %v613_v58 = vpack.c.bf16 %v604_v55, %v604_v55  ;;  %v773_v39 = vsel %vm622_vm1, %v531_v34, 0 }
  0xc4   : > { %v624_v63 = vsel %vm622_vm1, %v610_v56, 0  ;;  %v630_v0 = vsel %vm622_vm1, %v612_v57, 0  ;;  %v633_v1 = vsel %vm622_vm1, %v613_v58, 0  ;;  %v938_v57 = vperm.slane %v6965_v11, 5 }
  0xc5   : > { %654 = vmatpush.bf16.msra.mxu0 %v624_v63  ;;  %680 = vmatpush.bf16.msra.mxu2 %v630_v0 }
  0xc6   : > { %693 = vmatpush.bf16.msra.mxu3 %v633_v1  ;;  %v569_v3 = vpop.permute.xlu1 %568  ;;  %v567_v12 = vpop.permute.xlu0 %566 }
  0xc7   : > { %v575_v15 = vsel %vm574_vm0, %v569_v3, %v571_v48  ;;  %v576_v16 = vsel %vm574_vm0, %v567_v12, %v569_v3  ;;  %v577_v17 = vsel %vm574_vm0, %v565_v33, %v567_v12  ;;  %v937_v3 = vperm.slane %v6965_v11, 4 }
  0xc8   : > { %v608_v19 = vmul.f32 %v592_v60, %v575_v15  ;;  %v606_v20 = vmul.f32 %v590_v61, %v577_v17  ;;  %v607_v5 = vmul.f32 %v591_v2, %v576_v16  ;;  %4595 = vmatmul.msk.bf16.vlgmr.msra.gmra.mxu0 %vm618_vm2, %v6915_v46  ;;  %4597 = vmatmul.msk.bf16.vlgmr.msra.gmra.mxu2 %vm618_vm2, %v6915_v46  ;;  %v918_v55 = vpop.permute.xlu2 %917  ;;  %v1106_v2 = vld [vmem:[%s7630_s2] sm:$0xff]  ;;  %v6701_v15 = vmov 0  }
  0xc9   : > { %706 = vmatpush.bf16.msrb.mxu0 %v636_v62  ;;  %4598 = vmatmul.msk.bf16.vlgmr.msra.gmra.mxu3 %vm618_vm2, %v6915_v46 }
  0xca   : > { %v615_v6 = vpack.c.bf16 %v606_v20, %v606_v20  ;;  %v617_v21 = vpack.c.bf16 %v608_v19, %v608_v19  ;;  %v616_v22 = vpack.c.bf16 %v607_v5, %v607_v5  ;;  %6470 = vset.pattern.permute.xlu1 %v6701_v15  ;;  %6486 = vset.pattern.permute.xlu0 %v6701_v15 }
  0xcb   : > { %1109 = vperm.xlu1 %6470, %v1106_v2   ;;  %6507 = vset.pattern.permute.xlu2 %v6701_v15  ;;  %v6129_v15 = vld [vmem:[#allocation2 + $0x2ac] sm:$0xf0] }
  0xcc   : > { %v639_v25 = vsel %vm622_vm1, %v615_v6, 0  ;;  %v645_v26 = vsel %vm622_vm1, %v617_v21, 0  ;;  %v642_v27 = vsel %vm622_vm1, %v616_v22, 0 }
  0xcd   : > { %785 = vmatpush.bf16.msra.mxu0 %v755_v13  ;;  %719 = vmatpush.bf16.msrb.mxu1 %v639_v25  ;;  %v4612_v25 = vld [vmem:[%s7629_s1 + $0x8] sm:$0xf] }
  0xce   : > { %745 = vmatpush.bf16.msrb.mxu3 %v645_v26  ;;  %732 = vmatpush.bf16.msrb.mxu2 %v642_v27  ;;  %v910_v32 = vpop.permute.xlu1 %909  ;;  %v908_v33 = vpop.permute.xlu0 %907 }
  0xcf   : > { %v927_v38 = vsel %vm921_vm3, %v908_v33, %v910_v32  ;;  %v928_v43 = vsel %vm921_vm3, %v6967_v31, %v908_v33 }
  0xd0   : > { %4600 = vmatmul.msk.bf16.vlgmr.msrb.gmra.mxu1 %vm618_vm2, %v6915_v46  ;;  %v950_v40 = vmul.f32 %v934_v35, %v927_v38  ;;  %v949_v50 = vmul.f32 %v933_v9, %v928_v43 }
  0xd1   : > { %798 = vmatpush.bf16.msra.mxu1 %v758_v7 }
  0xd2   : > { %811 = vmatpush.bf16.msra.mxu2 %v761_v24  ;;  %824 = vmatpush.bf16.msra.mxu3 %v764_v28  ;;  %v960_v10 = vpack.c.bf16 %v950_v40, %v950_v40  ;;  %v959_v56 = vpack.c.bf16 %v949_v50, %v949_v50 }
  0xd4   : > { %v974_v51 = vsel %vm622_vm1, %v960_v10, 0  ;;  %v971_v61 = vsel %vm622_vm1, %v959_v56, 0 }
  0xd5   : > { %850 = vmatpush.bf16.msrb.mxu1 %v770_v29 }
  0xd6   : > { %v914_v44 = vpop.permute.xlu0 %913  ;;  %v916_v54 = vpop.permute.xlu1 %915 }
  0xd7   : > { %v925_v48 = vsel %vm921_vm3, %v912_v8, %v914_v44  ;;  %v923_v60 = vsel %vm921_vm3, %v916_v54, %v918_v55  ;;  %v924_v13 = vsel %vm921_vm3, %v914_v44, %v916_v54 }
  0xd8   : > { %4599 = vmatmul.msk.bf16.vlgmr.msrb.gmra.mxu0 %vm618_vm2, %v6915_v46  ;;  %4601 = vmatmul.msk.bf16.vlgmr.msrb.gmra.mxu2 %vm618_vm2, %v6915_v46  ;;  %v952_v53 = vmul.f32 %v936_v47, %v925_v48  ;;  %v954_v62 = vmul.f32 %v938_v57, %v923_v60  ;;  %v953_v18 = vmul.f32 %v937_v3, %v924_v13 }
  0xd9   : > { %4602 = vmatmul.msk.bf16.vlgmr.msrb.gmra.mxu3 %vm618_vm2, %v6915_v46  ;;  %863 = vmatpush.bf16.msrb.mxu2 %v773_v39  ;;  %v926_v46 = vsel %vm921_vm3, %v910_v32, %v912_v8 }
  0xda   : > { %876 = vmatpush.bf16.msrb.mxu3 %v776_v41  ;;  %837 = vmatpush.bf16.msrb.mxu0 %v767_v42  ;;  %v951_v52 = vmul.f32 %v935_v45, %v926_v46  ;;  %v962_v59 = vpack.c.bf16 %v952_v53, %v952_v53  ;;  %v964_v12 = vpack.c.bf16 %v954_v62, %v954_v62  ;;  %v4991_v62 = vld [vmem:[#allocation2 + $0x2e0] sm:$0xf] }
  0xdb   : > { %v963_v6 = vpack.c.bf16 %v953_v18, %v953_v18 }
  0xdc   : > { %v961_v58 = vpack.c.bf16 %v951_v52, %v951_v52  ;;  %v980_v63 = vsel %vm622_vm1, %v962_v59, 0  ;;  %v986_v19 = vsel %vm622_vm1, %v964_v12, 0  ;;  %v6133_v12 = vld [vmem:[#allocation2 + $0x2cc] sm:$0xf0] }
  0xdd   : > { %v983_v23 = vsel %vm622_vm1, %v963_v6, 0 }
  0xde   : > { %v977_v0 = vsel %vm622_vm1, %v961_v58, 0  ;;  %v920_v1 = vpop.permute.xlu0 %919 }
  0xdf   : > { %v929_v16 = vsel %vm921_vm3, %v920_v1, %v6967_v31  ;;  %v922_v17 = vsel %vm921_vm3, %v918_v55, %v920_v1 }
  0xe0   : > { %4604 = vmatmul.msk.bf16.vlgmr.msra.gmra.mxu1 %vm618_vm2, %v4594_v49  ;;  %v956_v20 = vmul.f32 %v940_v4, %v929_v16  ;;  %v955_v5 = vmul.f32 %v939_v14, %v922_v17  ;;  %v4959_v4 = vld [vmem:[#allocation2 + $0x2a0] sm:$0xf]  ;;  %v6073_v17 = vld [vmem:[#allocation2 + $0xec] sm:$0xf0] }
  0xe1   : > { %1014 = vmatpush.bf16.msra.mxu1 %v974_v51  ;;  %v4735_v16 = vld [vmem:[#allocation2 + $0xe0] sm:$0xf] }
  0xe2   : > { %v966_v21 = vpack.c.bf16 %v956_v20, %v956_v20  ;;  %v965_v22 = vpack.c.bf16 %v955_v5, %v955_v5  ;;  %v4736_v18 = vor.u32 %v6073_v17, %v4735_v16  ;;  %v6105_v20 = vld [vmem:[#allocation2 + $0x1ec] sm:$0xf0] }
  0xe4   : > { %v992_v7 = vsel %vm622_vm1, %v966_v21, 0  ;;  %v989_v24 = vsel %vm622_vm1, %v965_v22, 0 }
  0xe8   : > { %4603 = vmatmul.msk.bf16.vlgmr.msra.gmra.mxu0 %vm618_vm2, %v4594_v49  ;;  %4605 = vmatmul.msk.bf16.vlgmr.msra.gmra.mxu2 %vm618_vm2, %v4594_v49 }
  0xe9   : > { %4606 = vmatmul.msk.bf16.vlgmr.msra.gmra.mxu3 %vm618_vm2, %v4594_v49  ;;  %1001 = vmatpush.bf16.msra.mxu0 %v971_v61 }
  0xea   : > { %1040 = vmatpush.bf16.msra.mxu3 %v980_v63  ;;  %1027 = vmatpush.bf16.msra.mxu2 %v977_v0  ;;  %v6137_v63 = vld [vmem:[#allocation2 + $0x2ec] sm:$0xf0]  ;;  %v4975_v0 = vld [vmem:[#allocation2 + $0x2c0] sm:$0xf] }
  0xeb   : > { %v4992_v3 = vor.u32 %v6137_v63, %v4991_v62  ;;  %v4976_v14 = vor.u32 %v6133_v12, %v4975_v0  ;;  %v5119_v63 = vld [vmem:[#allocation2 + $0x3e0] sm:$0xf]  ;;  %v6169_v0 = vld [vmem:[#allocation2 + $0x3ec] sm:$0xf0] }
  0xf0   : > { %4608 = vmatmul.msk.bf16.vlgmr.msrb.gmra.mxu1 %vm618_vm2, %v4594_v49 }
  0xf1   : > { %1066 = vmatpush.bf16.msrb.mxu1 %v986_v19  ;;  %v4863_v19 = vld [vmem:[#allocation2 + $0x1e0] sm:$0xf] }
  0xf2   : > { %v4864_v22 = vor.u32 %v6105_v20, %v4863_v19  ;;  %v6057_v20 = vld [vmem:[#allocation2 + $0x6c] sm:$0xf0] }
  0xf8   : > { %4607 = vmatmul.msk.bf16.vlgmr.msrb.gmra.mxu0 %vm618_vm2, %v4594_v49  ;;  %4609 = vmatmul.msk.bf16.vlgmr.msrb.gmra.mxu2 %vm618_vm2, %v4594_v49 }
  0xf9   : > { %4610 = vmatmul.msk.bf16.vlgmr.msrb.gmra.mxu3 %vm618_vm2, %v4594_v49  ;;  %1053 = vmatpush.bf16.msrb.mxu0 %v983_v23  ;;  %v4719_v23 = vld [vmem:[#allocation2 + $0xc0] sm:$0xf] }
  0xfa   : > { %1092 = vmatpush.bf16.msrb.mxu3 %v992_v7  ;;  %1079 = vmatpush.bf16.msrb.mxu2 %v989_v24 }
 0x100   : > { %4614 = vmatmul.msk.bf16.vlgmr.msra.gmra.mxu1 %vm618_vm2, %v4612_v25 }
 0x101   : > { %2717 = vmatpush.bf16.msra.mxu1 %v4864_v22  ;;  %v6165_v22 = vld [vmem:[#allocation2 + $0x3cc] sm:$0xf0] }
 0x108   : > { %4613 = vmatmul.msk.bf16.vlgmr.msra.gmra.mxu0 %vm618_vm2, %v4612_v25  ;;  %4615 = vmatmul.msk.bf16.vlgmr.msra.gmra.mxu2 %vm618_vm2, %v4612_v25 }
 0x109   : > { %4616 = vmatmul.msk.bf16.vlgmr.msra.gmra.mxu3 %vm618_vm2, %v4612_v25  ;;  %2730 = vmatpush.bf16.msra.mxu2 %v4992_v3 }
 0x10a   : > { %2704 = vmatpush.bf16.msra.mxu0 %v4736_v18 }
 0x10d   : > { %2731 = vmatpush.bf16.msra.mxu2 %v4976_v14 }
 0x110   : > { %4618 = vmatmul.msk.bf16.vlgmr.msrb.gmra.mxu1 %vm618_vm2, %v4612_v25 }
 0x118   : > { %4617 = vmatmul.msk.bf16.vlgmr.msrb.gmra.mxu0 %vm618_vm2, %v4612_v25  ;;  %4619 = vmatmul.msk.bf16.vlgmr.msrb.gmra.mxu2 %vm618_vm2, %v4612_v25 }
 0x119   : > { %4620 = vmatmul.msk.bf16.vlgmr.msrb.gmra.mxu3 %vm618_vm2, %v4612_v25 }
 0x13d   : > { %v669_v26 = vpop.f32.mrf.mxu1  ;;  %v7055_v56 = vpop.permute.xlu1 %1109 }
 0x145   : > { %v656_v27 = vpop.f32.mrf.mxu0  ;;  %v671_v28 = vpop.f32.mrf.mxu1 }
 0x146   : > { %v4847_v28 = vld [vmem:[#allocation2 + $0x1c0] sm:$0xf] }
 0x14b   : > { %v682_v29 = vpop.f32.mrf.mxu2 }
 0x14c   : > { %v695_v11 = vpop.f32.mrf.mxu3 }
 0x14d   : > { %v658_v31 = vpop.f32.mrf.mxu0  ;;  %v721_v32 = vpop.f32.mrf.mxu1 }
 0x14e   : > { %v6101_v31 = vld [vmem:[#allocation2 + $0x1cc] sm:$0xf0] }
 0x153   : > { %v684_v33 = vpop.f32.mrf.mxu2 }
 0x154   : > { %v697_v34 = vpop.f32.mrf.mxu3 }
 0x155   : > { %v7043_v35 = vpop.f32.mrf.mxu0  ;;  %v723_v36 = vpop.f32.mrf.mxu1 }
 0x156   : > { %v4943_v36 = vld [vmem:[#allocation2 + $0x280] sm:$0xf] }
 0x15b   : > { %v7045_v37 = vpop.f32.mrf.mxu2 }
 0x15c   : > { %v7047_v38 = vpop.f32.mrf.mxu3 }
 0x15d   : > { %v710_v39 = vpop.f32.mrf.mxu0  ;;  %v800_v40 = vpop.f32.mrf.mxu1 }
 0x15e   : > { %v801_v54 = vadd.f32 %v800_v40, %v669_v26  ;;  %v4960_v26 = vor.u32 %v6129_v15, %v4959_v4  ;;  %v6125_v39 = vld [vmem:[#allocation2 + $0x28c] sm:$0xf0]  ;;  %v4671_v15 = vld [vmem:[#allocation2 + $0x60] sm:$0xf] }
 0x160   : > { %2732 = vmatpush.bf16.msra.mxu2 %v4960_v26 }
 0x163   : > { %v736_v41 = vpop.f32.mrf.mxu2 }
 0x164   : > { %v749_v42 = vpop.f32.mrf.mxu3 }
 0x165   : > { %v787_v8 = vpop.f32.mrf.mxu0  ;;  %v802_v9 = vpop.f32.mrf.mxu1 }
 0x166   : > { %v788_v58 = vadd.f32 %v787_v8, %v656_v27  ;;  %v6069_v27 = vld [vmem:[#allocation2 + $0xcc] sm:$0xf0]  ;;  %v4848_v8 = vor.u32 %v6101_v31, %v4847_v28  ;;  %v4672_v28 = vor.u32 %v6057_v20, %v4671_v15  ;;  %v5087_v31 = vld [vmem:[#allocation2 + $0x3a0] sm:$0xf] }
 0x167   : > { %v4720_v40 = vor.u32 %v6069_v27, %v4719_v23  ;;  %v6065_v9 = vld [vmem:[#allocation2 + $0xac] sm:$0xf0] }
 0x168   : > { %2718 = vmatpush.bf16.msra.mxu1 %v4848_v8 }
 0x169   : > { %2705 = vmatpush.bf16.msra.mxu0 %v4720_v40  ;;  %v6053_v40 = vld [vmem:[#allocation2 + $0x4c] sm:$0xf0] }
 0x16b   : > { %v813_v10 = vpop.f32.mrf.mxu2 }
 0x16c   : > { %v826_v43 = vpop.f32.mrf.mxu3  ;;  %v814_v5 = vadd.f32 %v813_v10, %v682_v29  ;;  %v4831_v10 = vld [vmem:[#allocation2 + $0x1a0] sm:$0xf] }
 0x16d   : > { %v789_v44 = vpop.f32.mrf.mxu0  ;;  %v852_v45 = vpop.f32.mrf.mxu1  ;;  %v827_v7 = vadd.f32 %v826_v43, %v695_v11  ;;  %v4703_v11 = vld [vmem:[#allocation2 + $0xa0] sm:$0xf]  ;;  %v6097_v43 = vld [vmem:[#allocation2 + $0x1ac] sm:$0xf0] }
 0x16e   : > { %v853_v24 = vadd.f32 %v852_v45, %v721_v32 }
 0x173   : > { %v815_v47 = vpop.f32.mrf.mxu2 }
 0x174   : > { %v828_v48 = vpop.f32.mrf.mxu3 }
 0x175   : > { %v7049_v46 = vpop.f32.mrf.mxu0  ;;  %v854_v49 = vpop.f32.mrf.mxu1  ;;  %v4927_v48 = vld [vmem:[#allocation2 + $0x260] sm:$0xf] }
 0x176   : > { %v6121_v49 = vld [vmem:[#allocation2 + $0x26c] sm:$0xf0]  ;;  %v840_v16 = vadd.f32 %v7049_v46, %v7043_v35  ;;  %v4799_v35 = vld [vmem:[#allocation2 + $0x160] sm:$0xf] }
 0x177   : > { %v4928_v18 = vor.u32 %v6121_v49, %v4927_v48  ;;  %v6089_v46 = vld [vmem:[#allocation2 + $0x16c] sm:$0xf0] }
 0x17b   : > { %v7051_v50 = vpop.f32.mrf.mxu2 }
 0x17c   : > { %v7053_v51 = vpop.f32.mrf.mxu3 }
 0x17d   : > { %v841_v52 = vpop.f32.mrf.mxu0  ;;  %v1016_v53 = vpop.f32.mrf.mxu1  ;;  %v879_v48 = vadd.f32 %v7053_v51, %v7047_v38 }
 0x17e   : > { %v1099_v55 = vadd.f32 %v1016_v53, %v801_v54  ;;  %v4704_v52 = vor.u32 %v6065_v9, %v4703_v11  ;;  %v4687_v53 = vld [vmem:[#allocation2 + $0x80] sm:$0xf]  ;;  %v6061_v54 = vld [vmem:[#allocation2 + $0x8c] sm:$0xf0]  ;;  %v866_v9 = vadd.f32 %v7051_v50, %v7045_v37 }
 0x17f   : > { %v4688_v14 = vor.u32 %v6061_v54, %v4687_v53  ;;  %v6113_v11 = vld [vmem:[#allocation2 + $0x22c] sm:$0xf0] }
 0x180   : > { %v7058_v2 = vadd.f32 %v7055_v56, %v1099_v55  ;;  %2706 = vmatpush.bf16.msra.mxu0 %v4704_v52  ;;  %v6049_v37 = vld [vmem:[#allocation2 + $0x2c] sm:$0xf0] }
 0x182   : > { %v1121_v21 = vmax.f32 %v7058_v2, 0.0  ;;  %v6099_v2 = vld [vmem:[#allocation2 + $0x1c4] sm:$0xf] }
 0x183   : > { %v867_v57 = vpop.f32.mrf.mxu2 }
 0x184   : > { %v880_v59 = vpop.f32.mrf.mxu3  ;;  %2707 = vmatpush.bf16.msra.mxu0 %v4688_v14 }
 0x185   : > { %v1003_v60 = vpop.f32.mrf.mxu0  ;;  %v1018_v61 = vpop.f32.mrf.mxu1  ;;  %v4832_v59 = vor.u32 %v6097_v43, %v4831_v10  ;;  %v5071_v43 = vld [vmem:[#allocation2 + $0x380] sm:$0xf] }
 0x186   : > { %v1098_v1 = vadd.f32 %v1003_v60, %v788_v58  ;;  %v4944_v58 = vor.u32 %v6125_v39, %v4943_v36  ;;  %v4815_v60 = vld [vmem:[#allocation2 + $0x180] sm:$0xf]  ;;  %v6093_v61 = vld [vmem:[#allocation2 + $0x18c] sm:$0xf0] }
 0x187   : > { %2719 = vmatpush.bf16.msra.mxu1 %v4832_v59  ;;  %v4816_v19 = vor.u32 %v6093_v61, %v4815_v60  ;;  %v4895_v36 = vld [vmem:[#allocation2 + $0x220] sm:$0xf] }
 0x188   : > { %v7061_v13 = vadd.f32 %v7055_v56, %v1098_v1  ;;  %v5120_v1 = vor.u32 %v6169_v0, %v5119_v63  ;;  %2733 = vmatpush.bf16.msra.mxu2 %v4944_v58  ;;  %v4655_v39 = vld [vmem:[#allocation2 + $0x40] sm:$0xf]  ;;  %2708 = vmatpush.bf16.msra.mxu0 %v4672_v28  ;;  %v4896_v58 = vor.u32 %v6113_v11, %v4895_v36  ;;  %v6109_v63 = vld [vmem:[#allocation2 + $0x20c] sm:$0xf0] }
 0x189   : > { %v4656_v52 = vor.u32 %v6053_v40, %v4655_v39  ;;  %v4639_v59 = vld [vmem:[#allocation2 + $0x20] sm:$0xf]  ;;  %v6149_v39 = vld [vmem:[#allocation2 + $0x34c] sm:$0xf0] }
 0x18a   : > { %v1120_v6 = vmax.f32 %v7061_v13, 0.0  ;;  %2743 = vmatpush.bf16.msra.mxu3 %v5120_v1  ;;  %v4879_v61 = vld [vmem:[#allocation2 + $0x200] sm:$0xf]  ;;  %v4640_v15 = vor.u32 %v6049_v37, %v4639_v59  ;;  %v6249_v59 = vld [vmem:[#allocation2 + $0x66c] sm:$0xf0] }
 0x18b   : > { %v1029_v25 = vpop.f32.mrf.mxu2  ;;  %2720 = vmatpush.bf16.msra.mxu1 %v4816_v19  ;;  %v5503_v1 = vld [vmem:[#allocation2 + $0x6e0] sm:$0xf]  ;;  %v4880_v20 = vor.u32 %v6109_v63, %v4879_v61 }
 0x18c   : > { %v1100_v33 = vadd.f32 %v1029_v25, %v814_v5  ;;  %v1042_v34 = vpop.f32.mrf.mxu3  ;;  %v6476_v29 = vpack.i.bf16 %v1121_v21, %v1120_v6  ;;  %v5103_v5 = vld [vmem:[#allocation2 + $0x3c0] sm:$0xf]  ;;  %v6117_v25 = vld [vmem:[#allocation2 + $0x24c] sm:$0xf0]  ;;  %2734 = vmatpush.bf16.msra.mxu2 %v4928_v18  ;;  %2709 = vmatpush.bf16.msra.mxu0 %v4656_v52 }
 0x18d   : > { %v1101_v32 = vadd.f32 %v1042_v34, %v827_v7  ;;  %v1005_v41 = vpop.f32.mrf.mxu0  ;;  %v1068_v42 = vpop.f32.mrf.mxu1  ;;  %v5104_v26 = vor.u32 %v6165_v22, %v5103_v5  ;;  %v6153_v18 = vld [vmem:[#allocation2 + $0x36c] sm:$0xf0]  ;;  %v4623_v5 = vld [vmem:[#allocation2] sm:$0xf] }
 0x18e   : > { %v7070_v44 = vadd.f32 %v7055_v56, %v1100_v33  ;;  %v1103_v45 = vadd.f32 %v1068_v42, %v853_v24  ;;  %6477 = vrot.lane.b32.xlu0 %v6476_v29, %s6700_s14  ;;  %v4911_v24 = vld [vmem:[#allocation2 + $0x240] sm:$0xf]  ;;  %v6161_v33 = vld [vmem:[#allocation2 + $0x3ac] sm:$0xf0] }
 0x18f   : > { %v7074_v47 = vadd.f32 %v7055_v56, %v1101_v32  ;;  %v4912_v29 = vor.u32 %v6117_v25, %v4911_v24  ;;  %v4800_v32 = vor.u32 %v6089_v46, %v4799_v35  ;;  %2744 = vmatpush.bf16.msra.mxu3 %v5104_v26  ;;  %v4783_v41 = vld [vmem:[#allocation2 + $0x140] sm:$0xf]  ;;  %v6085_v42 = vld [vmem:[#allocation2 + $0x14c] sm:$0xf0]  ;;  %v5088_v8 = vor.u32 %v6161_v33, %v5087_v31 }
 0x190   : > { %v1122_v55 = vmax.f32 %v7070_v44, 0.0  ;;  %v7078_v57 = vadd.f32 %v7055_v56, %v1103_v45  ;;  %v6157_v45 = vld [vmem:[#allocation2 + $0x38c] sm:$0xf0]  ;;  %v4784_v0 = vor.u32 %v6085_v42, %v4783_v41  ;;  %v5247_v24 = vld [vmem:[#allocation2 + $0x4e0] sm:$0xf]  ;;  %2710 = vmatpush.bf16.msra.mxu0 %v4640_v15 }
 0x191   : > { %v1123_v62 = vmax.f32 %v7074_v47, 0.0  ;;  %2735 = vmatpush.bf16.msra.mxu2 %v4912_v29  ;;  %2721 = vmatpush.bf16.msra.mxu1 %v4800_v32  ;;  %v5072_v38 = vor.u32 %v6157_v45, %v5071_v43  ;;  %v6045_v22 = vld [vmem:[#allocation2 + $0xc] sm:$0xf0]  ;;  %v4751_v35 = vld [vmem:[#allocation2 + $0x100] sm:$0xf] }
 0x192   : > { %v1125_v3 = vmax.f32 %v7078_v57, 0.0  ;;  %v6201_v25 = vld [vmem:[#allocation2 + $0x4ec] sm:$0xf0]  ;;  %v4624_v33 = vor.u32 %v6045_v22, %v4623_v5  ;;  %v5039_v36 = vld [vmem:[#allocation2 + $0x340] sm:$0xf] }
 0x193   : > { %v1031_v12 = vpop.f32.mrf.mxu2  ;;  %v6471_v4 = vpack.i.bf16 %v1123_v62, %v1122_v55  ;;  %2745 = vmatpush.bf16.msra.mxu3 %v5088_v8  ;;  %v6261_v26 = vld [vmem:[#allocation2 + $0x6cc] sm:$0xf0]  ;;  %v5248_v11 = vor.u32 %v6201_v25, %v5247_v24  ;;  %v5375_v32 = vld [vmem:[#allocation2 + $0x5e0] sm:$0xf]  ;;  %v5040_v45 = vor.u32 %v6149_v39, %v5039_v36  ;;  %v4673_v47 = vld [vmem:[#allocation2 + $0x70] sm:$0xf0] }
 0x194   : > { %v1044_v17 = vpop.f32.mrf.mxu3  ;;  %v6265_v12 = vld [vmem:[#allocation2 + $0x6ec] sm:$0xf0]  ;;  %v5471_v8 = vld [vmem:[#allocation2 + $0x6a0] sm:$0xf]  ;;  %2711 = vmatpush.bf16.msra.mxu0 %v4624_v33  ;;  %v5473_v57 = vld [vmem:[#allocation2 + $0x6b0] sm:$0xf0] }
 0x195   : > { %6472 = vrot.lane.b32.xlu2 %v6471_v4, %s6700_s14  ;;  %v1055_v23 = vpop.f32.mrf.mxu0  ;;  %v1070_v7 = vpop.f32.mrf.mxu1  ;;  %v4767_v4 = vld [vmem:[#allocation2 + $0x120] sm:$0xf]  ;;  %2736 = vmatpush.bf16.msra.mxu2 %v4896_v58  ;;  %v6077_v29 = vld [vmem:[#allocation2 + $0x10c] sm:$0xf0] }
 0x196   : > { %v1102_v27 = vadd.f32 %v1055_v23, %v840_v16  ;;  %1138 = vrot.lane.b32.xlu0 %v1125_v3, %s6700_s14  ;;  %v6081_v16 = vld [vmem:[#allocation2 + $0x12c] sm:$0xf0]  ;;  %v5055_v17 = vld [vmem:[#allocation2 + $0x360] sm:$0xf]  ;;  %v5504_v7 = vor.u32 %v6265_v12, %v5503_v1  ;;  %2722 = vmatpush.bf16.msra.mxu1 %v4784_v0  ;;  %v4752_v43 = vor.u32 %v6077_v29, %v4751_v35 }
 0x197   : > { %2746 = vmatpush.bf16.msra.mxu3 %v5072_v38  ;;  %v5056_v46 = vor.u32 %v6153_v18, %v5055_v17  ;;  %v6233_v41 = vld [vmem:[#allocation2 + $0x5ec] sm:$0xf0]  ;;  %v5455_v52 = vld [vmem:[#allocation2 + $0x680] sm:$0xf] }
 0x198   : > { %v7093_v34 = vadd.f32 %v7055_v56, %v1102_v27  ;;  %v4768_v27 = vor.u32 %v6081_v16, %v4767_v4  ;;  %2756 = vmatpush.bf16.msrb.mxu0 %v5248_v11  ;;  %v5439_v58 = vld [vmem:[#allocation2 + $0x660] sm:$0xf]  ;;  %v6197_v0 = vld [vmem:[#allocation2 + $0x4cc] sm:$0xf0] }
 0x199   : > { %2737 = vmatpush.bf16.msra.mxu2 %v4880_v20  ;;  %v5440_v37 = vor.u32 %v6249_v59, %v5439_v58  ;;  %v5231_v63 = vld [vmem:[#allocation2 + $0x4c0] sm:$0xf]  ;;  %v6229_v12 = vld [vmem:[#allocation2 + $0x5cc] sm:$0xf0] }
 0x19a   : > { %v1124_v10 = vmax.f32 %v7093_v34, 0.0  ;;  %2723 = vmatpush.bf16.msra.mxu1 %v4768_v27  ;;  %v5359_v38 = vld [vmem:[#allocation2 + $0x5c0] sm:$0xf]  ;;  %v5232_v1 = vor.u32 %v6197_v0, %v5231_v63  ;;  %v6241_v16 = vld [vmem:[#allocation2 + $0x62c] sm:$0xf0] }
 0x19b   : > { %v1081_v49 = vpop.f32.mrf.mxu2  ;;  %2747 = vmatpush.bf16.msra.mxu3 %v5056_v46  ;;  %v5360_v4 = vor.u32 %v6229_v12, %v5359_v38  ;;  %v5407_v15 = vld [vmem:[#allocation2 + $0x620] sm:$0xf]  ;;  %v6145_v20 = vld [vmem:[#allocation2 + $0x32c] sm:$0xf0]  ;;  %v5105_v34 = vld [vmem:[#allocation2 + $0x3d0] sm:$0xf0] }
 0x19c   : > { %v1104_v53 = vadd.f32 %v1081_v49, %v866_v9  ;;  %v1094_v54 = vpop.f32.mrf.mxu3  ;;  %1136 = vrot.lane.b32.xlu1 %v1124_v10, %s6700_s14  ;;  %v6257_v9 = vld [vmem:[#allocation2 + $0x6ac] sm:$0xf0]  ;;  %2757 = vmatpush.bf16.msrb.mxu0 %v5232_v1  ;;  %v5408_v17 = vor.u32 %v6241_v16, %v5407_v15  ;;  %v5023_v18 = vld [vmem:[#allocation2 + $0x320] sm:$0xf] }
 0x19d   : > { %v1105_v50 = vadd.f32 %v1094_v54, %v879_v48  ;;  %v1057_v60 = vpop.f32.mrf.mxu0  ;;  %2782 = vmatpush.bf16.msrb.mxu2 %v5504_v7  ;;  %v5376_v48 = vor.u32 %v6233_v41, %v5375_v32  ;;  %v5472_v49 = vor.u32 %v6257_v9, %v5471_v8  ;;  %v5024_v5 = vor.u32 %v6145_v20, %v5023_v18  ;;  %v5215_v22 = vld [vmem:[#allocation2 + $0x4a0] sm:$0xf]  ;;  %v6193_v7 = vld [vmem:[#allocation2 + $0x4ac] sm:$0xf0] }
 0x19e   : > { %v7104_v51 = vadd.f32 %v7055_v56, %v1104_v53  ;;  %v6253_v53 = vld [vmem:[#allocation2 + $0x68c] sm:$0xf0]  ;;  %2724 = vmatpush.bf16.msra.mxu1 %v4752_v43  ;;  %v5343_v24 = vld [vmem:[#allocation2 + $0x5a0] sm:$0xf]  ;;  %v5216_v25 = vor.u32 %v6193_v7, %v5215_v22 }
 0x19f   : > { %v7107_v14 = vadd.f32 %v7055_v56, %v1105_v50  ;;  %v5487_v56 = vld [vmem:[#allocation2 + $0x6c0] sm:$0xf]  ;;  %2748 = vmatpush.bf16.msra.mxu3 %v5040_v45  ;;  %v5456_v54 = vor.u32 %v6253_v53, %v5455_v52  ;;  %v6245_v60 = vld [vmem:[#allocation2 + $0x64c] sm:$0xf0] }
 0x1a0   : > { %v1126_v19 = vmax.f32 %v7104_v51, 0.0  ;;  %v5488_v42 = vor.u32 %v6261_v26, %v5487_v56  ;;  %v5423_v50 = vld [vmem:[#allocation2 + $0x640] sm:$0xf]  ;;  %v6225_v56 = vld [vmem:[#allocation2 + $0x5ac] sm:$0xf0]  ;;  %2758 = vmatpush.bf16.msrb.mxu0 %v5216_v25 }
 0x1a1   : > { %v1127_v23 = vmax.f32 %v7107_v14, 0.0  ;;  %v5424_v61 = vor.u32 %v6245_v60, %v5423_v50  ;;  %v5344_v26 = vor.u32 %v6225_v56, %v5343_v24  ;;  %v5391_v27 = vld [vmem:[#allocation2 + $0x600] sm:$0xf]  ;;  %v6237_v35 = vld [vmem:[#allocation2 + $0x60c] sm:$0xf0] }
 0x1a2   : > { %2783 = vmatpush.bf16.msrb.mxu2 %v5488_v42  ;;  %2769 = vmatpush.bf16.msrb.mxu1 %v5376_v48  ;;  %v5392_v46 = vor.u32 %v6237_v35, %v5391_v27  ;;  %v5199_v29 = vld [vmem:[#allocation2 + $0x480] sm:$0xf]  ;;  %v6189_v36 = vld [vmem:[#allocation2 + $0x48c] sm:$0xf0]  ;;  %v5377_v14 = vld [vmem:[#allocation2 + $0x5f0] sm:$0xf0] }
 0x1a3   : > { %v6481_v28 = vpack.i.bf16 %v1127_v23, %v1126_v19  ;;  %v1083_v31 = vpop.f32.mrf.mxu2  ;;  %2749 = vmatpush.bf16.msra.mxu3 %v5024_v5  ;;  %v5327_v39 = vld [vmem:[#allocation2 + $0x580] sm:$0xf]  ;;  %v6221_v11 = vld [vmem:[#allocation2 + $0x58c] sm:$0xf0] }
 0x1a4   : > { %v1096_v40 = vpop.f32.mrf.mxu3  ;;  %v6141_v31 = vld [vmem:[#allocation2 + $0x30c] sm:$0xf0]  ;;  %v5631_v32 = vld [vmem:[#allocation2 + $0x7e0] sm:$0xf]  ;;  %v5328_v42 = vor.u32 %v6221_v11, %v5327_v39 }
 0x1a5   : > { %6482 = vrot.lane.b32.xlu2 %v6481_v28, %s6700_s14  ;;  %v5007_v28 = vld [vmem:[#allocation2 + $0x300] sm:$0xf]  ;;  %v5200_v40 = vor.u32 %v6189_v36, %v5199_v29  ;;  %v6297_v41 = vld [vmem:[#allocation2 + $0x7ec] sm:$0xf0] }
 0x1a6   : > { %2784 = vmatpush.bf16.msrb.mxu2 %v5472_v49  ;;  %2770 = vmatpush.bf16.msrb.mxu1 %v5360_v4  ;;  %v5008_v33 = vor.u32 %v6141_v31, %v5007_v28  ;;  %v5632_v8 = vor.u32 %v6297_v41, %v5631_v32  ;;  %v5183_v9 = vld [vmem:[#allocation2 + $0x460] sm:$0xf]  ;;  %v6185_v43 = vld [vmem:[#allocation2 + $0x46c] sm:$0xf0] }
 0x1a7   : > { %2759 = vmatpush.bf16.msrb.mxu0 %v5200_v40  ;;  %v5311_v45 = vld [vmem:[#allocation2 + $0x560] sm:$0xf]  ;;  %v5184_v48 = vor.u32 %v6185_v43, %v5183_v9  ;;  %v6217_v49 = vld [vmem:[#allocation2 + $0x56c] sm:$0xf0] }
 0x1a8   : > { %2750 = vmatpush.bf16.msra.mxu3 %v5008_v33  ;;  %v5615_v52 = vld [vmem:[#allocation2 + $0x7c0] sm:$0xf]  ;;  %v6293_v53 = vld [vmem:[#allocation2 + $0x7cc] sm:$0xf0] }
 0x1a9   : > { %v5616_v58 = vor.u32 %v6293_v53, %v5615_v52  ;;  %v5167_v59 = vld [vmem:[#allocation2 + $0x440] sm:$0xf]  ;;  %v6289_v0 = vld [vmem:[#allocation2 + $0x7ac] sm:$0xf0] }
 0x1aa   : > { %2785 = vmatpush.bf16.msrb.mxu2 %v5456_v54  ;;  %2771 = vmatpush.bf16.msrb.mxu1 %v5344_v26  ;;  %v5312_v54 = vor.u32 %v6217_v49, %v5311_v45  ;;  %v5295_v50 = vld [vmem:[#allocation2 + $0x540] sm:$0xf]  ;;  %v6177_v4 = vld [vmem:[#allocation2 + $0x42c] sm:$0xf0] }
 0x1ab   : > { %2760 = vmatpush.bf16.msrb.mxu0 %v5184_v48  ;;  %v5599_v63 = vld [vmem:[#allocation2 + $0x7a0] sm:$0xf]  ;;  %v6285_v20 = vld [vmem:[#allocation2 + $0x78c] sm:$0xf0] }
 0x1ac   : > { %2795 = vmatpush.bf16.msrb.mxu3 %v5632_v8  ;;  %v5600_v1 = vor.u32 %v6289_v0, %v5599_v63  ;;  %v5151_v12 = vld [vmem:[#allocation2 + $0x420] sm:$0xf]  ;;  %v6173_v24 = vld [vmem:[#allocation2 + $0x40c] sm:$0xf0]  ;;  %v4993_v8 = vld [vmem:[#allocation2 + $0x2f0] sm:$0xf0] }
 0x1ad   : > { %v5279_v15 = vld [vmem:[#allocation2 + $0x520] sm:$0xf]  ;;  %v5152_v16 = vor.u32 %v6177_v4, %v5151_v12  ;;  %v6205_v26 = vld [vmem:[#allocation2 + $0x50c] sm:$0xf0]  ;;  %v4945_v63 = vld [vmem:[#allocation2 + $0x290] sm:$0xf0] }
 0x1ae   : > { %2786 = vmatpush.bf16.msrb.mxu2 %v5440_v37  ;;  %2772 = vmatpush.bf16.msrb.mxu1 %v5328_v42  ;;  %v6181_v37 = vld [vmem:[#allocation2 + $0x44c] sm:$0xf0]  ;;  %v5583_v18 = vld [vmem:[#allocation2 + $0x780] sm:$0xf]  ;;  %v6135_v42 = vld [vmem:[#allocation2 + $0x2e4] sm:$0xf] }
 0x1af   : > { %v5168_v60 = vor.u32 %v6181_v37, %v5167_v59  ;;  %v5584_v22 = vor.u32 %v6285_v20, %v5583_v18  ;;  %v5135_v7 = vld [vmem:[#allocation2 + $0x400] sm:$0xf]  ;;  %v6281_v35 = vld [vmem:[#allocation2 + $0x76c] sm:$0xf0]  ;;  %v4996_v52 = vor.u32 %v6135_v42, %v4993_v8  ;;  %v6127_v37 = vld [vmem:[#allocation2 + $0x2a4] sm:$0xf] }
 0x1b0   : > { %2796 = vmatpush.bf16.msrb.mxu3 %v5616_v58  ;;  %v5263_v25 = vld [vmem:[#allocation2 + $0x500] sm:$0xf]  ;;  %v5136_v56 = vor.u32 %v6173_v24, %v5135_v7  ;;  %v6277_v33 = vld [vmem:[#allocation2 + $0x74c] sm:$0xf0]  ;;  %v4977_v58 = vld [vmem:[#allocation2 + $0x2d0] sm:$0xf0] }
 0x1b1   : > { %2761 = vmatpush.bf16.msrb.mxu0 %v5168_v60  ;;  %v5567_v27 = vld [vmem:[#allocation2 + $0x760] sm:$0xf]  ;;  %v6273_v39 = vld [vmem:[#allocation2 + $0x72c] sm:$0xf0]  ;;  %v6071_v18 = vld [vmem:[#allocation2 + $0xe4] sm:$0xf] }
 0x1b2   : > { %2787 = vmatpush.bf16.msrb.mxu2 %v5424_v61  ;;  %2773 = vmatpush.bf16.msrb.mxu1 %v5312_v54  ;;  %v6213_v61 = vld [vmem:[#allocation2 + $0x54c] sm:$0xf0]  ;;  %v5568_v28 = vor.u32 %v6281_v35, %v5567_v27  ;;  %v5551_v31 = vld [vmem:[#allocation2 + $0x740] sm:$0xf]  ;;  %v6131_v54 = vld [vmem:[#allocation2 + $0x2c4] sm:$0xf] }
 0x1b3   : > { %v5296_v38 = vor.u32 %v6213_v61, %v5295_v50  ;;  %v5552_v29 = vor.u32 %v6277_v33, %v5551_v31  ;;  %v5535_v36 = vld [vmem:[#allocation2 + $0x720] sm:$0xf]  ;;  %v6269_v45 = vld [vmem:[#allocation2 + $0x70c] sm:$0xf0]  ;;  %v4980_v59 = vor.u32 %v6131_v54, %v4977_v58  ;;  %v4961_v50 = vld [vmem:[#allocation2 + $0x2b0] sm:$0xf0] }
 0x1b4   : > { %2797 = vmatpush.bf16.msrb.mxu3 %v5600_v1  ;;  %v5536_v11 = vor.u32 %v6273_v39, %v5535_v36  ;;  %v5519_v43 = vld [vmem:[#allocation2 + $0x700] sm:$0xf]  ;;  %v4964_v60 = vor.u32 %v6127_v37, %v4961_v50  ;;  %v6123_v61 = vld [vmem:[#allocation2 + $0x284] sm:$0xf]  ;;  %v4737_v20 = vld [vmem:[#allocation2 + $0xf0] sm:$0xf0] }
 0x1b5   : > { %2762 = vmatpush.bf16.msrb.mxu0 %v5152_v16  ;;  %v5520_v49 = vor.u32 %v6269_v45, %v5519_v43  ;;  %v4948_v1 = vor.u32 %v6123_v61, %v4945_v63  ;;  %v4929_v16 = vld [vmem:[#allocation2 + $0x270] sm:$0xf0]  ;;  %v6103_v24 = vld [vmem:[#allocation2 + $0x1e4] sm:$0xf] }
 0x1b6   : > { %2788 = vmatpush.bf16.msrb.mxu2 %v5408_v17  ;;  %2774 = vmatpush.bf16.msrb.mxu1 %v5296_v38  ;;  %v6209_v17 = vld [vmem:[#allocation2 + $0x52c] sm:$0xf0]  ;;  %v6115_v35 = vld [vmem:[#allocation2 + $0x244] sm:$0xf]  ;;  %v4721_v36 = vld [vmem:[#allocation2 + $0xd0] sm:$0xf0] }
 0x1b7   : > { %v5280_v5 = vor.u32 %v6209_v17, %v5279_v15  ;;  %v6119_v15 = vld [vmem:[#allocation2 + $0x264] sm:$0xf]  ;;  %v4705_v8 = vld [vmem:[#allocation2 + $0xb0] sm:$0xf0] }
 0x1b8   : > { %2798 = vmatpush.bf16.msrb.mxu3 %v5584_v22  ;;  %v4932_v27 = vor.u32 %v6119_v15, %v4929_v16  ;;  %v6111_v39 = vld [vmem:[#allocation2 + $0x224] sm:$0xf]  ;;  %v4833_v43 = vld [vmem:[#allocation2 + $0x1b0] sm:$0xf0] }
 0x1b9   : > { %2763 = vmatpush.bf16.msrb.mxu0 %v5136_v56  ;;  %v6063_v42 = vld [vmem:[#allocation2 + $0xa4] sm:$0xf]  ;;  %v4881_v54 = vld [vmem:[#allocation2 + $0x210] sm:$0xf0] }
 0x1ba   : > { %2789 = vmatpush.bf16.msrb.mxu2 %v5392_v46  ;;  %2775 = vmatpush.bf16.msrb.mxu1 %v5280_v5  ;;  %v5264_v46 = vor.u32 %v6205_v26, %v5263_v25  ;;  %v4865_v25 = vld [vmem:[#allocation2 + $0x1f0] sm:$0xf0]  ;;  %v6263_v58 = vld [vmem:[#allocation2 + $0x6e4] sm:$0xf] }
 0x1bb   : > { %v4868_v33 = vor.u32 %v6103_v24, %v4865_v25  ;;  %v4689_v61 = vld [vmem:[#allocation2 + $0x90] sm:$0xf0]  ;;  %v6091_v63 = vld [vmem:[#allocation2 + $0x184] sm:$0xf] }
 0x1bc   : > { %2799 = vmatpush.bf16.msrb.mxu3 %v5568_v28  ;;  %v4817_v15 = vld [vmem:[#allocation2 + $0x190] sm:$0xf0]  ;;  %v6167_v16 = vld [vmem:[#allocation2 + $0x3e4] sm:$0xf] }
 0x1bd   : > { %v4820_v24 = vor.u32 %v6091_v63, %v4817_v15  ;;  %v6075_v15 = vld [vmem:[#allocation2 + $0x104] sm:$0xf] }
 0x1be   : > { %2776 = vmatpush.bf16.msrb.mxu1 %v5264_v46  ;;  %v4913_v46 = vld [vmem:[#allocation2 + $0x250] sm:$0xf0] }
 0x1bf   : > { %v4916_v13 = vor.u32 %v6115_v35, %v4913_v46  ;;  %v6163_v35 = vld [vmem:[#allocation2 + $0x3c4] sm:$0xf] }
 0x1c0   : > { %2800 = vmatpush.bf16.msrb.mxu3 %v5552_v29  ;;  %v6067_v29 = vld [vmem:[#allocation2 + $0xc4] sm:$0xf] }
 0x1c4   : > { %2801 = vmatpush.bf16.msrb.mxu3 %v5536_v11  ;;  %v4897_v11 = vld [vmem:[#allocation2 + $0x230] sm:$0xf0] }
 0x1c5   : > { %v4900_v45 = vor.u32 %v6111_v39, %v4897_v11  ;;  %v4785_v39 = vld [vmem:[#allocation2 + $0x150] sm:$0xf0]  ;;  %v6159_v11 = vld [vmem:[#allocation2 + $0x3a4] sm:$0xf] }
 0x1c8   : > { %2802 = vmatpush.bf16.msrb.mxu3 %v5520_v49 }
 0x1ef   : > { %v7116_v40 = vpop.permute.xlu2 %6472 }
 0x1f0   : > { %v6475_v32 = vunpack.i.h.bf16 %v7116_v40  ;;  %v6474_v41 = vunpack.i.l.bf16 %v7116_v40 }
 0x1f2   : > { %v1148_v9 = vsel %vm921_vm3, %v6474_v41, %v6475_v32 }
 0x1f3   : > { %v1154_v48 = vmax.f32 %v1122_v55, %v1148_v9  ;;  %v6095_v9 = vld [vmem:[#allocation2 + $0x1a4] sm:$0xf] }
 0x1f4   : > { %v4836_v50 = vor.u32 %v6095_v9, %v4833_v43  ;;  %v6251_v43 = vld [vmem:[#allocation2 + $0x684] sm:$0xf] }
 0x1f5   : > { %v7126_v53 = vpack.c.bf16 %v1154_v48, %v1154_v48  ;;  %v6107_v48 = vld [vmem:[#allocation2 + $0x204] sm:$0xf] }
 0x1f7   : > { %2738 = vmatmul.bf16.vlgmr.msra.gmra.mxu2 %v7126_v53 }
 0x1f8   : > { %2834 = vmatpush.bf16.msra.mxu2 %v4996_v52  ;;  %v4708_v52 = vor.u32 %v6063_v42, %v4705_v8 }
 0x1fc   : > { %2835 = vmatpush.bf16.msra.mxu2 %v4980_v59  ;;  %v5505_v59 = vld [vmem:[#allocation2 + $0x6f0] sm:$0xf0] }
 0x1ff   : > { %v7129_v0 = vpop.permute.xlu2 %6482 }
 0x200   : > { %v6485_v44 = vunpack.i.h.bf16 %v7129_v0  ;;  %v6484_v55 = vunpack.i.l.bf16 %v7129_v0  ;;  %2836 = vmatpush.bf16.msra.mxu2 %v4964_v60  ;;  %v7133_v38 = vpop.permute.xlu0 %6477  ;;  %v6059_v60 = vld [vmem:[#allocation2 + $0x84] sm:$0xf] }
 0x201   : > { %v6480_v12 = vunpack.i.h.bf16 %v7133_v38  ;;  %v6479_v4 = vunpack.i.l.bf16 %v7133_v38 }
 0x202   : > { %v1144_v17 = vsel %vm921_vm3, %v6484_v55, %v6485_v44 }
 0x203   : > { %v1158_v5 = vmax.f32 %v1126_v19, %v1144_v17  ;;  %v1149_v22 = vsel %vm921_vm3, %v6480_v12, %v6474_v41  ;;  %v1150_v7 = vsel %vm921_vm3, %v6479_v4, %v6480_v12  ;;  %v4740_v19 = vor.u32 %v6071_v18, %v4737_v20  ;;  %v5121_v17 = vld [vmem:[#allocation2 + $0x3f0] sm:$0xf0] }
 0x204   : > { %v1153_v56 = vmax.f32 %v1121_v21, %v1149_v22  ;;  %v1152_v26 = vmax.f32 %v1120_v6, %v1150_v7  ;;  %2837 = vmatpush.bf16.msra.mxu2 %v4948_v1  ;;  %v4849_v21 = vld [vmem:[#allocation2 + $0x1d0] sm:$0xf0]  ;;  %v4724_v6 = vor.u32 %v6067_v29, %v4721_v36  ;;  %v5508_v22 = vor.u32 %v6263_v58, %v5505_v59  ;;  %v6255_v36 = vld [vmem:[#allocation2 + $0x6a4] sm:$0xf] }
 0x205   : > { %v7155_v51 = vpack.c.bf16 %v1158_v5, %v1158_v5  ;;  %v4852_v41 = vor.u32 %v6099_v2, %v4849_v21  ;;  %v4884_v5 = vor.u32 %v6107_v48, %v4881_v54  ;;  %v4692_v7 = vor.u32 %v6059_v60, %v4689_v61  ;;  %v6047_v48 = vld [vmem:[#allocation2 + $0x24] sm:$0xf]  ;;  %v4641_v54 = vld [vmem:[#allocation2 + $0x30] sm:$0xf0] }
 0x206   : > { %v7157_v28 = vpack.c.bf16 %v1152_v26, %v1152_v26  ;;  %v7159_v31 = vpack.c.bf16 %v1153_v56, %v1153_v56  ;;  %v5124_v25 = vor.u32 %v6167_v16, %v5121_v17  ;;  %v6259_v56 = vld [vmem:[#allocation2 + $0x6c4] sm:$0xf]  ;;  %v5489_v26 = vld [vmem:[#allocation2 + $0x6d0] sm:$0xf0]  ;;  %v5108_v21 = vor.u32 %v6163_v35, %v5105_v34 }
 0x207   : > { %2790 = vmatmul.bf16.vlgmr.msrb.gmra.mxu2 %v7155_v51  ;;  %v5476_v42 = vor.u32 %v6255_v36, %v5473_v57  ;;  %v6079_v58 = vld [vmem:[#allocation2 + $0x124] sm:$0xf]  ;;  %v4769_v59 = vld [vmem:[#allocation2 + $0x130] sm:$0xf0]  ;;  %v4644_v38 = vor.u32 %v6047_v48, %v4641_v54  ;;  %v4999_v54 = vld [vmem:[#allocation2 + $0x2e8] sm:$0xf] }
 0x208   : > { %2838 = vmatpush.bf16.msra.mxu2 %v4932_v27  ;;  %2712 = vmatmul.bf16.vlgmr.msra.gmra.mxu0 %v7157_v28  ;;  %v1139_v49 = vpop.permute.xlu0 %1138  ;;  %v6055_v27 = vld [vmem:[#allocation2 + $0x64] sm:$0xf]  ;;  %v4772_v0 = vor.u32 %v6079_v58, %v4769_v59  ;;  %v4753_v16 = vld [vmem:[#allocation2 + $0x110] sm:$0xf0]  ;;  %v6138_v58 = vld [vmem:[#allocation2 + $0x2f4] sm:$0xf0] }
 0x209   : > { %2725 = vmatmul.bf16.vlgmr.msra.gmra.mxu1 %v7159_v31  ;;  %2808 = vmatpush.bf16.msra.mxu0 %v4740_v19  ;;  %v1145_v18 = vsel %vm921_vm3, %v1139_v49, %v6484_v55  ;;  %v4801_v19 = vld [vmem:[#allocation2 + $0x170] sm:$0xf0]  ;;  %v6247_v61 = vld [vmem:[#allocation2 + $0x664] sm:$0xf] }
 0x20a   : > { %2821 = vmatpush.bf16.msra.mxu1 %v4868_v33  ;;  %v1157_v55 = vmax.f32 %v1125_v3, %v1145_v18  ;;  %v4676_v33 = vor.u32 %v6055_v27, %v4673_v47  ;;  %v6051_v3 = vld [vmem:[#allocation2 + $0x44] sm:$0xf]  ;;  %v5057_v18 = vld [vmem:[#allocation2 + $0x370] sm:$0xf0] }
 0x20b   : > { %v6151_v17 = vld [vmem:[#allocation2 + $0x364] sm:$0xf]  ;;  %v5233_v35 = vld [vmem:[#allocation2 + $0x4d0] sm:$0xf0] }
 0x20c   : > { %2839 = vmatpush.bf16.msra.mxu2 %v4916_v13  ;;  %v7185_v2 = vpack.c.bf16 %v1157_v55, %v1157_v55  ;;  %v4657_v13 = vld [vmem:[#allocation2 + $0x50] sm:$0xf0]  ;;  %v6147_v55 = vld [vmem:[#allocation2 + $0x344] sm:$0xf] }
 0x20d   : > { %2809 = vmatpush.bf16.msra.mxu0 %v4724_v6  ;;  %v6083_v6 = vld [vmem:[#allocation2 + $0x144] sm:$0xf]  ;;  %v4660_v8 = vor.u32 %v6051_v3, %v4657_v13  ;;  %v5409_v36 = vld [vmem:[#allocation2 + $0x630] sm:$0xf0] }
 0x20e   : > { %2822 = vmatpush.bf16.msra.mxu1 %v4852_v41  ;;  %v1137_v37 = vpop.permute.xlu1 %1136  ;;  %v5089_v41 = vld [vmem:[#allocation2 + $0x3b0] sm:$0xf0]  ;;  %v4788_v9 = vor.u32 %v6083_v6, %v4785_v39  ;;  %v6191_v39 = vld [vmem:[#allocation2 + $0x4a4] sm:$0xf] }
 0x20f   : > { %v1146_v1 = vsel %vm921_vm3, %v1137_v37, %v1139_v49  ;;  %v1147_v12 = vsel %vm921_vm3, %v6475_v32, %v1137_v37  ;;  %v1151_v49 = vsel %vm921_vm3, %v6485_v44, %v6479_v4  ;;  %v6155_v37 = vld [vmem:[#allocation2 + $0x384] sm:$0xf]  ;;  %v4625_v44 = vld [vmem:[#allocation2 + $0x10] sm:$0xf0] }
 0x210   : > { %2840 = vmatpush.bf16.msra.mxu2 %v4900_v45  ;;  %v1155_v20 = vmax.f32 %v1123_v62, %v1147_v12  ;;  %v1156_v40 = vmax.f32 %v1124_v10, %v1146_v1  ;;  %v6087_v62 = vld [vmem:[#allocation2 + $0x164] sm:$0xf]  ;;  %v5492_v10 = vor.u32 %v6259_v56, %v5489_v26  ;;  %v5457_v45 = vld [vmem:[#allocation2 + $0x690] sm:$0xf0]  ;;  %v1159_v63 = vmax.f32 %v1127_v23, %v1151_v49 }
 0x211   : > { %2810 = vmatpush.bf16.msra.mxu0 %v4708_v52  ;;  %v4804_v29 = vor.u32 %v6087_v62, %v4801_v19  ;;  %v5092_v52 = vor.u32 %v6159_v11, %v5089_v41  ;;  %v5460_v60 = vor.u32 %v6251_v43, %v5457_v45  ;;  %v5441_v1 = vld [vmem:[#allocation2 + $0x670] sm:$0xf0]  ;;  %v6043_v12 = vld [vmem:[#allocation2 + $0x4] sm:$0xf]  ;;  %v5060_v26 = vor.u32 %v6151_v17, %v5057_v18 }
 0x212   : > { %v7178_v32 = vpack.c.bf16 %v1155_v20, %v1155_v20  ;;  %2823 = vmatpush.bf16.msra.mxu1 %v4836_v50  ;;  %v7183_v46 = vpack.c.bf16 %v1156_v40, %v1156_v40  ;;  %v5073_v50 = vld [vmem:[#allocation2 + $0x390] sm:$0xf0]  ;;  %v6199_v20 = vld [vmem:[#allocation2 + $0x4e4] sm:$0xf]  ;;  %v7198_v23 = vpack.c.bf16 %v1159_v63, %v1159_v63  ;;  %v4628_v40 = vor.u32 %v6043_v12, %v4625_v44 }
 0x213   : > { %v5076_v4 = vor.u32 %v6155_v37, %v5073_v50  ;;  %v5425_v56 = vld [vmem:[#allocation2 + $0x650] sm:$0xf0]  ;;  %v6195_v19 = vld [vmem:[#allocation2 + $0x4c4] sm:$0xf] }
 0x214   : > { %2841 = vmatpush.bf16.msra.mxu2 %v4884_v5  ;;  %2751 = vmatmul.bf16.vlgmr.msra.gmra.mxu3 %v7178_v32  ;;  %v5249_v5 = vld [vmem:[#allocation2 + $0x4f0] sm:$0xf0]  ;;  %v5236_v3 = vor.u32 %v6195_v19, %v5233_v35  ;;  %v6139_v45 = vld [vmem:[#allocation2 + $0x304] sm:$0xf] }
 0x215   : > { %2811 = vmatpush.bf16.msra.mxu0 %v4692_v7  ;;  %2847 = vmatpush.bf16.msra.mxu3 %v5124_v25  ;;  %v6231_v7 = vld [vmem:[#allocation2 + $0x5e4] sm:$0xf]  ;;  %v5252_v27 = vor.u32 %v6199_v20, %v5249_v5  ;;  %v5041_v62 = vld [vmem:[#allocation2 + $0x350] sm:$0xf0] }
 0x216   : > { %2824 = vmatpush.bf16.msra.mxu1 %v4820_v24  ;;  %v4756_v24 = vor.u32 %v6075_v15, %v4753_v16  ;;  %v6243_v25 = vld [vmem:[#allocation2 + $0x644] sm:$0xf]  ;;  %v5380_v47 = vor.u32 %v6231_v7, %v5377_v14  ;;  %v5044_v57 = vor.u32 %v6147_v55, %v5041_v62  ;;  %v5025_v6 = vld [vmem:[#allocation2 + $0x330] sm:$0xf0]  ;;  %v6134_v15 = vld [vmem:[#allocation2 + $0x2d4] sm:$0xf0] }
 0x217   : > { %2842 = vmatmul.bf16.vlgmr.msra.gmra.mxu2 %v7126_v53  ;;  %v5428_v34 = vor.u32 %v6243_v25, %v5425_v56  ;;  %v5217_v11 = vld [vmem:[#allocation2 + $0x4b0] sm:$0xf0]  ;;  %v6187_v37 = vld [vmem:[#allocation2 + $0x484] sm:$0xf]  ;;  %v4967_v25 = vld [vmem:[#allocation2 + $0x2a8] sm:$0xf] }
 0x218   : > { %2886 = vmatpush.bf16.msrb.mxu2 %v5508_v22  ;;  %2764 = vmatmul.bf16.vlgmr.msrb.gmra.mxu0 %v7183_v46  ;;  %v5444_v22 = vor.u32 %v6247_v61, %v5441_v1  ;;  %v5393_v43 = vld [vmem:[#allocation2 + $0x610] sm:$0xf0]  ;;  %v5220_v49 = vor.u32 %v6191_v39, %v5217_v11  ;;  %v5000_v1 = vor.u32 %v6138_v58, %v4999_v54  ;;  %v6183_v18 = vld [vmem:[#allocation2 + $0x464] sm:$0xf]  ;;  %v6130_v56 = vld [vmem:[#allocation2 + $0x2b4] sm:$0xf0] }
 0x219   : > { %2777 = vmatmul.bf16.vlgmr.msrb.gmra.mxu1 %v7185_v2  ;;  %2812 = vmatpush.bf16.msra.mxu0 %v4676_v33  ;;  %v5361_v33 = vld [vmem:[#allocation2 + $0x5d0] sm:$0xf0]  ;;  %v6215_v5 = vld [vmem:[#allocation2 + $0x564] sm:$0xf] }
 0x21a   : > { %2825 = vmatpush.bf16.msra.mxu1 %v4804_v29  ;;  %2848 = vmatpush.bf16.msra.mxu3 %v5108_v21  ;;  %v6239_v29 = vld [vmem:[#allocation2 + $0x624] sm:$0xf]  ;;  %v5201_v50 = vld [vmem:[#allocation2 + $0x490] sm:$0xf0] }
 0x21b   : > { %v6143_v21 = vld [vmem:[#allocation2 + $0x324] sm:$0xf]  ;;  %v5412_v41 = vor.u32 %v6239_v29, %v5409_v36  ;;  %v5329_v63 = vld [vmem:[#allocation2 + $0x590] sm:$0xf0]  ;;  %v5204_v44 = vor.u32 %v6187_v37, %v5201_v50  ;;  %v4951_v29 = vld [vmem:[#allocation2 + $0x288] sm:$0xf] }
 0x21c   : > { %2887 = vmatpush.bf16.msrb.mxu2 %v5492_v10  ;;  %v6227_v10 = vld [vmem:[#allocation2 + $0x5c4] sm:$0xf]  ;;  %v5028_v48 = vor.u32 %v6143_v21, %v5025_v6  ;;  %v5185_v20 = vld [vmem:[#allocation2 + $0x470] sm:$0xf0]  ;;  %v6126_v36 = vld [vmem:[#allocation2 + $0x294] sm:$0xf0] }
 0x21d   : > { %2813 = vmatpush.bf16.msra.mxu0 %v4660_v8  ;;  %v5364_v13 = vor.u32 %v6227_v10, %v5361_v33  ;;  %v5345_v8 = vld [vmem:[#allocation2 + $0x5b0] sm:$0xf0]  ;;  %v6291_v7 = vld [vmem:[#allocation2 + $0x7c4] sm:$0xf]  ;;  %v4968_v10 = vor.u32 %v6130_v56, %v4967_v25  ;;  %v4743_v50 = vld [vmem:[#allocation2 + $0xe8] sm:$0xf] }
 0x21e   : > { %2826 = vmatpush.bf16.msra.mxu1 %v4788_v9  ;;  %2849 = vmatpush.bf16.msra.mxu3 %v5092_v52  ;;  %v6235_v9 = vld [vmem:[#allocation2 + $0x604] sm:$0xf]  ;;  %v5009_v52 = vld [vmem:[#allocation2 + $0x310] sm:$0xf0] }
 0x21f   : > { %v5396_v61 = vor.u32 %v6235_v9, %v5393_v43  ;;  %v5012_v12 = vor.u32 %v6139_v45, %v5009_v52  ;;  %v5617_v14 = vld [vmem:[#allocation2 + $0x7d0] sm:$0xf0]  ;;  %v6179_v55 = vld [vmem:[#allocation2 + $0x444] sm:$0xf]  ;;  %v4935_v9 = vld [vmem:[#allocation2 + $0x268] sm:$0xf] }
 0x220   : > { %2888 = vmatpush.bf16.msrb.mxu2 %v5476_v42  ;;  %v6223_v42 = vld [vmem:[#allocation2 + $0x5a4] sm:$0xf]  ;;  %v5297_v19 = vld [vmem:[#allocation2 + $0x550] sm:$0xf0]  ;;  %v6122_v43 = vld [vmem:[#allocation2 + $0x274] sm:$0xf0] }
 0x221   : > { %2814 = vmatpush.bf16.msra.mxu0 %v4644_v38  ;;  %v5348_v59 = vor.u32 %v6223_v42, %v5345_v8  ;;  %v6295_v38 = vld [vmem:[#allocation2 + $0x7e4] sm:$0xf]  ;;  %v5281_v39 = vld [vmem:[#allocation2 + $0x530] sm:$0xf0]  ;;  %v4952_v42 = vor.u32 %v6126_v36, %v4951_v29  ;;  %v5511_v36 = vld [vmem:[#allocation2 + $0x6e8] sm:$0xf] }
 0x222   : > { %2827 = vmatpush.bf16.msra.mxu1 %v4772_v0  ;;  %2850 = vmatpush.bf16.msra.mxu3 %v5076_v4  ;;  %v5633_v0 = vld [vmem:[#allocation2 + $0x7f0] sm:$0xf0]  ;;  %v4983_v4 = vld [vmem:[#allocation2 + $0x2c8] sm:$0xf]  ;;  %v6211_v62 = vld [vmem:[#allocation2 + $0x544] sm:$0xf] }
 0x223   : > { %v5636_v17 = vor.u32 %v6295_v38, %v5633_v0  ;;  %v6287_v35 = vld [vmem:[#allocation2 + $0x7a4] sm:$0xf]  ;;  %v5137_v52 = vld [vmem:[#allocation2 + $0x410] sm:$0xf0]  ;;  %v6106_v38 = vld [vmem:[#allocation2 + $0x1f4] sm:$0xf0] }
 0x224   : > { %2889 = vmatpush.bf16.msrb.mxu2 %v5460_v60  ;;  %2803 = vmatmul.bf16.vlgmr.msrb.gmra.mxu3 %v7198_v23  ;;  %v6219_v60 = vld [vmem:[#allocation2 + $0x584] sm:$0xf]  ;;  %v5265_v58 = vld [vmem:[#allocation2 + $0x510] sm:$0xf0] }
 0x225   : > { %2815 = vmatpush.bf16.msra.mxu0 %v4628_v40  ;;  %v5332_v16 = vor.u32 %v6219_v60, %v5329_v63  ;;  %v4984_v40 = vor.u32 %v6134_v15, %v4983_v4  ;;  %v6175_v21 = vld [vmem:[#allocation2 + $0x424] sm:$0xf]  ;;  %v5569_v37 = vld [vmem:[#allocation2 + $0x770] sm:$0xf0]  ;;  %v4936_v60 = vor.u32 %v6122_v43, %v4935_v9  ;;  %v4871_v63 = vld [vmem:[#allocation2 + $0x1e8] sm:$0xf] }
 0x226   : > { %2828 = vmatpush.bf16.msra.mxu1 %v4756_v24  ;;  %2851 = vmatpush.bf16.msra.mxu3 %v5060_v26  ;;  %v5188_v24 = vor.u32 %v6183_v18, %v5185_v20  ;;  %v6207_v6 = vld [vmem:[#allocation2 + $0x524] sm:$0xf]  ;;  %v5553_v18 = vld [vmem:[#allocation2 + $0x750] sm:$0xf0]  ;;  %v4727_v20 = vld [vmem:[#allocation2 + $0xc8] sm:$0xf] }
 0x227   : > { %v6283_v11 = vld [vmem:[#allocation2 + $0x784] sm:$0xf]  ;;  %v5127_v43 = vld [vmem:[#allocation2 + $0x3e8] sm:$0xf] }
 0x228   : > { %2890 = vmatpush.bf16.msrb.mxu2 %v5444_v22  ;;  %2816 = vmatmul.bf16.vlgmr.msra.gmra.mxu0 %v7157_v28  ;;  %v5313_v22 = vld [vmem:[#allocation2 + $0x570] sm:$0xf0]  ;;  %v6171_v45 = vld [vmem:[#allocation2 + $0x404] sm:$0xf] }
 0x229   : > { %2860 = vmatpush.bf16.msrb.mxu0 %v5252_v27  ;;  %2829 = vmatmul.bf16.vlgmr.msra.gmra.mxu1 %v7159_v31  ;;  %v5316_v26 = vor.u32 %v6215_v5, %v5313_v22  ;;  %v5620_v27 = vor.u32 %v6291_v7, %v5617_v14  ;;  %v6203_v54 = vld [vmem:[#allocation2 + $0x504] sm:$0xf]  ;;  %v5140_v0 = vor.u32 %v6171_v45, %v5137_v52  ;;  %v6070_v22 = vld [vmem:[#allocation2 + $0xd4] sm:$0xf0]  ;;  %v4855_v7 = vld [vmem:[#allocation2 + $0x1c8] sm:$0xf] }
 0x22a   : > { %2873 = vmatpush.bf16.msrb.mxu1 %v5380_v47  ;;  %2852 = vmatpush.bf16.msra.mxu3 %v5044_v57  ;;  %v5169_v47 = vld [vmem:[#allocation2 + $0x450] sm:$0xf0]  ;;  %v5300_v57 = vor.u32 %v6211_v62, %v5297_v19  ;;  %v6102_v14 = vld [vmem:[#allocation2 + $0x1d4] sm:$0xf0]  ;;  %v4728_v56 = vor.u32 %v6070_v22, %v4727_v20  ;;  %v5095_v22 = vld [vmem:[#allocation2 + $0x3a8] sm:$0xf] }
 0x22b   : > { %v5172_v33 = vor.u32 %v6179_v55, %v5169_v47  ;;  %v5537_v55 = vld [vmem:[#allocation2 + $0x730] sm:$0xf0]  ;;  %v4711_v47 = vld [vmem:[#allocation2 + $0xa8] sm:$0xf]  ;;  %v6066_v19 = vld [vmem:[#allocation2 + $0xb4] sm:$0xf0] }
 0x22c   : > { %2891 = vmatpush.bf16.msrb.mxu2 %v5428_v34  ;;  %v5601_v34 = vld [vmem:[#allocation2 + $0x7b0] sm:$0xf0]  ;;  %v6170_v45 = vld [vmem:[#allocation2 + $0x3f4] sm:$0xf0] }
 0x22d   : > { %2861 = vmatpush.bf16.msrb.mxu0 %v5236_v3  ;;  %v5604_v3 = vor.u32 %v6287_v35, %v5601_v34  ;;  %v4839_v35 = vld [vmem:[#allocation2 + $0x1a8] sm:$0xf]  ;;  %v6098_v34 = vld [vmem:[#allocation2 + $0x1b4] sm:$0xf0] }
 0x22e   : > { %2874 = vmatpush.bf16.msrb.mxu1 %v5364_v13  ;;  %2853 = vmatpush.bf16.msra.mxu3 %v5028_v48  ;;  %v5153_v13 = vld [vmem:[#allocation2 + $0x430] sm:$0xf0]  ;;  %v5284_v48 = vor.u32 %v6207_v6, %v5281_v39  ;;  %v4695_v39 = vld [vmem:[#allocation2 + $0x88] sm:$0xf]  ;;  %v6262_v52 = vld [vmem:[#allocation2 + $0x6d4] sm:$0xf0] }
 0x22f   : > { %v5156_v8 = vor.u32 %v6175_v21, %v5153_v13  ;;  %v4840_v21 = vor.u32 %v6098_v34, %v4839_v35  ;;  %v6267_v13 = vld [vmem:[#allocation2 + $0x704] sm:$0xf]  ;;  %v5521_v6 = vld [vmem:[#allocation2 + $0x710] sm:$0xf0]  ;;  %v6086_v20 = vld [vmem:[#allocation2 + $0x154] sm:$0xf0] }
 0x230   : > { %2892 = vmatpush.bf16.msrb.mxu2 %v5412_v41  ;;  %v5585_v41 = vld [vmem:[#allocation2 + $0x790] sm:$0xf0]  ;;  %v6158_v35 = vld [vmem:[#allocation2 + $0x394] sm:$0xf0]  ;;  %v5447_v34 = vld [vmem:[#allocation2 + $0x668] sm:$0xf] }
 0x231   : > { %2862 = vmatpush.bf16.msrb.mxu0 %v5220_v49  ;;  %v5588_v49 = vor.u32 %v6283_v11, %v5585_v41  ;;  %v6062_v41 = vld [vmem:[#allocation2 + $0x94] sm:$0xf0] }
 0x232   : > { %2875 = vmatpush.bf16.msrb.mxu1 %v5348_v59  ;;  %2854 = vmatpush.bf16.msra.mxu3 %v5012_v12  ;;  %v6279_v59 = vld [vmem:[#allocation2 + $0x764] sm:$0xf]  ;;  %v6118_v12 = vld [vmem:[#allocation2 + $0x254] sm:$0xf0] }
 0x233   : > { %v5572_v4 = vor.u32 %v6279_v59, %v5569_v37  ;;  %v4679_v59 = vld [vmem:[#allocation2 + $0x68] sm:$0xf]  ;;  %v5128_v37 = vor.u32 %v6170_v45, %v5127_v43  ;;  %v6246_v45 = vld [vmem:[#allocation2 + $0x654] sm:$0xf0] }
 0x234   : > { %2893 = vmatpush.bf16.msrb.mxu2 %v5396_v61  ;;  %v6074_v61 = vld [vmem:[#allocation2 + $0xf4] sm:$0xf0]  ;;  %v5431_v43 = vld [vmem:[#allocation2 + $0x648] sm:$0xf] }
 0x235   : > { %2863 = vmatpush.bf16.msrb.mxu0 %v5204_v44  ;;  %2855 = vmatmul.bf16.vlgmr.msra.gmra.mxu3 %v7178_v32  ;;  %v5268_v44 = vor.u32 %v6203_v54, %v5265_v58  ;;  %v4744_v15 = vor.u32 %v6074_v61, %v4743_v50  ;;  %v4696_v54 = vor.u32 %v6062_v41, %v4695_v39  ;;  %v6058_v50 = vld [vmem:[#allocation2 + $0x74] sm:$0xf0]  ;;  %v5255_v41 = vld [vmem:[#allocation2 + $0x4e8] sm:$0xf] }
 0x236   : > { %2876 = vmatpush.bf16.msrb.mxu1 %v5332_v16  ;;  %2899 = vmatpush.bf16.msrb.mxu3 %v5636_v17  ;;  %v4872_v16 = vor.u32 %v6106_v38, %v4871_v63  ;;  %v6275_v17 = vld [vmem:[#allocation2 + $0x744] sm:$0xf]  ;;  %v6090_v61 = vld [vmem:[#allocation2 + $0x174] sm:$0xf0]  ;;  %v5111_v38 = vld [vmem:[#allocation2 + $0x3c8] sm:$0xf] }
 0x237   : > { %2894 = vmatmul.bf16.vlgmr.msrb.gmra.mxu2 %v7155_v51  ;;  %v5556_v25 = vor.u32 %v6275_v17, %v5553_v18  ;;  %v6054_v17 = vld [vmem:[#allocation2 + $0x54] sm:$0xf0]  ;;  %v4791_v18 = vld [vmem:[#allocation2 + $0x148] sm:$0xf] }
 0x238   : > { %2938 = vmatpush.bf16.msra.mxu2 %v5000_v1  ;;  %v4919_v1 = vld [vmem:[#allocation2 + $0x248] sm:$0xf]  ;;  %v6154_v39 = vld [vmem:[#allocation2 + $0x374] sm:$0xf0] }
 0x239   : > { %2864 = vmatpush.bf16.msrb.mxu0 %v5188_v24  ;;  %v4920_v5 = vor.u32 %v6118_v12, %v4919_v1  ;;  %v6114_v24 = vld [vmem:[#allocation2 + $0x234] sm:$0xf0]  ;;  %v5479_v1 = vld [vmem:[#allocation2 + $0x6a8] sm:$0xf] }
 0x23a   : > { %2877 = vmatpush.bf16.msrb.mxu1 %v5316_v26  ;;  %2900 = vmatpush.bf16.msrb.mxu3 %v5620_v27  ;;  %v4856_v26 = vor.u32 %v6102_v14, %v4855_v7  ;;  %v6271_v27 = vld [vmem:[#allocation2 + $0x724] sm:$0xf]  ;;  %v6258_v12 = vld [vmem:[#allocation2 + $0x6b4] sm:$0xf0]  ;;  %v5463_v14 = vld [vmem:[#allocation2 + $0x688] sm:$0xf] }
 0x23b   : > { %v5540_v29 = vor.u32 %v6271_v27, %v5537_v55  ;;  %v6162_v7 = vld [vmem:[#allocation2 + $0x3b4] sm:$0xf0]  ;;  %v4775_v55 = vld [vmem:[#allocation2 + $0x128] sm:$0xf] }
 0x23c   : > { %2939 = vmatpush.bf16.msra.mxu2 %v4984_v40  ;;  %v4903_v40 = vld [vmem:[#allocation2 + $0x228] sm:$0xf]  ;;  %v6050_v27 = vld [vmem:[#allocation2 + $0x34] sm:$0xf0] }
 0x23d   : > { %2865 = vmatpush.bf16.msrb.mxu0 %v5172_v33  ;;  %v4904_v62 = vor.u32 %v6114_v24, %v4903_v40  ;;  %v6110_v33 = vld [vmem:[#allocation2 + $0x214] sm:$0xf0] }
 0x23e   : > { %2878 = vmatpush.bf16.msrb.mxu1 %v5300_v57  ;;  %2901 = vmatpush.bf16.msrb.mxu3 %v5604_v3  ;;  %v6266_v57 = vld [vmem:[#allocation2 + $0x6f4] sm:$0xf0]  ;;  %v4712_v3 = vor.u32 %v6066_v19, %v4711_v47  ;;  %v5079_v19 = vld [vmem:[#allocation2 + $0x388] sm:$0xf] }
 0x23f   : > { %v5512_v9 = vor.u32 %v6266_v57, %v5511_v36  ;;  %v6254_v40 = vld [vmem:[#allocation2 + $0x694] sm:$0xf0]  ;;  %v4631_v36 = vld [vmem:[#allocation2 + $0x8] sm:$0xf] }
 0x240   : > { %2940 = vmatpush.bf16.msra.mxu2 %v4968_v10  ;;  %v4887_v10 = vld [vmem:[#allocation2 + $0x208] sm:$0xf]  ;;  %v6082_v47 = vld [vmem:[#allocation2 + $0x134] sm:$0xf0] }
 0x241   : > { %2866 = vmatpush.bf16.msrb.mxu0 %v5156_v8  ;;  %v4888_v11 = vor.u32 %v6110_v33, %v4887_v10  ;;  %v6094_v8 = vld [vmem:[#allocation2 + $0x194] sm:$0xf0] }
 0x242   : > { %2879 = vmatpush.bf16.msrb.mxu1 %v5284_v48  ;;  %2902 = vmatpush.bf16.msrb.mxu3 %v5588_v49  ;;  %v5524_v48 = vor.u32 %v6267_v13, %v5521_v6  ;;  %v5495_v49 = vld [vmem:[#allocation2 + $0x6c8] sm:$0xf]  ;;  %v6250_v10 = vld [vmem:[#allocation2 + $0x674] sm:$0xf0] }
 0x243   : > { %v5496_v63 = vor.u32 %v6262_v52, %v5495_v49  ;;  %v6046_v57 = vld [vmem:[#allocation2 + $0x14] sm:$0xf0]  ;;  %v5063_v6 = vld [vmem:[#allocation2 + $0x368] sm:$0xf] }
 0x244   : > { %2941 = vmatpush.bf16.msra.mxu2 %v4952_v42  ;;  %v4823_v42 = vld [vmem:[#allocation2 + $0x188] sm:$0xf]  ;;  %v6078_v13 = vld [vmem:[#allocation2 + $0x114] sm:$0xf0]  ;;  %v5064_v52 = vor.u32 %v6154_v39, %v5063_v6 }
 0x245   : > { %2867 = vmatpush.bf16.msrb.mxu0 %v5140_v0  ;;  %v4824_v58 = vor.u32 %v6094_v8, %v4823_v42  ;;  %v6166_v0 = vld [vmem:[#allocation2 + $0x3d4] sm:$0xf0]  ;;  %v5383_v8 = vld [vmem:[#allocation2 + $0x5e8] sm:$0xf] }
 0x246   : > { %2880 = vmatpush.bf16.msrb.mxu1 %v5268_v44  ;;  %2903 = vmatpush.bf16.msrb.mxu3 %v5572_v4  ;;  %v4680_v44 = vor.u32 %v6058_v50, %v4679_v59  ;;  %v6202_v42 = vld [vmem:[#allocation2 + $0x4f4] sm:$0xf0]  ;;  %v5432_v50 = vor.u32 %v6246_v45, %v5431_v43  ;;  %v5191_v39 = vld [vmem:[#allocation2 + $0x468] sm:$0xf] }
 0x247   : > { %v6150_v59 = vld [vmem:[#allocation2 + $0x354] sm:$0xf0] }
 0x248   : > { %2942 = vmatpush.bf16.msra.mxu2 %v4936_v60  ;;  %2868 = vmatmul.bf16.vlgmr.msrb.gmra.mxu0 %v7183_v46  ;;  %v4807_v60 = vld [vmem:[#allocation2 + $0x168] sm:$0xf] }
 0x249   : > { %2912 = vmatpush.bf16.msra.mxu0 %v4744_v15  ;;  %2881 = vmatmul.bf16.vlgmr.msrb.gmra.mxu1 %v7185_v2  ;;  %v4808_v4 = vor.u32 %v6090_v61, %v4807_v60  ;;  %v4663_v15 = vld [vmem:[#allocation2 + $0x48] sm:$0xf]  ;;  %v6198_v61 = vld [vmem:[#allocation2 + $0x4d4] sm:$0xf0] }
 0x24a   : > { %2925 = vmatpush.bf16.msra.mxu1 %v4872_v16  ;;  %2904 = vmatpush.bf16.msrb.mxu3 %v5556_v25  ;;  %v5112_v16 = vor.u32 %v6166_v0, %v5111_v38  ;;  %v4664_v24 = vor.u32 %v6054_v17, %v4663_v15  ;;  %v4792_v25 = vor.u32 %v6086_v20, %v4791_v18  ;;  %v5239_v60 = vld [vmem:[#allocation2 + $0x4c8] sm:$0xf]  ;;  %v6230_v38 = vld [vmem:[#allocation2 + $0x5d4] sm:$0xf0] }
 0x24b   : > { %v5415_v0 = vld [vmem:[#allocation2 + $0x628] sm:$0xf]  ;;  %v6146_v15 = vld [vmem:[#allocation2 + $0x334] sm:$0xf0] }
 0x24c   : > { %2943 = vmatpush.bf16.msra.mxu2 %v4920_v5  ;;  %v5480_v5 = vor.u32 %v6258_v12, %v5479_v1  ;;  %v6242_v1 = vld [vmem:[#allocation2 + $0x634] sm:$0xf0]  ;;  %v5223_v18 = vld [vmem:[#allocation2 + $0x4a8] sm:$0xf] }
 0x24d   : > { %2913 = vmatpush.bf16.msra.mxu0 %v4728_v56  ;;  %v4647_v56 = vld [vmem:[#allocation2 + $0x28] sm:$0xf]  ;;  %v5416_v17 = vor.u32 %v6242_v1, %v5415_v0  ;;  %v6194_v20 = vld [vmem:[#allocation2 + $0x4b4] sm:$0xf0]  ;;  %v6124_v0 = vld [vmem:[#allocation2 + $0x28c] sm:$0xf] }
 0x24e   : > { %2926 = vmatpush.bf16.msra.mxu1 %v4856_v26  ;;  %2905 = vmatpush.bf16.msrb.mxu3 %v5540_v29  ;;  %v5096_v26 = vor.u32 %v6162_v7, %v5095_v22  ;;  %v4648_v33 = vor.u32 %v6050_v27, %v4647_v56  ;;  %v4776_v29 = vor.u32 %v6082_v47, %v4775_v55  ;;  %v6226_v22 = vld [vmem:[#allocation2 + $0x5b4] sm:$0xf0]  ;;  %v5399_v7 = vld [vmem:[#allocation2 + $0x608] sm:$0xf]  ;;  %v4953_v1 = vld [vmem:[#allocation2 + $0x298] sm:$0xf0] }
 0x24f   : > { %v5224_v56 = vor.u32 %v6194_v20, %v5223_v18  ;;  %v6142_v27 = vld [vmem:[#allocation2 + $0x314] sm:$0xf0]  ;;  %v5591_v18 = vld [vmem:[#allocation2 + $0x788] sm:$0xf] }
 0x250   : > { %2944 = vmatpush.bf16.msra.mxu2 %v4904_v62  ;;  %v5464_v62 = vor.u32 %v6254_v40, %v5463_v14  ;;  %v6238_v14 = vld [vmem:[#allocation2 + $0x614] sm:$0xf0]  ;;  %v6136_v40 = vld [vmem:[#allocation2 + $0x2ec] sm:$0xf] }
 0x251   : > { %2914 = vmatpush.bf16.msra.mxu0 %v4712_v3  ;;  %v4759_v3 = vld [vmem:[#allocation2 + $0x108] sm:$0xf]  ;;  %v5400_v47 = vor.u32 %v6238_v14, %v5399_v7  ;;  %v6286_v20 = vld [vmem:[#allocation2 + $0x794] sm:$0xf0]  ;;  %v6120_v7 = vld [vmem:[#allocation2 + $0x26c] sm:$0xf] }
 0x252   : > { %2927 = vmatpush.bf16.msra.mxu1 %v4840_v21  ;;  %2906 = vmatpush.bf16.msrb.mxu3 %v5524_v48  ;;  %v5080_v21 = vor.u32 %v6158_v35, %v5079_v19  ;;  %v4632_v48 = vor.u32 %v6046_v57, %v4631_v36  ;;  %v4760_v49 = vor.u32 %v6078_v13, %v4759_v3  ;;  %v6190_v19 = vld [vmem:[#allocation2 + $0x494] sm:$0xf0]  ;;  %v5335_v35 = vld [vmem:[#allocation2 + $0x588] sm:$0xf]  ;;  %v6132_v3 = vld [vmem:[#allocation2 + $0x2cc] sm:$0xf] }
 0x253   : > { %v4937_v14 = vld [vmem:[#allocation2 + $0x278] sm:$0xf0] }
 0x254   : > { %2945 = vmatpush.bf16.msra.mxu2 %v4888_v11  ;;  %v5448_v11 = vor.u32 %v6250_v10, %v5447_v34  ;;  %v6222_v10 = vld [vmem:[#allocation2 + $0x594] sm:$0xf0] }
 0x255   : > { %2915 = vmatpush.bf16.msra.mxu0 %v4696_v54  ;;  %2907 = vmatmul.bf16.vlgmr.msrb.gmra.mxu3 %v7198_v23  ;;  %v5256_v54 = vor.u32 %v6202_v42, %v5255_v41  ;;  %v5336_v13 = vor.u32 %v6222_v10, %v5335_v35  ;;  %v5319_v41 = vld [vmem:[#allocation2 + $0x568] sm:$0xf]  ;;  %v6218_v42 = vld [vmem:[#allocation2 + $0x574] sm:$0xf0]  ;;  %v4745_v35 = vld [vmem:[#allocation2 + $0xf8] sm:$0xf0] }
 0x256   : > { %2928 = vmatpush.bf16.msra.mxu1 %v4824_v58  ;;  %2951 = vmatpush.bf16.msra.mxu3 %v5128_v37  ;;  %v5047_v58 = vld [vmem:[#allocation2 + $0x348] sm:$0xf]  ;;  %v4873_v10 = vld [vmem:[#allocation2 + $0x1f8] sm:$0xf0] }
 0x257   : > { %2946 = vmatmul.bf16.vlgmr.msra.gmra.mxu2 %v7126_v53  ;;  %v5048_v12 = vor.u32 %v6150_v59, %v5047_v58  ;;  %v5175_v58 = vld [vmem:[#allocation2 + $0x448] sm:$0xf]  ;;  %v6182_v59 = vld [vmem:[#allocation2 + $0x454] sm:$0xf0] }
 0x258   : > { %2990 = vmatpush.bf16.msrb.mxu2 %v5512_v9  ;;  %v6234_v9 = vld [vmem:[#allocation2 + $0x5f4] sm:$0xf0] }
 0x259   : > { %2916 = vmatpush.bf16.msra.mxu0 %v4680_v44  ;;  %v5384_v37 = vor.u32 %v6234_v9, %v5383_v8  ;;  %v5240_v44 = vor.u32 %v6198_v61, %v5239_v60  ;;  %v5623_v8 = vld [vmem:[#allocation2 + $0x7c8] sm:$0xf]  ;;  %v6294_v9 = vld [vmem:[#allocation2 + $0x7d4] sm:$0xf0] }
 0x25a   : > { %2929 = vmatpush.bf16.msra.mxu1 %v4808_v4  ;;  %2952 = vmatpush.bf16.msra.mxu3 %v5112_v16  ;;  %v5031_v4 = vld [vmem:[#allocation2 + $0x328] sm:$0xf]  ;;  %v6290_v61 = vld [vmem:[#allocation2 + $0x7b4] sm:$0xf0] }
 0x25b   : > { %v5607_v60 = vld [vmem:[#allocation2 + $0x7a8] sm:$0xf] }
 0x25c   : > { %2991 = vmatpush.bf16.msrb.mxu2 %v5496_v63  ;;  %v5367_v63 = vld [vmem:[#allocation2 + $0x5c8] sm:$0xf] }
 0x25d   : > { %2917 = vmatpush.bf16.msra.mxu0 %v4664_v24  ;;  %v5368_v16 = vor.u32 %v6230_v38, %v5367_v63  ;;  %v5001_v24 = vld [vmem:[#allocation2 + $0x2f8] sm:$0xf0]  ;;  %v5176_v38 = vor.u32 %v6182_v59, %v5175_v58  ;;  %v5543_v58 = vld [vmem:[#allocation2 + $0x728] sm:$0xf]  ;;  %v6274_v59 = vld [vmem:[#allocation2 + $0x734] sm:$0xf0] }
 0x25e   : > { %2930 = vmatpush.bf16.msra.mxu1 %v4792_v25  ;;  %2953 = vmatpush.bf16.msra.mxu3 %v5096_v26  ;;  %v5032_v25 = vor.u32 %v6146_v15, %v5031_v4  ;;  %v5015_v26 = vld [vmem:[#allocation2 + $0x308] sm:$0xf]  ;;  %v5004_v34 = vor.u32 %v6136_v40, %v5001_v24  ;;  %v6178_v15 = vld [vmem:[#allocation2 + $0x434] sm:$0xf0] }
 0x25f   : > { %v5016_v36 = vor.u32 %v6142_v27, %v5015_v26  ;;  %v5159_v4 = vld [vmem:[#allocation2 + $0x428] sm:$0xf]  ;;  %v6206_v27 = vld [vmem:[#allocation2 + $0x514] sm:$0xf0] }
 0x260   : > { %2992 = vmatpush.bf16.msrb.mxu2 %v5480_v5  ;;  %v5351_v5 = vld [vmem:[#allocation2 + $0x5a8] sm:$0xf] }
 0x261   : > { %2918 = vmatpush.bf16.msra.mxu0 %v4648_v33  ;;  %v5352_v55 = vor.u32 %v6226_v22, %v5351_v5  ;;  %v5639_v33 = vld [vmem:[#allocation2 + $0x7e8] sm:$0xf]  ;;  %v4956_v5 = vor.u32 %v6124_v0, %v4953_v1  ;;  %v5160_v22 = vor.u32 %v6178_v15, %v5159_v4  ;;  %v6108_v0 = vld [vmem:[#allocation2 + $0x20c] sm:$0xf]  ;;  %v4889_v1 = vld [vmem:[#allocation2 + $0x218] sm:$0xf0] }
 0x262   : > { %2931 = vmatpush.bf16.msra.mxu1 %v4776_v29  ;;  %2954 = vmatpush.bf16.msra.mxu3 %v5080_v21  ;;  %v6298_v29 = vld [vmem:[#allocation2 + $0x7f4] sm:$0xf0]  ;;  %v4985_v21 = vld [vmem:[#allocation2 + $0x2d8] sm:$0xf0]  ;;  %v5143_v40 = vld [vmem:[#allocation2 + $0x408] sm:$0xf] }
 0x263   : > { %v5640_v6 = vor.u32 %v6298_v29, %v5639_v33  ;;  %v4988_v43 = vor.u32 %v6132_v3, %v4985_v21  ;;  %v5271_v26 = vld [vmem:[#allocation2 + $0x508] sm:$0xf]  ;;  %v5513_v4 = vld [vmem:[#allocation2 + $0x6f8] sm:$0xf0] }
 0x264   : > { %2993 = vmatpush.bf16.msrb.mxu2 %v5464_v62  ;;  %v5207_v62 = vld [vmem:[#allocation2 + $0x488] sm:$0xf]  ;;  %v5272_v3 = vor.u32 %v6206_v27, %v5271_v26  ;;  %v5129_v26 = vld [vmem:[#allocation2 + $0x3f8] sm:$0xf0] }
 0x265   : > { %2919 = vmatpush.bf16.msra.mxu0 %v4632_v48  ;;  %v5208_v57 = vor.u32 %v6190_v19, %v5207_v62  ;;  %v6128_v48 = vld [vmem:[#allocation2 + $0x2ac] sm:$0xf]  ;;  %v4940_v19 = vor.u32 %v6120_v7, %v4937_v14  ;;  %v4697_v7 = vld [vmem:[#allocation2 + $0x98] sm:$0xf0] }
 0x266   : > { %2932 = vmatpush.bf16.msra.mxu1 %v4760_v49  ;;  %2955 = vmatpush.bf16.msra.mxu3 %v5064_v52  ;;  %v4969_v49 = vld [vmem:[#allocation2 + $0x2b8] sm:$0xf0]  ;;  %v5320_v52 = vor.u32 %v6218_v42, %v5319_v41  ;;  %v6072_v62 = vld [vmem:[#allocation2 + $0xec] sm:$0xf] }
 0x267   : > { %v4972_v63 = vor.u32 %v6128_v48, %v4969_v49  ;;  %v6068_v41 = vld [vmem:[#allocation2 + $0xcc] sm:$0xf]  ;;  %v4905_v48 = vld [vmem:[#allocation2 + $0x238] sm:$0xf0] }
 0x268   : > { %2994 = vmatpush.bf16.msrb.mxu2 %v5448_v11  ;;  %2920 = vmatmul.bf16.vlgmr.msra.gmra.mxu0 %v7157_v28  ;;  %v6186_v11 = vld [vmem:[#allocation2 + $0x474] sm:$0xf0]  ;;  %v6092_v14 = vld [vmem:[#allocation2 + $0x18c] sm:$0xf] }
 0x269   : > { %2964 = vmatpush.bf16.msrb.mxu0 %v5256_v54  ;;  %2933 = vmatmul.bf16.vlgmr.msra.gmra.mxu1 %v7159_v31  ;;  %v5192_v45 = vor.u32 %v6186_v11, %v5191_v39  ;;  %v5624_v54 = vor.u32 %v6294_v9, %v5623_v8  ;;  %v5559_v39 = vld [vmem:[#allocation2 + $0x748] sm:$0xf]  ;;  %v6278_v11 = vld [vmem:[#allocation2 + $0x754] sm:$0xf0]  ;;  %v4729_v8 = vld [vmem:[#allocation2 + $0xd8] sm:$0xf0] }
 0x26a   : > { %2977 = vmatpush.bf16.msrb.mxu1 %v5384_v37  ;;  %2956 = vmatpush.bf16.msra.mxu3 %v5048_v12  ;;  %v5303_v37 = vld [vmem:[#allocation2 + $0x548] sm:$0xf]  ;;  %v6100_v9 = vld [vmem:[#allocation2 + $0x1cc] sm:$0xf]  ;;  %v5560_v49 = vor.u32 %v6278_v11, %v5559_v39  ;;  %v5113_v39 = vld [vmem:[#allocation2 + $0x3d8] sm:$0xf0] }
 0x26b   : > { %v6256_v11 = vld [vmem:[#allocation2 + $0x6ac] sm:$0xf] }
 0x26c   : > { %2995 = vmatpush.bf16.msrb.mxu2 %v5432_v50  ;;  %v6214_v50 = vld [vmem:[#allocation2 + $0x554] sm:$0xf0] }
 0x26d   : > { %2965 = vmatpush.bf16.msrb.mxu0 %v5240_v44  ;;  %v5304_v12 = vor.u32 %v6214_v50, %v5303_v37  ;;  %v5608_v44 = vor.u32 %v6290_v61, %v5607_v60  ;;  %v6064_v37 = vld [vmem:[#allocation2 + $0xac] sm:$0xf]  ;;  %v4713_v60 = vld [vmem:[#allocation2 + $0xb8] sm:$0xf0] }
 0x26e   : > { %2978 = vmatpush.bf16.msrb.mxu1 %v5368_v16  ;;  %2957 = vmatpush.bf16.msra.mxu3 %v5032_v25  ;;  %v5287_v16 = vld [vmem:[#allocation2 + $0x528] sm:$0xf]  ;;  %v5592_v25 = vor.u32 %v6286_v20, %v5591_v18  ;;  %v6096_v61 = vld [vmem:[#allocation2 + $0x1ac] sm:$0xf]  ;;  %v4716_v15 = vor.u32 %v6064_v37, %v4713_v60  ;;  %v6270_v18 = vld [vmem:[#allocation2 + $0x714] sm:$0xf0] }
 0x26f   : > { %v6060_v20 = vld [vmem:[#allocation2 + $0x8c] sm:$0xf] }
 0x270   : > { %2996 = vmatpush.bf16.msrb.mxu2 %v5416_v17  ;;  %v6210_v17 = vld [vmem:[#allocation2 + $0x534] sm:$0xf0]  ;;  %v6252_v37 = vld [vmem:[#allocation2 + $0x68c] sm:$0xf] }
 0x271   : > { %2966 = vmatpush.bf16.msrb.mxu0 %v5224_v56  ;;  %v5288_v24 = vor.u32 %v6210_v17, %v5287_v16  ;;  %v6174_v56 = vld [vmem:[#allocation2 + $0x414] sm:$0xf0]  ;;  %v5527_v17 = vld [vmem:[#allocation2 + $0x708] sm:$0xf] }
 0x272   : > { %2979 = vmatpush.bf16.msrb.mxu1 %v5352_v55  ;;  %2958 = vmatpush.bf16.msra.mxu3 %v5016_v36  ;;  %v5575_v55 = vld [vmem:[#allocation2 + $0x768] sm:$0xf]  ;;  %v5144_v29 = vor.u32 %v6174_v56, %v5143_v40  ;;  %v6116_v36 = vld [vmem:[#allocation2 + $0x24c] sm:$0xf]  ;;  %v4825_v40 = vld [vmem:[#allocation2 + $0x198] sm:$0xf0] }
 0x273   : > { %v6168_v56 = vld [vmem:[#allocation2 + $0x3ec] sm:$0xf] }
 0x274   : > { %2997 = vmatpush.bf16.msrb.mxu2 %v5400_v47  ;;  %v6282_v47 = vld [vmem:[#allocation2 + $0x774] sm:$0xf0] }
 0x275   : > { %2967 = vmatpush.bf16.msrb.mxu0 %v5208_v57  ;;  %2959 = vmatmul.bf16.vlgmr.msra.gmra.mxu3 %v7178_v32  ;;  %v4921_v57 = vld [vmem:[#allocation2 + $0x258] sm:$0xf0]  ;;  %v5576_v21 = vor.u32 %v6282_v47, %v5575_v55  ;;  %v5528_v55 = vor.u32 %v6270_v18, %v5527_v17  ;;  %v6260_v47 = vld [vmem:[#allocation2 + $0x6cc] sm:$0xf] }
 0x276   : > { %2980 = vmatpush.bf16.msrb.mxu1 %v5336_v13  ;;  %3003 = vmatpush.bf16.msrb.mxu3 %v5640_v6  ;;  %v4748_v13 = vor.u32 %v6072_v62, %v4745_v35  ;;  %v4924_v42 = vor.u32 %v6116_v36, %v4921_v57  ;;  %v5497_v62 = vld [vmem:[#allocation2 + $0x6d8] sm:$0xf0]  ;;  %v4828_v35 = vor.u32 %v6092_v14, %v4825_v40  ;;  %v6088_v36 = vld [vmem:[#allocation2 + $0x16c] sm:$0xf] }
 0x277   : > { %2998 = vmatmul.bf16.vlgmr.msrb.gmra.mxu2 %v7155_v51  ;;  %v4809_v57 = vld [vmem:[#allocation2 + $0x178] sm:$0xf0] }
 0x278   : > { %3042 = vmatpush.bf16.msra.mxu2 %v5004_v34  ;;  %v6104_v34 = vld [vmem:[#allocation2 + $0x1ec] sm:$0xf]  ;;  %v5449_v17 = vld [vmem:[#allocation2 + $0x678] sm:$0xf0] }
 0x279   : > { %2968 = vmatpush.bf16.msrb.mxu0 %v5192_v45  ;;  %v4876_v6 = vor.u32 %v6104_v34, %v4873_v10  ;;  %v6112_v45 = vld [vmem:[#allocation2 + $0x22c] sm:$0xf]  ;;  %v5132_v10 = vor.u32 %v6168_v56, %v5129_v26  ;;  %v5065_v56 = vld [vmem:[#allocation2 + $0x378] sm:$0xf0] }
 0x27a   : > { %2981 = vmatpush.bf16.msrb.mxu1 %v5320_v52  ;;  %3004 = vmatpush.bf16.msrb.mxu3 %v5624_v54  ;;  %v7213_v33 = vpop.f32.mrf.mxu2  ;;  %v4732_v52 = vor.u32 %v6068_v41, %v4729_v8  ;;  %v4908_v50 = vor.u32 %v6112_v45, %v4905_v48  ;;  %v6056_v34 = vld [vmem:[#allocation2 + $0x6c] sm:$0xf]  ;;  %v5481_v41 = vld [vmem:[#allocation2 + $0x6b8] sm:$0xf0]  ;;  %v4812_v8 = vor.u32 %v6088_v36, %v4809_v57 }
 0x27b   : > { %v4665_v45 = vld [vmem:[#allocation2 + $0x58] sm:$0xf0]  ;;  %v6084_v48 = vld [vmem:[#allocation2 + $0x14c] sm:$0xf] }
 0x27c   : > { %3043 = vmatpush.bf16.msra.mxu2 %v4988_v43  ;;  %v4857_v43 = vld [vmem:[#allocation2 + $0x1d8] sm:$0xf0] }
 0x27d   : > { %2969 = vmatpush.bf16.msrb.mxu0 %v5176_v38  ;;  %v4860_v54 = vor.u32 %v6100_v9, %v4857_v43  ;;  %v6052_v9 = vld [vmem:[#allocation2 + $0x4c] sm:$0xf] }
 0x27e   : > { %2982 = vmatpush.bf16.msrb.mxu1 %v5304_v12  ;;  %3005 = vmatpush.bf16.msrb.mxu3 %v5608_v44  ;;  %v5544_v12 = vor.u32 %v6274_v59, %v5543_v58  ;;  %v6264_v44 = vld [vmem:[#allocation2 + $0x6ec] sm:$0xf]  ;;  %v5097_v59 = vld [vmem:[#allocation2 + $0x3b8] sm:$0xf0]  ;;  %v4668_v60 = vor.u32 %v6052_v9, %v4665_v45 }
 0x27f   : > { %v6160_v58 = vld [vmem:[#allocation2 + $0x3ac] sm:$0xf] }
 0x280   : > { %3044 = vmatpush.bf16.msra.mxu2 %v4972_v63  ;;  %v4841_v63 = vld [vmem:[#allocation2 + $0x1b8] sm:$0xf0]  ;;  %v6228_v45 = vld [vmem:[#allocation2 + $0x5cc] sm:$0xf] }
 0x281   : > { %2970 = vmatpush.bf16.msrb.mxu0 %v5160_v22  ;;  %v4844_v16 = vor.u32 %v6096_v61, %v4841_v63  ;;  %v4892_v22 = vor.u32 %v6108_v0, %v4889_v1  ;;  %v6048_v63 = vld [vmem:[#allocation2 + $0x2c] sm:$0xf]  ;;  %v4777_v1 = vld [vmem:[#allocation2 + $0x138] sm:$0xf0] }
 0x282   : > { %2983 = vmatpush.bf16.msrb.mxu1 %v5288_v24  ;;  %3006 = vmatpush.bf16.msrb.mxu3 %v5592_v25  ;;  %v2741_v38 = vpop.f32.mrf.mxu2  ;;  %v5516_v25 = vor.u32 %v6264_v44, %v5513_v4  ;;  %v6080_v0 = vld [vmem:[#allocation2 + $0x12c] sm:$0xf] }
 0x283   : > { %v4649_v38 = vld [vmem:[#allocation2 + $0x38] sm:$0xf0]  ;;  %v6156_v4 = vld [vmem:[#allocation2 + $0x38c] sm:$0xf] }
 0x284   : > { %3045 = vmatpush.bf16.msra.mxu2 %v4956_v5  ;;  %v4652_v18 = vor.u32 %v6048_v63, %v4649_v38  ;;  %v5225_v38 = vld [vmem:[#allocation2 + $0x4b8] sm:$0xf0] }
 0x285   : > { %2971 = vmatpush.bf16.msrb.mxu0 %v5144_v29  ;;  %v2713_v5 = vpop.f32.mrf.mxu0  ;;  %v4681_v29 = vld [vmem:[#allocation2 + $0x78] sm:$0xf0] }
 0x286   : > { %2984 = vmatpush.bf16.msrb.mxu1 %v5272_v3  ;;  %3007 = vmatpush.bf16.msrb.mxu3 %v5576_v21  ;;  %v2726_v24 = vpop.f32.mrf.mxu1 }
 0x287   : > { %v2727_v27 = vadd.f32 %v2726_v24, %v2713_v5  ;;  %v6044_v5 = vld [vmem:[#allocation2 + $0xc] sm:$0xf]  ;;  %v4761_v24 = vld [vmem:[#allocation2 + $0x118] sm:$0xf0] }
 0x288   : > { %3046 = vmatpush.bf16.msra.mxu2 %v4940_v19  ;;  %2972 = vmatmul.bf16.vlgmr.msrb.gmra.mxu0 %v7183_v46  ;;  %v4700_v19 = vor.u32 %v6060_v20, %v4697_v7  ;;  %v4780_v20 = vor.u32 %v6080_v0, %v4777_v1  ;;  %v6076_v7 = vld [vmem:[#allocation2 + $0x10c] sm:$0xf] }
 0x289   : > { %3016 = vmatpush.bf16.msra.mxu0 %v4748_v13  ;;  %2985 = vmatmul.bf16.vlgmr.msrb.gmra.mxu1 %v7185_v2  ;;  %v7218_v3 = vadd.f32 %v7213_v33, %v2727_v27  ;;  %v5500_v13 = vor.u32 %v6260_v47, %v5497_v62  ;;  %v5257_v47 = vld [vmem:[#allocation2 + $0x4f8] sm:$0xf0]  ;;  %v6232_v62 = vld [vmem:[#allocation2 + $0x5ec] sm:$0xf]  ;;  %v4764_v57 = vor.u32 %v6076_v7, %v4761_v24 }
 0x28a   : > { %3029 = vmatpush.bf16.msra.mxu1 %v4876_v6  ;;  %3008 = vmatpush.bf16.msrb.mxu3 %v5560_v49  ;;  %v7220_v21 = vpop.f32.mrf.mxu2  ;;  %v6164_v6 = vld [vmem:[#allocation2 + $0x3cc] sm:$0xf]  ;;  %v4793_v49 = vld [vmem:[#allocation2 + $0x158] sm:$0xf0] }
 0x28b   : > { %v5116_v43 = vor.u32 %v6164_v6, %v5113_v39  ;;  %v4796_v61 = vor.u32 %v6084_v48, %v4793_v49  ;;  %v6148_v39 = vld [vmem:[#allocation2 + $0x34c] sm:$0xf]  ;;  %v5369_v48 = vld [vmem:[#allocation2 + $0x5d8] sm:$0xf0] }
 0x28c   : > { %3047 = vmatpush.bf16.msra.mxu2 %v4924_v42  ;;  %v4684_v42 = vor.u32 %v6056_v34, %v4681_v29  ;;  %v6244_v34 = vld [vmem:[#allocation2 + $0x64c] sm:$0xf]  ;;  %v5641_v24 = vld [vmem:[#allocation2 + $0x7f8] sm:$0xf0] }
 0x28d   : > { %3017 = vmatpush.bf16.msra.mxu0 %v4732_v52  ;;  %v2715_v33 = vpop.f32.mrf.mxu0  ;;  %v6240_v49 = vld [vmem:[#allocation2 + $0x62c] sm:$0xf] }
 0x28e   : > { %3030 = vmatpush.bf16.msra.mxu1 %v4860_v54  ;;  %3009 = vmatpush.bf16.msrb.mxu3 %v5544_v12  ;;  %v2728_v52 = vpop.f32.mrf.mxu1  ;;  %v5484_v54 = vor.u32 %v6256_v11, %v5481_v41  ;;  %v5049_v11 = vld [vmem:[#allocation2 + $0x358] sm:$0xf0]  ;;  %v6224_v0 = vld [vmem:[#allocation2 + $0x5ac] sm:$0xf] }
 0x28f   : > { %v5241_v33 = vld [vmem:[#allocation2 + $0x4d8] sm:$0xf0]  ;;  %v6188_v7 = vld [vmem:[#allocation2 + $0x48c] sm:$0xf] }
 0x290   : > { %3048 = vmatpush.bf16.msra.mxu2 %v4908_v50  ;;  %v5465_v50 = vld [vmem:[#allocation2 + $0x698] sm:$0xf0] }
 0x291   : > { %3018 = vmatpush.bf16.msra.mxu0 %v4716_v15  ;;  %v5468_v44 = vor.u32 %v6252_v37, %v5465_v50  ;;  %v5081_v15 = vld [vmem:[#allocation2 + $0x398] sm:$0xf0]  ;;  %v6144_v37 = vld [vmem:[#allocation2 + $0x32c] sm:$0xf] }
 0x292   : > { %3031 = vmatpush.bf16.msra.mxu1 %v4844_v16  ;;  %3010 = vmatpush.bf16.msrb.mxu3 %v5528_v55  ;;  %v2793_v12 = vpop.f32.mrf.mxu2  ;;  %v6248_v16 = vld [vmem:[#allocation2 + $0x66c] sm:$0xf]  ;;  %v5084_v14 = vor.u32 %v6156_v4, %v5081_v15  ;;  %v5417_v52 = vld [vmem:[#allocation2 + $0x638] sm:$0xf0] }
 0x293   : > { %v5452_v27 = vor.u32 %v6248_v16, %v5449_v17  ;;  %v6200_v55 = vld [vmem:[#allocation2 + $0x4ec] sm:$0xf]  ;;  %v5033_v50 = vld [vmem:[#allocation2 + $0x338] sm:$0xf0]  ;;  %v5420_v63 = vor.u32 %v6240_v49, %v5417_v52 }
 0x294   : > { %3049 = vmatpush.bf16.msra.mxu2 %v4892_v22  ;;  %v4633_v22 = vld [vmem:[#allocation2 + $0x18] sm:$0xf0]  ;;  %v5260_v6 = vor.u32 %v6200_v55, %v5257_v47  ;;  %v6236_v4 = vld [vmem:[#allocation2 + $0x60c] sm:$0xf]  ;;  %v5036_v16 = vor.u32 %v6144_v37, %v5033_v50 }
 0x295   : > { %3019 = vmatpush.bf16.msra.mxu0 %v4700_v19  ;;  %3011 = vmatmul.bf16.vlgmr.msrb.gmra.mxu3 %v7198_v23  ;;  %v2765_v40 = vpop.f32.mrf.mxu0  ;;  %v4636_v36 = vor.u32 %v6044_v5, %v4633_v22  ;;  %v5401_v15 = vld [vmem:[#allocation2 + $0x618] sm:$0xf0]  ;;  %v6184_v47 = vld [vmem:[#allocation2 + $0x46c] sm:$0xf] }
 0x296   : > { %3032 = vmatpush.bf16.msra.mxu1 %v4828_v35  ;;  %3055 = vmatpush.bf16.msra.mxu3 %v5132_v10  ;;  %v2778_v26 = vpop.f32.mrf.mxu1  ;;  %v5385_v35 = vld [vmem:[#allocation2 + $0x5f8] sm:$0xf0]  ;;  %v6176_v52 = vld [vmem:[#allocation2 + $0x42c] sm:$0xf] }
 0x297   : > { %3050 = vmatmul.bf16.vlgmr.msra.gmra.mxu2 %v7126_v53  ;;  %v5100_v53 = vor.u32 %v6160_v58, %v5097_v59  ;;  %v2752_v19 = vpop.f32.mrf.mxu3  ;;  %v5433_v10 = vld [vmem:[#allocation2 + $0x658] sm:$0xf0]  ;;  %v6284_v50 = vld [vmem:[#allocation2 + $0x78c] sm:$0xf] }
 0x298   : > { %3094 = vmatpush.bf16.msrb.mxu2 %v5516_v25  ;;  %v6152_v25 = vld [vmem:[#allocation2 + $0x36c] sm:$0xf]  ;;  %v2753_v29 = vadd.f32 %v2752_v19, %v7218_v3  ;;  %v5436_v9 = vor.u32 %v6244_v34, %v5433_v10  ;;  %v5321_v10 = vld [vmem:[#allocation2 + $0x578] sm:$0xf0] }
 0x299   : > { %3020 = vmatpush.bf16.msra.mxu0 %v4684_v42  ;;  %v6216_v19 = vld [vmem:[#allocation2 + $0x56c] sm:$0xf]  ;;  %v5289_v37 = vld [vmem:[#allocation2 + $0x538] sm:$0xf0] }
 0x29a   : > { %3033 = vmatpush.bf16.msra.mxu1 %v4812_v8  ;;  %3056 = vmatpush.bf16.msra.mxu3 %v5116_v43  ;;  %v2766_v41 = vadd.f32 %v2765_v40, %v2753_v29  ;;  %v7225_v42 = vpop.f32.mrf.mxu2  ;;  %v5388_v8 = vor.u32 %v6232_v62, %v5385_v35  ;;  %v6196_v43 = vld [vmem:[#allocation2 + $0x4cc] sm:$0xf]  ;;  %v5337_v40 = vld [vmem:[#allocation2 + $0x598] sm:$0xf0] }
 0x29b   : > { %v5244_v59 = vor.u32 %v6196_v43, %v5241_v33  ;;  %v5193_v62 = vld [vmem:[#allocation2 + $0x478] sm:$0xf0]  ;;  %v6292_v29 = vld [vmem:[#allocation2 + $0x7cc] sm:$0xf] }
 0x29c   : > { %3095 = vmatpush.bf16.msrb.mxu2 %v5500_v13  ;;  %v5068_v13 = vor.u32 %v6152_v25, %v5065_v56  ;;  %v2779_v3 = vadd.f32 %v2778_v26, %v2766_v41  ;;  %v6212_v41 = vld [vmem:[#allocation2 + $0x54c] sm:$0xf]  ;;  %v5609_v43 = vld [vmem:[#allocation2 + $0x7b8] sm:$0xf0] }
 0x29d   : > { %3021 = vmatpush.bf16.msra.mxu0 %v4668_v60  ;;  %v2767_v58 = vpop.f32.mrf.mxu0 }
 0x29e   : > { %3034 = vmatpush.bf16.msra.mxu1 %v4796_v61  ;;  %3057 = vmatpush.bf16.msra.mxu3 %v5100_v53  ;;  %v2780_v60 = vpop.f32.mrf.mxu1  ;;  %v5372_v61 = vor.u32 %v6228_v45, %v5369_v48  ;;  %v6192_v53 = vld [vmem:[#allocation2 + $0x4ac] sm:$0xf]  ;;  %v7228_v1 = vadd.f32 %v7220_v21, %v2779_v3  ;;  %v5404_v21 = vor.u32 %v6236_v4, %v5401_v15  ;;  %v5161_v3 = vld [vmem:[#allocation2 + $0x438] sm:$0xf0] }
 0x29f   : > { %v2754_v12 = vpop.f32.mrf.mxu3  ;;  %v5228_v17 = vor.u32 %v6192_v53, %v5225_v38  ;;  %v5164_v60 = vor.u32 %v6176_v52, %v5161_v3  ;;  %v5145_v53 = vld [vmem:[#allocation2 + $0x418] sm:$0xf0]  ;;  %v6204_v38 = vld [vmem:[#allocation2 + $0x50c] sm:$0xf] }
 0x2a0   : > { %3096 = vmatpush.bf16.msrb.mxu2 %v5484_v54  ;;  %v5052_v54 = vor.u32 %v6148_v39, %v5049_v11  ;;  %v6180_v39 = vld [vmem:[#allocation2 + $0x44c] sm:$0xf]  ;;  %v5177_v11 = vld [vmem:[#allocation2 + $0x458] sm:$0xf0] }
 0x2a1   : > { %3022 = vmatpush.bf16.msra.mxu0 %v4652_v18  ;;  %v6140_v18 = vld [vmem:[#allocation2 + $0x30c] sm:$0xf]  ;;  %v5180_v33 = vor.u32 %v6180_v39, %v5177_v11 }
 0x2a2   : > { %3035 = vmatpush.bf16.msra.mxu1 %v4780_v20  ;;  %3058 = vmatpush.bf16.msra.mxu3 %v5084_v14  ;;  %v5017_v20 = vld [vmem:[#allocation2 + $0x318] sm:$0xf0]  ;;  %v2845_v5 = vpop.f32.mrf.mxu2  ;;  %v6280_v12 = vld [vmem:[#allocation2 + $0x76c] sm:$0xf] }
 0x2a3   : > { %v5209_v14 = vld [vmem:[#allocation2 + $0x498] sm:$0xf0]  ;;  %v5020_v25 = vor.u32 %v6140_v18, %v5017_v20 }
 0x2a4   : > { %3097 = vmatpush.bf16.msrb.mxu2 %v5468_v44  ;;  %v5353_v44 = vld [vmem:[#allocation2 + $0x5b8] sm:$0xf0]  ;;  %v5212_v56 = vor.u32 %v6188_v7, %v5209_v14 }
 0x2a5   : > { %3023 = vmatpush.bf16.msra.mxu0 %v4636_v36  ;;  %v5356_v22 = vor.u32 %v6224_v0, %v5353_v44  ;;  %v7232_v26 = vpop.f32.mrf.mxu0  ;;  %v5625_v36 = vld [vmem:[#allocation2 + $0x7d8] sm:$0xf0] }
 0x2a6   : > { %3036 = vmatpush.bf16.msra.mxu1 %v4764_v57  ;;  %3059 = vmatpush.bf16.msra.mxu3 %v5068_v13  ;;  %v7234_v35 = vpop.f32.mrf.mxu1  ;;  %v5196_v57 = vor.u32 %v6184_v47, %v5193_v62  ;;  %v5324_v13 = vor.u32 %v6216_v19, %v5321_v10  ;;  %v5273_v0 = vld [vmem:[#allocation2 + $0x518] sm:$0xf0] }
 0x2a7   : > { %v7236_v34 = vpop.f32.mrf.mxu3  ;;  %v5577_v44 = vld [vmem:[#allocation2 + $0x778] sm:$0xf0]  ;;  %v5276_v15 = vor.u32 %v6204_v38, %v5273_v0 }
 0x2a8   : > { %3098 = vmatpush.bf16.msrb.mxu2 %v5452_v27  ;;  %3024 = vmatmul.bf16.vlgmr.msra.gmra.mxu0 %v7157_v28  ;;  %v6220_v28 = vld [vmem:[#allocation2 + $0x58c] sm:$0xf]  ;;  %v5561_v18 = vld [vmem:[#allocation2 + $0x758] sm:$0xf0] }
 0x2a9   : > { %3068 = vmatpush.bf16.msrb.mxu0 %v5260_v6  ;;  %3037 = vmatmul.bf16.vlgmr.msra.gmra.mxu1 %v7159_v31  ;;  %v6296_v31 = vld [vmem:[#allocation2 + $0x7ec] sm:$0xf]  ;;  %v5340_v27 = vor.u32 %v6220_v28, %v5337_v40  ;;  %v5628_v6 = vor.u32 %v6292_v29, %v5625_v36  ;;  %v5545_v7 = vld [vmem:[#allocation2 + $0x738] sm:$0xf0] }
 0x2aa   : > { %3081 = vmatpush.bf16.msrb.mxu1 %v5388_v8  ;;  %3060 = vmatpush.bf16.msra.mxu3 %v5052_v54  ;;  %v5644_v55 = vor.u32 %v6296_v31, %v5641_v24  ;;  %v5305_v8 = vld [vmem:[#allocation2 + $0x558] sm:$0xf0]  ;;  %v6208_v54 = vld [vmem:[#allocation2 + $0x52c] sm:$0xf] }
 0x2ab   : > { %v5308_v48 = vor.u32 %v6212_v41, %v5305_v8  ;;  %v6268_v28 = vld [vmem:[#allocation2 + $0x70c] sm:$0xf]  ;;  %v5529_v40 = vld [vmem:[#allocation2 + $0x718] sm:$0xf0] }
 0x2ac   : > { %3099 = vmatpush.bf16.msrb.mxu2 %v5436_v9  ;;  %v6288_v9 = vld [vmem:[#allocation2 + $0x7ac] sm:$0xf] }
 0x2ad   : > { %3069 = vmatpush.bf16.msrb.mxu0 %v5244_v59  ;;  %v2819_v45 = vpop.f32.mrf.mxu0  ;;  %v5612_v49 = vor.u32 %v6288_v9, %v5609_v43 }
 0x2ae   : > { %3082 = vmatpush.bf16.msrb.mxu1 %v5372_v61  ;;  %3061 = vmatpush.bf16.msra.mxu3 %v5036_v16  ;;  %v2832_v58 = vpop.f32.mrf.mxu1  ;;  %v5580_v16 = vor.u32 %v6280_v12, %v5577_v44 }
 0x2af   : > { %v2806_v59 = vpop.f32.mrf.mxu3 }
 0x2b0   : > { %3100 = vmatpush.bf16.msrb.mxu2 %v5420_v63  ;;  %v6172_v63 = vld [vmem:[#allocation2 + $0x40c] sm:$0xf] }
 0x2b1   : > { %3070 = vmatpush.bf16.msrb.mxu0 %v5228_v17  ;;  %v5148_v4 = vor.u32 %v6172_v63, %v5145_v53  ;;  %v6276_v17 = vld [vmem:[#allocation2 + $0x74c] sm:$0xf] }
 0x2b2   : > { %3083 = vmatpush.bf16.msrb.mxu1 %v5356_v22  ;;  %3062 = vmatpush.bf16.msra.mxu3 %v5020_v25  ;;  %v5564_v22 = vor.u32 %v6276_v17, %v5561_v18  ;;  %v5532_v25 = vor.u32 %v6268_v28, %v5529_v40 }
 0x2b4   : > { %3101 = vmatpush.bf16.msrb.mxu2 %v5404_v21  ;;  %v6272_v21 = vld [vmem:[#allocation2 + $0x72c] sm:$0xf] }
 0x2b5   : > { %3071 = vmatpush.bf16.msrb.mxu0 %v5212_v56  ;;  %3063 = vmatmul.bf16.vlgmr.msra.gmra.mxu3 %v7178_v32  ;;  %v5292_v32 = vor.u32 %v6208_v54, %v5289_v37  ;;  %v5548_v14 = vor.u32 %v6272_v21, %v5545_v7 }
 0x2b6   : > { %3084 = vmatpush.bf16.msrb.mxu1 %v5340_v27  ;;  %3107 = vmatpush.bf16.msrb.mxu3 %v5644_v55  ;;  %v2831_v55 = vadd.f32 %v7234_v35, %v7232_v26 }
 0x2b7   : > { %3102 = vmatmul.bf16.vlgmr.msrb.gmra.mxu2 %v7155_v51  ;;  %v5593_v51 = vld [vmem:[#allocation2 + $0x798] sm:$0xf0] }
 0x2b8   : > { %v5596_v61 = vor.u32 %v6284_v50, %v5593_v51  ;;  %v2856_v5 = vpop.f32.mrf.mxu3  ;;  %v2844_v47 = vadd.f32 %v7225_v42, %v2831_v55  ;;  %v7252_v42 = vadd.f32 %v7236_v34, %v7228_v1  ;;  %v3432_v55 = vld [vmem:[%s7634_s6 + $0x8] sm:$0xff] }
 0x2b9   : > { %3072 = vmatpush.bf16.msrb.mxu0 %v5196_v57 }
 0x2ba   : > { %3085 = vmatpush.bf16.msrb.mxu1 %v5324_v13  ;;  %3108 = vmatpush.bf16.msrb.mxu3 %v5628_v6  ;;  %v2895_v20 = vpop.f32.mrf.mxu2 }
 0x2bd   : > { %3073 = vmatpush.bf16.msrb.mxu0 %v5180_v33 }
 0x2be   : > { %3086 = vmatpush.bf16.msrb.mxu1 %v5308_v48  ;;  %3109 = vmatpush.bf16.msrb.mxu3 %v5612_v49 }
 0x2c0   : > { %v2858_v24 = vpop.f32.mrf.mxu3 }
 0x2c1   : > { %3074 = vmatpush.bf16.msrb.mxu0 %v5164_v60 }
 0x2c2   : > { %3087 = vmatpush.bf16.msrb.mxu1 %v5292_v32  ;;  %3110 = vmatpush.bf16.msrb.mxu3 %v5596_v61  ;;  %v2897_v31 = vpop.f32.mrf.mxu2 }
 0x2c3   : > { %v3139_v31 = vld [vmem:[%s7635_s7] ss:$2 sm:$0xf] }
 0x2c4   : > { %v3142_v24 = vperm.slane %v3139_v31, 1 }
 0x2c5   : > { %3075 = vmatpush.bf16.msrb.mxu0 %v5148_v4  ;;  %v2869_v56 = vpop.f32.mrf.mxu0 }
 0x2c6   : > { %3088 = vmatpush.bf16.msrb.mxu1 %v5276_v15  ;;  %3111 = vmatpush.bf16.msrb.mxu3 %v5580_v16  ;;  %v2882_v27 = vpop.f32.mrf.mxu1 }
 0x2c8   : > { %3076 = vmatmul.bf16.vlgmr.msrb.gmra.mxu0 %v7183_v46  ;;  %v2857_v46 = vadd.f32 %v2856_v5, %v2844_v47 }
 0x2c9   : > { %3089 = vmatmul.bf16.vlgmr.msrb.gmra.mxu1 %v7185_v2 }
 0x2ca   : > { %3112 = vmatpush.bf16.msrb.mxu3 %v5564_v22  ;;  %v2870_v19 = vadd.f32 %v2869_v56, %v2857_v46 }
 0x2cc   : > { %v2883_v10 = vadd.f32 %v2882_v27, %v2870_v19 }
 0x2cd   : > { %v2871_v2 = vpop.f32.mrf.mxu0 }
 0x2ce   : > { %3113 = vmatpush.bf16.msrb.mxu3 %v5548_v14  ;;  %v2884_v62 = vpop.f32.mrf.mxu1  ;;  %v2896_v36 = vadd.f32 %v2895_v20, %v2883_v10  ;;  %v6300_v10 = vld [vmem:[%s7633_s5] sm:$0xff] }
 0x2d2   : > { %3114 = vmatpush.bf16.msrb.mxu3 %v5532_v25 }
 0x2d5   : > { %3115 = vmatmul.bf16.vlgmr.msrb.gmra.mxu3 %v7198_v23 }
 0x2d8   : > { %v2908_v57 = vpop.f32.mrf.mxu3 }
 0x2d9   : > { %v7246_v13 = vadd.f32 %v2908_v57, %v2896_v36 }
 0x2da   : > { %v2947_v29 = vpop.f32.mrf.mxu2 }
 0x2db   : > { %3129 = vrot.lane.b32.xlu1 %v7246_v13, %s6699_s29  ;;  %v3124_v46 = vpack.c.bf16 %v7246_v13, %v7246_v13 }
 0x2dd   : > { %v3249_v19 = vsel %vm3168_vm4, %v3124_v46, 0 }
 0x2e0   : > { %v2910_v26 = vpop.f32.mrf.mxu3 }
 0x2e2   : > { %v2949_v6 = vpop.f32.mrf.mxu2 }
 0x2e3   : > { %3127 = vrot.lane.b32.xlu1 %v7252_v42, %s6699_s29 }
 0x2e5   : > { %v2921_v23 = vpop.f32.mrf.mxu0 }
 0x2e6   : > { %v2934_v35 = vpop.f32.mrf.mxu1 }
 0x2e7   : > { %v2935_v48 = vadd.f32 %v2934_v35, %v2921_v23 }
 0x2e9   : > { %v2948_v49 = vadd.f32 %v2947_v29, %v2935_v48  ;;  %v3143_v29 = vperm.slane %v3139_v31, 2  ;;  %v3144_v48 = vperm.slane %v3139_v31, 3 }
 0x2ed   : > { %v2923_v39 = vpop.f32.mrf.mxu0 }
 0x2ee   : > { %v2936_v11 = vpop.f32.mrf.mxu1  ;;  %v6299_v39 = vld [vmem:[%s7633_s5 + $0x8] sm:$0xff] }
 0x2f8   : > { %v2960_v8 = vpop.f32.mrf.mxu3 }
 0x2f9   : > { %v2961_v52 = vadd.f32 %v2960_v8, %v2948_v49  ;;  %v3431_v8 = vld [vmem:[%s7634_s6] sm:$0xff] }
 0x2fa   : > { %v2999_v41 = vpop.f32.mrf.mxu2 }
 0x300   : > { %v2962_v43 = vpop.f32.mrf.mxu3 }
 0x302   : > { %v3001_v9 = vpop.f32.mrf.mxu2 }
 0x305   : > { %v2973_v33 = vpop.f32.mrf.mxu0 }
 0x306   : > { %v2986_v45 = vpop.f32.mrf.mxu1  ;;  %v2974_v1 = vadd.f32 %v2973_v33, %v2961_v52 }
 0x308   : > { %v2987_v34 = vadd.f32 %v2986_v45, %v2974_v1  ;;  %v3141_v45 = vperm.slane %v3139_v31, 0 }
 0x30a   : > { %v3000_v59 = vadd.f32 %v2999_v41, %v2987_v34  ;;  %v5663_v41 = vld [vmem:[%s7635_s7 + $0x1] ss:$2 sm:$0xf] }
 0x30b   : > { %v3328_v43 = vperm.slane %v5663_v41, 0  ;;  %v3331_v49 = vperm.slane %v5663_v41, 3 }
 0x30d   : > { %v2975_v3 = vpop.f32.mrf.mxu0 }
 0x30e   : > { %v2988_v54 = vpop.f32.mrf.mxu1 }
 0x318   : > { %v3012_v37 = vpop.f32.mrf.mxu3 }
 0x319   : > { %v3013_v50 = vadd.f32 %v3012_v37, %v3000_v59 }
 0x31a   : > { %v3051_v58 = vpop.f32.mrf.mxu2 }
 0x31b   : > { %3131 = vrot.lane.b32.xlu2 %v3013_v50, %s6699_s29  ;;  %v3125_v6 = vpack.c.bf16 %v3013_v50, %v3013_v50 }
 0x31d   : > { %v3252_v35 = vsel %vm3168_vm4, %v3125_v6, 0 }
 0x320   : > { %v3014_v60 = vpop.f32.mrf.mxu3 }
 0x322   : > { %v3053_v51 = vpop.f32.mrf.mxu2 }
 0x323   : > { %3313 = vrot.lane.b32.xlu2 %v7252_v42, %s6700_s14  ;;  %v3123_v51 = vpack.c.bf16 %v7252_v42, %v7252_v42 }
 0x325   : > { %v3025_v32 = vpop.f32.mrf.mxu0 }
 0x326   : > { %v3038_v61 = vpop.f32.mrf.mxu1 }
 0x327   : > { %v3039_v16 = vadd.f32 %v3038_v61, %v3025_v32 }
 0x329   : > { %v3052_v17 = vadd.f32 %v3051_v58, %v3039_v16 }
 0x32b   : > { %3315 = vrot.lane.b32.xlu2 %v7246_v13, %s6700_s14 }
 0x32d   : > { %v3027_v63 = vpop.f32.mrf.mxu0 }
 0x32e   : > { %v3040_v53 = vpop.f32.mrf.mxu1 }
 0x32f   : > { %v3329_v53 = vperm.slane %v5663_v41, 1 }
 0x338   : > { %v3064_v0 = vpop.f32.mrf.mxu3 }
 0x339   : > { %v3065_v18 = vadd.f32 %v3064_v0, %v3052_v17 }
 0x33a   : > { %v3103_v38 = vpop.f32.mrf.mxu2 }
 0x340   : > { %v3066_v44 = vpop.f32.mrf.mxu3 }
 0x341   : > { %v3330_v44 = vperm.slane %v5663_v41, 2 }
 0x342   : > { %v3105_v12 = vpop.f32.mrf.mxu2 }
 0x345   : > { %v3077_v4 = vpop.f32.mrf.mxu0 }
 0x346   : > { %v3090_v15 = vpop.f32.mrf.mxu1  ;;  %v3078_v22 = vadd.f32 %v3077_v4, %v3065_v18 }
 0x348   : > { %v3091_v21 = vadd.f32 %v3090_v15, %v3078_v22  ;;  %v3246_v15 = vsel %vm3168_vm4, %v3123_v51, 0  ;;  %v6333_v51 = vld [vmem:[#allocation5 + $0xf4] sm:$0xf0] }
 0x34a   : > { %v3104_v7 = vadd.f32 %v3103_v38, %v3091_v21 }
 0x34d   : > { %v3079_v20 = vpop.f32.mrf.mxu0  ;;  %v3130_v14 = vpop.permute.xlu1 %3129 }
 0x34e   : > { %v3092_v5 = vpop.f32.mrf.mxu1 }
 0x355   : > { %v3128_v25 = vpop.permute.xlu1 %3127 }
 0x356   : > { %v3137_v27 = vsel %vm574_vm0, %v3128_v25, %v3130_v14 }
 0x357   : > { %v3150_v47 = vmul.f32 %v3142_v24, %v3137_v27 }
 0x358   : > { %v3116_v28 = vpop.f32.mrf.mxu3 }
 0x359   : > { %v7261_v40 = vadd.f32 %v3116_v28, %v3104_v7  ;;  %v3156_v2 = vpack.c.bf16 %v3150_v47, %v3150_v47 }
 0x35b   : > { %3133 = vrot.lane.b32.xlu0 %v7261_v40, %s6699_s29  ;;  %3319 = vrot.lane.b32.xlu1 %v7261_v40, %s6700_s14  ;;  %v3173_v62 = vsel %vm3168_vm4, %v3156_v2, 0  ;;  %v3126_v60 = vpack.c.bf16 %v7261_v40, %v7261_v40  ;;  %v6301_v40 = vld [vmem:[%s7633_s5 + $0x10] sm:$0xff] }
 0x35c   : > { %3202 = vmatpush.bf16.msra.mxu1 %v3173_v62 }
 0x35d   : > { %v3255_v4 = vsel %vm3168_vm4, %v3126_v60, 0  ;;  %v5724_v60 = vld [vmem:[#allocation5 + $0x60] sm:$0xf] }
 0x35f   : > { %5652 = vmatmul.msk.bf16.vlgmr.msra.gmra.mxu1 %vm3164_vm5, %v6300_v10 }
 0x360   : > { %v3118_v56 = vpop.f32.mrf.mxu3  ;;  %3278 = vmatpush.bf16.msrb.mxu1 %v3249_v19 }
 0x363   : > { %3317 = vrot.lane.b32.xlu0 %v3013_v50, %s6700_s14  ;;  %3440 = vperm.xlu1 %6470, %v3432_v55  }
 0x36b   : > { %3435 = vperm.xlu0 %6486, %v3431_v8  }
 0x36f   : > { %5660 = vmatmul.msk.bf16.vlgmr.msrb.gmra.mxu1 %vm3164_vm5, %v6299_v39 }
 0x375   : > { %v3132_v36 = vpop.permute.xlu2 %3131 }
 0x376   : > { %v3136_v57 = vsel %vm574_vm0, %v3130_v14, %v3132_v36 }
 0x377   : > { %v3151_v13 = vmul.f32 %v3143_v29, %v3136_v57 }
 0x379   : > { %v3157_v26 = vpack.c.bf16 %v3151_v13, %v3151_v13 }
 0x37b   : > { %v3176_v23 = vsel %vm3168_vm4, %v3157_v26, 0 }
 0x37c   : > { %3216 = vmatpush.bf16.msra.mxu2 %v3176_v23 }
 0x37d   : > { %v3314_v11 = vpop.permute.xlu2 %3313 }
 0x37f   : > { %5653 = vmatmul.msk.bf16.vlgmr.msra.gmra.mxu2 %vm3164_vm5, %v6300_v10 }
 0x380   : > { %3292 = vmatpush.bf16.msrb.mxu2 %v3252_v35 }
 0x385   : > { %v3316_v9 = vpop.permute.xlu2 %3315 }
 0x386   : > { %v3323_v33 = vsel %vm921_vm3, %v3314_v11, %v3316_v9 }
 0x387   : > { %v3336_v54 = vmul.f32 %v3328_v43, %v3323_v33 }
 0x389   : > { %v3343_v63 = vpack.c.bf16 %v3336_v54, %v3336_v54 }
 0x38b   : > { %v3356_v5 = vsel %vm3168_vm4, %v3343_v63, 0 }
 0x38f   : > { %5661 = vmatmul.msk.bf16.vlgmr.msrb.gmra.mxu2 %vm3164_vm5, %v6299_v39 }
 0x3cd   : > { %v3134_v52 = vpop.permute.xlu0 %3133  ;;  %v3320_v3 = vpop.permute.xlu1 %3319 }
 0x3ce   : > { %v3135_v1 = vsel %vm574_vm0, %v3132_v36, %v3134_v52  ;;  %v3138_v34 = vsel %vm574_vm0, %v3134_v52, %v3128_v25  ;;  %v3324_v58 = vsel %vm921_vm3, %v3320_v3, %v3314_v11 }
 0x3cf   : > { %v3149_v59 = vmul.f32 %v3141_v45, %v3138_v34  ;;  %v3152_v37 = vmul.f32 %v3144_v48, %v3135_v1  ;;  %v3339_v50 = vmul.f32 %v3331_v49, %v3324_v58  ;;  %v5732_v34 = vld [vmem:[#allocation5 + $0x70] sm:$0xf]  ;;  %v6317_v58 = vld [vmem:[#allocation5 + $0x74] sm:$0xf0] }
 0x3d1   : > { %v3155_v32 = vpack.c.bf16 %v3149_v59, %v3149_v59  ;;  %v3158_v61 = vpack.c.bf16 %v3152_v37, %v3152_v37  ;;  %v3346_v38 = vpack.c.bf16 %v3339_v50, %v3339_v50  ;;  %v5796_v59 = vld [vmem:[#allocation5 + $0xf0] sm:$0xf]  ;;  %v5733_v50 = vor.u32 %v6317_v58, %v5732_v34  ;;  %v5692_v58 = vld [vmem:[#allocation5 + $0x20] sm:$0xf] }
 0x3d3   : > { %v3170_v0 = vsel %vm3168_vm4, %v3155_v32, 0  ;;  %v3179_v12 = vsel %vm3168_vm4, %v3158_v61, 0  ;;  %v3365_v22 = vsel %vm3168_vm4, %v3346_v38, 0  ;;  %v6315_v32 = vld [vmem:[#allocation5 + $0x64] sm:$0xf0] }
 0x3d4   : > { %3188 = vmatpush.bf16.msra.mxu0 %v3170_v0  ;;  %3230 = vmatpush.bf16.msra.mxu3 %v3179_v12  ;;  %v5788_v38 = vld [vmem:[#allocation5 + $0xe0] sm:$0xf]  ;;  %v6331_v0 = vld [vmem:[#allocation5 + $0xe4] sm:$0xf0]  ;;  %v5725_v12 = vor.u32 %v6315_v32, %v5724_v60  ;;  %v5684_v60 = vld [vmem:[#allocation5 + $0x10] sm:$0xf] }
 0x3d5   : > { %v3318_v42 = vpop.permute.xlu0 %3317  ;;  %v6305_v32 = vld [vmem:[#allocation5 + $0x14] sm:$0xf0] }
 0x3d6   : > { %v3321_v16 = vsel %vm921_vm3, %v3318_v42, %v3320_v3  ;;  %v3322_v17 = vsel %vm921_vm3, %v3316_v9, %v3318_v42  ;;  %v7346_v9 = vpop.permute.xlu1 %3440  ;;  %v6313_v42 = vld [vmem:[#allocation5 + $0x54] sm:$0xf0] }
 0x3d7   : > { %v3337_v18 = vmul.f32 %v3329_v53, %v3322_v17  ;;  %v3338_v20 = vmul.f32 %v3330_v44, %v3321_v16  ;;  %5651 = vmatmul.msk.bf16.vlgmr.msra.gmra.mxu0 %vm3164_vm5, %v6300_v10  ;;  %5654 = vmatmul.msk.bf16.vlgmr.msra.gmra.mxu3 %vm3164_vm5, %v6300_v10  ;;  %v5797_v53 = vor.u32 %v6333_v51, %v5796_v59  ;;  %v5780_v16 = vld [vmem:[#allocation5 + $0xd0] sm:$0xf]  ;;  %v6329_v17 = vld [vmem:[#allocation5 + $0xd4] sm:$0xf0]  ;;  %v6307_v59 = vld [vmem:[#allocation5 + $0x24] sm:$0xf0] }
 0x3d8   : > { %3306 = vmatpush.bf16.msrb.mxu3 %v3255_v4  ;;  %3264 = vmatpush.bf16.msrb.mxu0 %v3246_v15  ;;  %v5789_v4 = vor.u32 %v6331_v0, %v5788_v38  ;;  %v5716_v15 = vld [vmem:[#allocation5 + $0x50] sm:$0xf]  ;;  %v6323_v51 = vld [vmem:[#allocation5 + $0xa4] sm:$0xf0]  ;;  %v5685_v38 = vor.u32 %v6305_v32, %v5684_v60  ;;  %v6321_v0 = vld [vmem:[#allocation5 + $0x94] sm:$0xf0] }
 0x3d9   : > { %v3344_v21 = vpack.c.bf16 %v3337_v18, %v3337_v18  ;;  %v3345_v7 = vpack.c.bf16 %v3338_v20, %v3338_v20  ;;  %v6310_v32 = vld [vmem:[#allocation5 + $0x44] sm:$0xf] }
 0x3db   : > { %v3359_v14 = vsel %vm3168_vm4, %v3344_v21, 0  ;;  %v3362_v28 = vsel %vm3168_vm4, %v3345_v7, 0  ;;  %v5708_v21 = vld [vmem:[#allocation5 + $0x40] sm:$0xf]  ;;  %v6311_v7 = vld [vmem:[#allocation5 + $0x44] sm:$0xf0] }
 0x3dc   : > { %3374 = vmatpush.bf16.msra.mxu0 %v3356_v5  ;;  %3416 = vmatpush.bf16.msra.mxu3 %v3365_v22  ;;  %v3204_v31 = vpop.f32.mrf.mxu1  ;;  %v5717_v5 = vor.u32 %v6313_v42, %v5716_v15  ;;  %v5781_v22 = vor.u32 %v6329_v17, %v5780_v16  ;;  %v5740_v42 = vld [vmem:[#allocation5 + $0x80] sm:$0xf]  ;;  %v6319_v16 = vld [vmem:[#allocation5 + $0x84] sm:$0xf0]  ;;  %v6316_v17 = vld [vmem:[#allocation5 + $0x74] sm:$0xf] }
 0x3dd   : > { %3388 = vmatpush.bf16.msra.mxu1 %v3359_v14  ;;  %3402 = vmatpush.bf16.msra.mxu2 %v3362_v28  ;;  %v7339_v13 = vpop.permute.xlu0 %3435  ;;  %v5772_v28 = vld [vmem:[#allocation5 + $0xc0] sm:$0xf] }
 0x3e0   : > { %5671 = vmatmul.msk.bf16.vlgmr.msra.gmra.mxu1 %vm3164_vm5, %v6301_v40  ;;  %5672 = vmatmul.msk.bf16.vlgmr.msra.gmra.mxu2 %vm3164_vm5, %v6301_v40 }
 0x3e1   : > { %3893 = vmatpush.bf16.msrb.mxu1 %v5797_v53  ;;  %v5748_v53 = vld [vmem:[#allocation5 + $0x90] sm:$0xf] }
 0x3e2   : > { %v5749_v15 = vor.u32 %v6321_v0, %v5748_v53  ;;  %v5710_v53 = vld [vmem:[#allocation5 + $0x48] sm:$0xf0] }
 0x3e3   : > { %v5713_v0 = vor.u32 %v6310_v32, %v5710_v53  ;;  %v6302_v32 = vld [vmem:[#allocation5 + $0x4] sm:$0xf]  ;;  %v5678_v53 = vld [vmem:[#allocation5 + $0x8] sm:$0xf0] }
 0x3e4   : > { %v3206_v25 = vpop.f32.mrf.mxu1 }
 0x3e5   : > { %3894 = vmatpush.bf16.msrb.mxu1 %v5789_v4  ;;  %v6303_v4 = vld [vmem:[#allocation5 + $0x4] sm:$0xf0] }
 0x3e7   : > { %5659 = vmatmul.msk.bf16.vlgmr.msrb.gmra.mxu0 %vm3164_vm5, %v6299_v39  ;;  %5662 = vmatmul.msk.bf16.vlgmr.msrb.gmra.mxu3 %vm3164_vm5, %v6299_v39 }
 0x3e8   : > { %3879 = vmatpush.bf16.msrb.mxu0 %v5733_v50  ;;  %v5693_v50 = vor.u32 %v6307_v59, %v5692_v58  ;;  %v5844_v58 = vld [vmem:[#allocation5 + $0x150] sm:$0xf]  ;;  %v6345_v59 = vld [vmem:[#allocation5 + $0x154] sm:$0xf0] }
 0x3e9   : > { %3895 = vmatpush.bf16.msrb.mxu1 %v5781_v22  ;;  %v5860_v22 = vld [vmem:[#allocation5 + $0x170] sm:$0xf] }
 0x3ec   : > { %v3280_v27 = vpop.f32.mrf.mxu1  ;;  %3880 = vmatpush.bf16.msrb.mxu0 %v5725_v12  ;;  %v5676_v12 = vld [vmem:[#allocation5] sm:$0xf] }
 0x3ed   : > { %v3281_v29 = vadd.f32 %v3280_v27, %v3204_v31  ;;  %v6309_v27 = vld [vmem:[#allocation5 + $0x34] sm:$0xf0] }
 0x3f0   : > { %3881 = vmatpush.bf16.msrb.mxu0 %v5717_v5  ;;  %v5798_v5 = vld [vmem:[#allocation5 + $0xf8] sm:$0xf0] }
 0x3f4   : > { %v3282_v47 = vpop.f32.mrf.mxu1 }
 0x3f5   : > { %v3283_v23 = vadd.f32 %v3282_v47, %v3206_v25  ;;  %v6325_v47 = vld [vmem:[#allocation5 + $0xb4] sm:$0xf0] }
 0x3f7   : > { %5670 = vmatmul.msk.bf16.vlgmr.msra.gmra.mxu0 %vm3164_vm5, %v6301_v40  ;;  %5673 = vmatmul.msk.bf16.vlgmr.msra.gmra.mxu3 %vm3164_vm5, %v6301_v40  ;;  %v6327_v40 = vld [vmem:[#allocation5 + $0xc4] sm:$0xf0] }
 0x3f8   : > { %v5773_v25 = vor.u32 %v6327_v40, %v5772_v28  ;;  %v6365_v40 = vld [vmem:[#allocation5 + $0x1f4] sm:$0xf0] }
 0x3fa   : > { %3896 = vmatpush.bf16.msrb.mxu1 %v5773_v25 }
 0x402   : > { %v3218_v24 = vpop.f32.mrf.mxu2 }
 0x40a   : > { %v3220_v56 = vpop.f32.mrf.mxu2 }
 0x412   : > { %v3294_v55 = vpop.f32.mrf.mxu2 }
 0x413   : > { %v3295_v36 = vadd.f32 %v3294_v55, %v3218_v24  ;;  %v5709_v24 = vor.u32 %v6311_v7, %v5708_v21  ;;  %v5764_v55 = vld [vmem:[#allocation5 + $0xb0] sm:$0xf]  ;;  %v6349_v21 = vld [vmem:[#allocation5 + $0x174] sm:$0xf0] }
 0x414   : > { %v5924_v7 = vld [vmem:[#allocation5 + $0x1f0] sm:$0xf]  ;;  %v5861_v28 = vor.u32 %v6349_v21, %v5860_v22  ;;  %v5702_v22 = vld [vmem:[#allocation5 + $0x38] sm:$0xf0]  ;;  %v6324_v21 = vld [vmem:[#allocation5 + $0xb4] sm:$0xf] }
 0x415   : > { %3882 = vmatpush.bf16.msrb.mxu0 %v5709_v24  ;;  %v5925_v25 = vor.u32 %v6365_v40, %v5924_v7  ;;  %v6341_v40 = vld [vmem:[#allocation5 + $0x134] sm:$0xf0] }
 0x416   : > { %3907 = vmatpush.bf16.msrb.mxu2 %v5861_v28  ;;  %v5828_v28 = vld [vmem:[#allocation5 + $0x130] sm:$0xf] }
 0x417   : > { %3921 = vmatpush.bf16.msrb.mxu3 %v5925_v25  ;;  %v5892_v25 = vld [vmem:[#allocation5 + $0x1b0] sm:$0xf] }
 0x41a   : > { %v3296_v2 = vpop.f32.mrf.mxu2 }
 0x41b   : > { %v3297_v43 = vadd.f32 %v3296_v2, %v3220_v56  ;;  %v5700_v56 = vld [vmem:[#allocation5 + $0x30] sm:$0xf] }
 0x454   : > { %v3190_v46 = vpop.f32.mrf.mxu0 }
 0x45a   : > { %v7335_v62 = vpop.f32.mrf.mxu3 }
 0x45c   : > { %v7337_v19 = vpop.f32.mrf.mxu0 }
 0x45d   : > { %v3390_v10 = vpop.f32.mrf.mxu1 }
 0x45e   : > { %v3424_v57 = vadd.f32 %v3390_v10, %v3281_v29  ;;  %v5701_v29 = vor.u32 %v6309_v27, %v5700_v56  ;;  %v6314_v56 = vld [vmem:[#allocation5 + $0x64] sm:$0xf]  ;;  %v5726_v27 = vld [vmem:[#allocation5 + $0x68] sm:$0xf0] }
 0x460   : > { %v7344_v11 = vadd.f32 %v7339_v13, %v3424_v57  ;;  %v5765_v57 = vor.u32 %v6325_v47, %v5764_v55  ;;  %3883 = vmatpush.bf16.msrb.mxu0 %v5701_v29  ;;  %v5852_v55 = vld [vmem:[#allocation5 + $0x160] sm:$0xf]  ;;  %v6363_v29 = vld [vmem:[#allocation5 + $0x1e4] sm:$0xf0] }
 0x462   : > { %v7341_v6 = vpop.f32.mrf.mxu3  ;;  %v3452_v49 = vmax.f32 %v7344_v11, 0.0  ;;  %3897 = vmatpush.bf16.msrb.mxu1 %v5765_v57  ;;  %v5790_v57 = vld [vmem:[#allocation5 + $0xe8] sm:$0xf0]  ;;  %v6354_v11 = vld [vmem:[#allocation5 + $0x1a4] sm:$0xf] }
 0x463   : > { %v3404_v26 = vpop.f32.mrf.mxu2 }
 0x464   : > { %v3266_v35 = vpop.f32.mrf.mxu0  ;;  %v3425_v41 = vadd.f32 %v3404_v26, %v3295_v36  ;;  %3884 = vmatpush.bf16.msrb.mxu0 %v5693_v50  ;;  %v5845_v50 = vor.u32 %v6345_v59, %v5844_v58  ;;  %v5812_v58 = vld [vmem:[#allocation5 + $0x110] sm:$0xf] }
 0x465   : > { %v3392_v39 = vpop.f32.mrf.mxu1  ;;  %v3267_v31 = vadd.f32 %v3266_v35, %v3190_v46 }
 0x466   : > { %v3428_v8 = vadd.f32 %v3392_v39, %v3283_v23  ;;  %v7352_v45 = vadd.f32 %v7339_v13, %v3425_v41 }
 0x468   : > { %v7349_v33 = vadd.f32 %v7346_v9, %v3428_v8  ;;  %v3453_v61 = vmax.f32 %v7352_v45, 0.0  ;;  %3885 = vmatpush.bf16.msrb.mxu0 %v5685_v38  ;;  %v6326_v38 = vld [vmem:[#allocation5 + $0xc4] sm:$0xf] }
 0x46a   : > { %v3456_v48 = vmax.f32 %v7349_v33, 0.0  ;;  %v3308_v52 = vpop.f32.mrf.mxu3 }
 0x46b   : > { %v3406_v3 = vpop.f32.mrf.mxu2  ;;  %v3309_v23 = vadd.f32 %v3308_v52, %v7335_v62 }
 0x46c   : > { %v3429_v54 = vadd.f32 %v3406_v3, %v3297_v43  ;;  %v6502_v1 = vpack.i.bf16 %v3456_v48, %v3452_v49  ;;  %v3268_v37 = vpop.f32.mrf.mxu0 }
 0x46d   : > { %v3269_v36 = vadd.f32 %v3268_v37, %v7337_v19  ;;  %v5756_v37 = vld [vmem:[#allocation5 + $0xa0] sm:$0xf] }
 0x46e   : > { %v7362_v63 = vadd.f32 %v7346_v9, %v3429_v54  ;;  %6503 = vrot.lane.b32.xlu0 %v6502_v1, %s6700_s14 }
 0x470   : > { %v3457_v44 = vmax.f32 %v7362_v63, 0.0 }
 0x472   : > { %v6487_v18 = vpack.i.bf16 %v3457_v44, %v3453_v61  ;;  %v3310_v20 = vpop.f32.mrf.mxu3 }
 0x473   : > { %v3311_v8 = vadd.f32 %v3310_v20, %v7341_v6  ;;  %v6332_v20 = vld [vmem:[#allocation5 + $0xf4] sm:$0xf] }
 0x474   : > { %6488 = vrot.lane.b32.xlu2 %v6487_v18, %s6700_s14  ;;  %v3376_v14 = vpop.f32.mrf.mxu0  ;;  %v5734_v18 = vld [vmem:[#allocation5 + $0x78] sm:$0xf0]  ;;  %v5801_v47 = vor.u32 %v6332_v20, %v5798_v5  ;;  %v6308_v5 = vld [vmem:[#allocation5 + $0x34] sm:$0xf] }
 0x475   : > { %v3423_v2 = vadd.f32 %v3376_v14, %v3267_v31  ;;  %v5677_v14 = vor.u32 %v6303_v4, %v5676_v12  ;;  %v5741_v31 = vor.u32 %v6319_v16, %v5740_v42  ;;  %v5737_v24 = vor.u32 %v6316_v17, %v5734_v18  ;;  %v5774_v12 = vld [vmem:[#allocation5 + $0xc8] sm:$0xf0]  ;;  %v5836_v4 = vld [vmem:[#allocation5 + $0x140] sm:$0xf]  ;;  %v6359_v18 = vld [vmem:[#allocation5 + $0x1c4] sm:$0xf0] }
 0x476   : > { %v5777_v42 = vor.u32 %v6326_v38, %v5774_v12  ;;  %v5900_v17 = vld [vmem:[#allocation5 + $0x1c0] sm:$0xf]  ;;  %v5705_v7 = vor.u32 %v6308_v5, %v5702_v22  ;;  %v6318_v38 = vld [vmem:[#allocation5 + $0x84] sm:$0xf]  ;;  %v5742_v12 = vld [vmem:[#allocation5 + $0x88] sm:$0xf0] }
 0x477   : > { %v7374_v46 = vadd.f32 %v7339_v13, %v3423_v2  ;;  %v6347_v2 = vld [vmem:[#allocation5 + $0x164] sm:$0xf0]  ;;  %3886 = vmatpush.bf16.msrb.mxu0 %v5677_v14  ;;  %v5901_v20 = vor.u32 %v6359_v18, %v5900_v17  ;;  %v5766_v14 = vld [vmem:[#allocation5 + $0xb8] sm:$0xf0]  ;;  %v6348_v17 = vld [vmem:[#allocation5 + $0x174] sm:$0xf]  ;;  %v5681_v18 = vor.u32 %v6302_v32, %v5678_v53 }
 0x478   : > { %v6364_v5 = vld [vmem:[#allocation5 + $0x1f4] sm:$0xf]  ;;  %v5926_v22 = vld [vmem:[#allocation5 + $0x1f8] sm:$0xf0] }
 0x479   : > { %v3451_v43 = vmax.f32 %v7374_v46, 0.0 }
 0x47a   : > { %v3418_v10 = vpop.f32.mrf.mxu3 }
 0x47b   : > { %v3426_v39 = vadd.f32 %v3418_v10, %v3309_v23  ;;  %v5916_v10 = vld [vmem:[#allocation5 + $0x1e0] sm:$0xf]  ;;  %3935 = vmatpush.bf16.msra.mxu0 %v5737_v24  ;;  %v5829_v24 = vor.u32 %v6341_v40, %v5828_v28  ;;  %v5929_v40 = vor.u32 %v6364_v5, %v5926_v22 }
 0x47c   : > { %v3378_v26 = vpop.f32.mrf.mxu0  ;;  %v5917_v23 = vor.u32 %v6363_v29, %v5916_v10  ;;  %v5758_v10 = vld [vmem:[#allocation5 + $0xa8] sm:$0xf0] }
 0x47d   : > { %v3427_v35 = vadd.f32 %v3378_v26, %v3269_v36  ;;  %v7383_v54 = vadd.f32 %v7339_v13, %v3426_v39  ;;  %v6330_v36 = vld [vmem:[#allocation5 + $0xe4] sm:$0xf]  ;;  %v5853_v26 = vor.u32 %v6347_v2, %v5852_v55 }
 0x47e   : > { %v5793_v39 = vor.u32 %v6330_v36, %v5790_v57  ;;  %3922 = vmatpush.bf16.msrb.mxu3 %v5917_v23  ;;  %v6322_v2 = vld [vmem:[#allocation5 + $0xa4] sm:$0xf]  ;;  %v5820_v57 = vld [vmem:[#allocation5 + $0x120] sm:$0xf] }
 0x47f   : > { %v7377_v41 = vadd.f32 %v7346_v9, %v3427_v35  ;;  %v3454_v6 = vmax.f32 %v7383_v54, 0.0  ;;  %v5729_v35 = vor.u32 %v6314_v56, %v5726_v27  ;;  %3908 = vmatpush.bf16.msrb.mxu2 %v5853_v26  ;;  %v6357_v56 = vld [vmem:[#allocation5 + $0x1b4] sm:$0xf0]  ;;  %v6306_v27 = vld [vmem:[#allocation5 + $0x24] sm:$0xf]  ;;  %v5761_v36 = vor.u32 %v6322_v2, %v5758_v10 }
 0x480   : > { %v5893_v55 = vor.u32 %v6357_v56, %v5892_v25  ;;  %v6339_v26 = vld [vmem:[#allocation5 + $0x124] sm:$0xf0]  ;;  %v5884_v23 = vld [vmem:[#allocation5 + $0x1a0] sm:$0xf]  ;;  %v5854_v25 = vld [vmem:[#allocation5 + $0x168] sm:$0xf0] }
 0x481   : > { %v3455_v19 = vmax.f32 %v7377_v41, 0.0  ;;  %3936 = vmatpush.bf16.msra.mxu0 %v5729_v35  ;;  %v5821_v35 = vor.u32 %v6339_v26, %v5820_v57  ;;  %v6362_v56 = vld [vmem:[#allocation5 + $0x1e4] sm:$0xf]  ;;  %v6344_v2 = vld [vmem:[#allocation5 + $0x154] sm:$0xf] }
 0x482   : > { %v3420_v3 = vpop.f32.mrf.mxu3  ;;  %v5846_v10 = vld [vmem:[#allocation5 + $0x158] sm:$0xf0] }
 0x483   : > { %v3430_v62 = vadd.f32 %v3420_v3, %v3311_v8  ;;  %v6497_v52 = vpack.i.bf16 %v3455_v19, %v3451_v43  ;;  %v6312_v8 = vld [vmem:[#allocation5 + $0x54] sm:$0xf]  ;;  %v5718_v3 = vld [vmem:[#allocation5 + $0x58] sm:$0xf0]  ;;  %3909 = vmatpush.bf16.msrb.mxu2 %v5845_v50  ;;  %v5876_v50 = vld [vmem:[#allocation5 + $0x190] sm:$0xf] }
 0x484   : > { %v5910_v57 = vld [vmem:[#allocation5 + $0x1d8] sm:$0xf0] }
 0x485   : > { %v7390_v1 = vadd.f32 %v7346_v9, %v3430_v62  ;;  %6498 = vrot.lane.b32.xlu2 %v6497_v52, %s6700_s14  ;;  %v5757_v9 = vor.u32 %v6323_v51, %v5756_v37  ;;  %v6328_v62 = vld [vmem:[#allocation5 + $0xd4] sm:$0xf]  ;;  %v5721_v52 = vor.u32 %v6312_v8, %v5718_v3  ;;  %v5908_v51 = vld [vmem:[#allocation5 + $0x1d0] sm:$0xf]  ;;  %v5686_v3 = vld [vmem:[#allocation5 + $0x18] sm:$0xf0] }
 0x486   : > { %v6304_v8 = vld [vmem:[#allocation5 + $0x14] sm:$0xf] }
 0x487   : > { %v3458_v34 = vmax.f32 %v7390_v1, 0.0  ;;  %3898 = vmatpush.bf16.msrb.mxu1 %v5757_v9  ;;  %v6361_v9 = vld [vmem:[#allocation5 + $0x1d4] sm:$0xf0]  ;;  %3937 = vmatpush.bf16.msra.mxu0 %v5721_v52  ;;  %v6320_v52 = vld [vmem:[#allocation5 + $0x94] sm:$0xf]  ;;  %v5689_v59 = vor.u32 %v6304_v8, %v5686_v3 }
 0x488   : > { %v5909_v60 = vor.u32 %v6361_v9, %v5908_v51  ;;  %v6353_v51 = vld [vmem:[#allocation5 + $0x194] sm:$0xf0]  ;;  %v6342_v3 = vld [vmem:[#allocation5 + $0x144] sm:$0xf] }
 0x489   : > { %v6492_v13 = vpack.i.bf16 %v3458_v34, %v3454_v6 }
 0x48a   : > { %3923 = vmatpush.bf16.msrb.mxu3 %v5909_v60 }
 0x48b   : > { %6493 = vrot.lane.b32.xlu1 %v6492_v13, %s6700_s14  ;;  %3899 = vmatpush.bf16.msrb.mxu1 %v5749_v15  ;;  %v5782_v13 = vld [vmem:[#allocation5 + $0xd8] sm:$0xf0]  ;;  %v6343_v15 = vld [vmem:[#allocation5 + $0x144] sm:$0xf0] }
 0x48c   : > { %v5785_v37 = vor.u32 %v6328_v62, %v5782_v13  ;;  %v5837_v16 = vor.u32 %v6343_v15, %v5836_v4  ;;  %3938 = vmatpush.bf16.msra.mxu0 %v5713_v0  ;;  %v5750_v13 = vld [vmem:[#allocation5 + $0x98] sm:$0xf0]  ;;  %v5877_v0 = vor.u32 %v6353_v51, %v5876_v50  ;;  %v5804_v4 = vld [vmem:[#allocation5 + $0x100] sm:$0xf]  ;;  %v6335_v15 = vld [vmem:[#allocation5 + $0x104] sm:$0xf0] }
 0x48d   : > { %v5753_v9 = vor.u32 %v6320_v52, %v5750_v13  ;;  %v6358_v52 = vld [vmem:[#allocation5 + $0x1c4] sm:$0xf]  ;;  %v5902_v50 = vld [vmem:[#allocation5 + $0x1c8] sm:$0xf0] }
 0x48e   : > { %3910 = vmatpush.bf16.msrb.mxu2 %v5837_v16  ;;  %3924 = vmatpush.bf16.msrb.mxu3 %v5901_v20  ;;  %v6351_v16 = vld [vmem:[#allocation5 + $0x184] sm:$0xf0]  ;;  %v5862_v20 = vld [vmem:[#allocation5 + $0x178] sm:$0xf0] }
 0x48f   : > { %3900 = vmatpush.bf16.msrb.mxu1 %v5741_v31  ;;  %v5769_v31 = vor.u32 %v6324_v21, %v5766_v14  ;;  %v5745_v21 = vor.u32 %v6318_v38, %v5742_v12  ;;  %v5865_v28 = vor.u32 %v6348_v17, %v5862_v20  ;;  %v6356_v17 = vld [vmem:[#allocation5 + $0x1b4] sm:$0xf]  ;;  %v5894_v20 = vld [vmem:[#allocation5 + $0x1b8] sm:$0xf0] }
 0x490   : > { %3939 = vmatpush.bf16.msra.mxu0 %v5705_v7  ;;  %v5805_v7 = vor.u32 %v6335_v15, %v5804_v4  ;;  %v5897_v33 = vor.u32 %v6356_v17, %v5894_v20 }
 0x492   : > { %3911 = vmatpush.bf16.msrb.mxu2 %v5829_v24  ;;  %3925 = vmatpush.bf16.msrb.mxu3 %v5893_v55  ;;  %v6346_v24 = vld [vmem:[#allocation5 + $0x164] sm:$0xf]  ;;  %v5918_v55 = vld [vmem:[#allocation5 + $0x1e8] sm:$0xf0] }
 0x493   : > { %3949 = vmatpush.bf16.msra.mxu1 %v5801_v47  ;;  %v5694_v47 = vld [vmem:[#allocation5 + $0x28] sm:$0xf0] }
 0x494   : > { %v5697_v29 = vor.u32 %v6306_v27, %v5694_v47  ;;  %v5857_v27 = vor.u32 %v6346_v24, %v5854_v25  ;;  %v5921_v47 = vor.u32 %v6362_v56, %v5918_v55  ;;  %v6334_v24 = vld [vmem:[#allocation5 + $0x104] sm:$0xf]  ;;  %v5806_v25 = vld [vmem:[#allocation5 + $0x108] sm:$0xf0] }
 0x495   : > { %v6350_v56 = vld [vmem:[#allocation5 + $0x184] sm:$0xf]  ;;  %v5809_v55 = vor.u32 %v6334_v24, %v5806_v25 }
 0x496   : > { %3940 = vmatpush.bf16.msra.mxu0 %v5697_v29  ;;  %3912 = vmatpush.bf16.msrb.mxu2 %v5821_v35  ;;  %v6360_v29 = vld [vmem:[#allocation5 + $0x1d4] sm:$0xf] }
 0x497   : > { %3950 = vmatpush.bf16.msra.mxu1 %v5793_v39  ;;  %v6355_v39 = vld [vmem:[#allocation5 + $0x1a4] sm:$0xf0]  ;;  %v5913_v26 = vor.u32 %v6360_v29, %v5910_v57 }
 0x498   : > { %v5885_v62 = vor.u32 %v6355_v39, %v5884_v23 }
 0x49a   : > { %3926 = vmatpush.bf16.msrb.mxu3 %v5885_v62  ;;  %3941 = vmatpush.bf16.msra.mxu0 %v5689_v59  ;;  %v5838_v62 = vld [vmem:[#allocation5 + $0x148] sm:$0xf0] }
 0x49b   : > { %3951 = vmatpush.bf16.msra.mxu1 %v5785_v37  ;;  %v6337_v37 = vld [vmem:[#allocation5 + $0x114] sm:$0xf0]  ;;  %v5841_v51 = vor.u32 %v6342_v3, %v5838_v62 }
 0x49c   : > { %v5813_v60 = vor.u32 %v6337_v37, %v5812_v58 }
 0x49e   : > { %3913 = vmatpush.bf16.msrb.mxu2 %v5813_v60  ;;  %3927 = vmatpush.bf16.msrb.mxu3 %v5877_v0 }
 0x49f   : > { %3952 = vmatpush.bf16.msra.mxu1 %v5777_v42  ;;  %v5868_v42 = vld [vmem:[#allocation5 + $0x180] sm:$0xf]  ;;  %3942 = vmatpush.bf16.msra.mxu0 %v5681_v18 }
 0x4a0   : > { %v5869_v14 = vor.u32 %v6351_v16, %v5868_v42  ;;  %v6340_v42 = vld [vmem:[#allocation5 + $0x134] sm:$0xf]  ;;  %v5830_v16 = vld [vmem:[#allocation5 + $0x138] sm:$0xf0] }
 0x4a1   : > { %v5833_v18 = vor.u32 %v6340_v42, %v5830_v16 }
 0x4a2   : > { %3914 = vmatpush.bf16.msrb.mxu2 %v5805_v7  ;;  %3928 = vmatpush.bf16.msrb.mxu3 %v5869_v14  ;;  %v6352_v7 = vld [vmem:[#allocation5 + $0x194] sm:$0xf]  ;;  %v5878_v14 = vld [vmem:[#allocation5 + $0x198] sm:$0xf0] }
 0x4a3   : > { %3953 = vmatpush.bf16.msra.mxu1 %v5769_v31 }
 0x4a6   : > { %3963 = vmatpush.bf16.msra.mxu2 %v5865_v28  ;;  %3977 = vmatpush.bf16.msra.mxu3 %v5929_v40  ;;  %v5881_v40 = vor.u32 %v6352_v7, %v5878_v14 }
 0x4a7   : > { %3954 = vmatpush.bf16.msra.mxu1 %v5761_v36  ;;  %v5849_v36 = vor.u32 %v6344_v2, %v5846_v10 }
 0x4aa   : > { %3964 = vmatpush.bf16.msra.mxu2 %v5857_v27  ;;  %3978 = vmatpush.bf16.msra.mxu3 %v5921_v47  ;;  %v5870_v27 = vld [vmem:[#allocation5 + $0x188] sm:$0xf0] }
 0x4ab   : > { %3955 = vmatpush.bf16.msra.mxu1 %v5753_v9  ;;  %v5905_v9 = vor.u32 %v6358_v52, %v5902_v50  ;;  %v5873_v47 = vor.u32 %v6350_v56, %v5870_v27 }
 0x4ae   : > { %3965 = vmatpush.bf16.msra.mxu2 %v5849_v36  ;;  %3979 = vmatpush.bf16.msra.mxu3 %v5913_v26 }
 0x4af   : > { %3956 = vmatpush.bf16.msra.mxu1 %v5745_v21  ;;  %v5822_v21 = vld [vmem:[#allocation5 + $0x128] sm:$0xf0] }
 0x4b2   : > { %3966 = vmatpush.bf16.msra.mxu2 %v5841_v51  ;;  %3980 = vmatpush.bf16.msra.mxu3 %v5905_v9 }
 0x4b6   : > { %3967 = vmatpush.bf16.msra.mxu2 %v5833_v18  ;;  %3981 = vmatpush.bf16.msra.mxu3 %v5897_v33  ;;  %v4228_v33 = vld [vmem:[%s7638_s10 + $0x8] sm:$0xff] }
 0x4ce   : > { %v7400_v31 = vpop.permute.xlu2 %6488 }
 0x4cf   : > { %v6491_v23 = vunpack.i.h.bf16 %v7400_v31  ;;  %v6490_v35 = vunpack.i.l.bf16 %v7400_v31 }
 0x4df   : > { %v7404_v8 = vpop.permute.xlu2 %6498 }
 0x4e0   : > { %v6504_v39 = vpop.permute.xlu0 %6503  ;;  %v6501_v59 = vunpack.i.h.bf16 %v7404_v8  ;;  %v6500_v37 = vunpack.i.l.bf16 %v7404_v8 }
 0x4e1   : > { %v6506_v13 = vunpack.i.h.bf16 %v6504_v39  ;;  %v6505_v58 = vunpack.i.l.bf16 %v6504_v39 }
 0x4e3   : > { %v3478_v60 = vsel %vm921_vm3, %v6506_v13, %v6491_v23  ;;  %v3477_v32 = vsel %vm921_vm3, %v6505_v58, %v6490_v35  ;;  %v3480_v53 = vsel %vm921_vm3, %v6501_v59, %v6506_v13  ;;  %v3479_v38 = vsel %vm921_vm3, %v6500_v37, %v6505_v58 }
 0x4e4   : > { %v3488_v0 = vmax.f32 %v3456_v48, %v3478_v60  ;;  %v3484_v12 = vmax.f32 %v3452_v49, %v3477_v32  ;;  %v3487_v4 = vmax.f32 %v3455_v19, %v3480_v53  ;;  %v3483_v15 = vmax.f32 %v3451_v43, %v3479_v38  ;;  %v6338_v48 = vld [vmem:[#allocation5 + $0x124] sm:$0xf]  ;;  %v5886_v49 = vld [vmem:[#allocation5 + $0x1a8] sm:$0xf0]  ;;  %v6336_v43 = vld [vmem:[#allocation5 + $0x114] sm:$0xf] }
 0x4e5   : > { %v5825_v46 = vor.u32 %v6338_v48, %v5822_v21  ;;  %v5889_v41 = vor.u32 %v6354_v11, %v5886_v49  ;;  %v5814_v19 = vld [vmem:[#allocation5 + $0x118] sm:$0xf0]  ;;  %v4230_v48 = vld [vmem:[%s7638_s10 + $0x18] sm:$0xff]  ;;  %v6366_v21 = vld [vmem:[%s7637_s9 + $0x10] sm:$0xff] }
 0x4e6   : > { %v3492_v5 = vpack.c.bf16 %v3488_v0, %v3484_v12  ;;  %v3491_v22 = vpack.c.bf16 %v3487_v4, %v3483_v15  ;;  %v5817_v28 = vor.u32 %v6336_v43, %v5814_v19  ;;  %v6367_v11 = vld [vmem:[%s7637_s9 + $0x18] sm:$0xff]  ;;  %v4010_v43 = vld [vmem:[%s7639_s11] ss:$2 sm:$0x3] }
 0x4e7   : > { %3968 = vmatpush.bf16.msra.mxu2 %v5825_v46  ;;  %3982 = vmatpush.bf16.msra.mxu3 %v5889_v41  ;;  %v4012_v7 = vperm.slane %v4010_v43, 0  ;;  %v4013_v14 = vperm.slane %v4010_v43, 1 }
 0x4e8   : > { %3887 = vmatmul.bf16.vlgmr.msrb.gmra.mxu0 %v3491_v22  ;;  %3901 = vmatmul.bf16.vlgmr.msrb.gmra.mxu1 %v3492_v5 }
 0x4eb   : > { %3969 = vmatpush.bf16.msra.mxu2 %v5817_v28  ;;  %3983 = vmatpush.bf16.msra.mxu3 %v5881_v40 }
 0x4ef   : > { %3970 = vmatpush.bf16.msra.mxu2 %v5809_v55  ;;  %3984 = vmatpush.bf16.msra.mxu3 %v5873_v47 }
 0x4f8   : > { %3943 = vmatmul.bf16.vlgmr.msra.gmra.mxu0 %v3491_v22  ;;  %3957 = vmatmul.bf16.vlgmr.msra.gmra.mxu1 %v3492_v5  ;;  %v4227_v22 = vld [vmem:[%s7638_s10] sm:$0xff] }
 0x4fd   : > { %v6494_v2 = vpop.permute.xlu1 %6493 }
 0x4fe   : > { %v6496_v10 = vunpack.i.h.bf16 %v6494_v2  ;;  %v6495_v29 = vunpack.i.l.bf16 %v6494_v2 }
 0x500   : > { %v3475_v36 = vsel %vm921_vm3, %v6490_v35, %v6495_v29  ;;  %v3476_v57 = vsel %vm921_vm3, %v6491_v23, %v6496_v10  ;;  %v3481_v26 = vsel %vm921_vm3, %v6495_v29, %v6500_v37  ;;  %v3482_v39 = vsel %vm921_vm3, %v6496_v10, %v6501_v59  ;;  %v5958_v10 = vld [vmem:[%s7639_s11 + $0x1] ss:$2 sm:$0x3] }
 0x501   : > { %v3485_v8 = vmax.f32 %v3453_v61, %v3475_v36  ;;  %v3486_v3 = vmax.f32 %v3454_v6, %v3481_v26  ;;  %v3489_v35 = vmax.f32 %v3457_v44, %v3476_v57  ;;  %v3490_v31 = vmax.f32 %v3458_v34, %v3482_v39  ;;  %v6368_v26 = vld [vmem:[%s7637_s9] sm:$0xff] }
 0x503   : > { %v3493_v62 = vpack.c.bf16 %v3489_v35, %v3485_v8  ;;  %v3494_v23 = vpack.c.bf16 %v3490_v31, %v3486_v3  ;;  %v4150_v8 = vperm.slane %v5958_v10, 0  ;;  %v4151_v3 = vperm.slane %v5958_v10, 1 }
 0x505   : > { %3915 = vmatmul.bf16.vlgmr.msrb.gmra.mxu2 %v3493_v62  ;;  %3929 = vmatmul.bf16.vlgmr.msrb.gmra.mxu3 %v3494_v23 }
 0x515   : > { %3971 = vmatmul.bf16.vlgmr.msra.gmra.mxu2 %v3493_v62  ;;  %3985 = vmatmul.bf16.vlgmr.msra.gmra.mxu3 %v3494_v23 }
 0x565   : > { %v3888_v52 = vpop.f32.mrf.mxu0  ;;  %v3902_v13 = vpop.f32.mrf.mxu1 }
 0x566   : > { %v3903_v58 = vadd.f32 %v3902_v13, %v3888_v52 }
 0x56d   : > { %v3890_v45 = vpop.f32.mrf.mxu0  ;;  %v3904_v61 = vpop.f32.mrf.mxu1 }
 0x56e   : > { %v3905_v63 = vadd.f32 %v3904_v61, %v3890_v45 }
 0x575   : > { %v3944_v50 = vpop.f32.mrf.mxu0  ;;  %v3958_v51 = vpop.f32.mrf.mxu1 }
 0x576   : > { %v3959_v32 = vadd.f32 %v3958_v51, %v3944_v50 }
 0x57d   : > { %v3946_v4 = vpop.f32.mrf.mxu0  ;;  %v3960_v15 = vpop.f32.mrf.mxu1 }
 0x57e   : > { %v3961_v42 = vadd.f32 %v3960_v15, %v3946_v4 }
 0x588   : > { %v3916_v59 = vpop.f32.mrf.mxu2  ;;  %v3930_v54 = vpop.f32.mrf.mxu3 }
 0x589   : > { %v3917_v6 = vadd.f32 %v3916_v59, %v3903_v58 }
 0x58b   : > { %v3931_v37 = vadd.f32 %v3930_v54, %v3917_v6  ;;  %v6369_v6 = vld [vmem:[%s7637_s9 + $0x8] sm:$0xff] }
 0x58d   : > { %3998 = vrot.lane.b32.xlu1 %v3931_v37, %s6699_s29 }
 0x590   : > { %v3918_v44 = vpop.f32.mrf.mxu2  ;;  %v3932_v1 = vpop.f32.mrf.mxu3 }
 0x591   : > { %v3919_v34 = vadd.f32 %v3918_v44, %v3905_v63  ;;  %v6370_v63 = vld [vmem:[%s7637_s9 + $0x20] sm:$0xff]  ;;  %v6371_v44 = vld [vmem:[%s7637_s9 + $0x28] sm:$0xff] }
 0x593   : > { %v3933_v9 = vadd.f32 %v3932_v1, %v3919_v34 }
 0x595   : > { %v3996_v60 = vpack.c.bf16 %v3933_v9, %v3931_v37  ;;  %4000 = vrot.lane.b32.xlu2 %v3933_v9, %s6699_s29 }
 0x597   : > { %4104 = vmatpush.bf16.msrb.mxu2 %v3996_v60 }
 0x598   : > { %v3972_v53 = vpop.f32.mrf.mxu2  ;;  %v3986_v38 = vpop.f32.mrf.mxu3 }
 0x599   : > { %v3973_v0 = vadd.f32 %v3972_v53, %v3959_v32 }
 0x59a   : > { %5954 = vmatmul.msk.bf16.vlgmr.msrb.gmra.mxu2 %vm4036_vm6, %v6366_v21 }
 0x59b   : > { %v3987_v12 = vadd.f32 %v3986_v38, %v3973_v0 }
 0x59d   : > { %4002 = vrot.lane.b32.xlu0 %v3987_v12, %s6699_s29  ;;  %4135 = vrot.lane.b32.xlu2 %v3931_v37, %s6700_s14  ;;  %v4229_v37 = vld [vmem:[%s7638_s10 + $0x10] sm:$0xff] }
 0x5a0   : > { %v3974_v16 = vpop.f32.mrf.mxu2  ;;  %v3988_v18 = vpop.f32.mrf.mxu3 }
 0x5a1   : > { %v3975_v17 = vadd.f32 %v3974_v16, %v3961_v42 }
 0x5a3   : > { %v3989_v20 = vadd.f32 %v3988_v18, %v3975_v17 }
 0x5a5   : > { %v3997_v5 = vpack.c.bf16 %v3989_v20, %v3987_v12  ;;  %4004 = vrot.lane.b32.xlu1 %v3989_v20, %s6699_s29  ;;  %4137 = vrot.lane.b32.xlu0 %v3933_v9, %s6700_s14 }
 0x5a6   : > { %4141 = vrot.lane.b32.xlu2 %v3989_v20, %s6700_s14 }
 0x5a7   : > { %4123 = vmatpush.bf16.msrb.mxu3 %v3997_v5 }
 0x5aa   : > { %5956 = vmatmul.msk.bf16.vlgmr.msrb.gmra.mxu3 %vm4036_vm6, %v6366_v21  ;;  %5955 = vmatmul.msk.bf16.gmra.mxu2 %vm4036_vm6, %v6367_v11 }
 0x5ad   : > { %4139 = vrot.lane.b32.xlu1 %v3987_v12, %s6700_s14  ;;  %4233 = vperm.xlu0 %6486, %v4227_v22  }
 0x5ae   : > { %4243 = vperm.xlu2 %6507, %v4229_v37  }
 0x5b5   : > { %4238 = vperm.xlu1 %6470, %v4228_v33   ;;  %4248 = vperm.xlu0 %6486, %v4230_v48  }
 0x5ba   : > { %5957 = vmatmul.msk.bf16.gmra.mxu3 %vm4036_vm6, %v6367_v11 }
 0x5ef   : > { %v4001_v49 = vpop.permute.xlu2 %4000 }
 0x5f7   : > { %v4136_v19 = vpop.permute.xlu2 %4135 }
 0x5ff   : > { %v3999_v46 = vpop.permute.xlu1 %3998 }
 0x600   : > { %v4142_v39 = vpop.permute.xlu2 %4141 }
 0x60f   : > { %v4003_v41 = vpop.permute.xlu0 %4002 }
 0x610   : > { %v4006_v28 = vsel %vm574_vm0, %v3999_v46, %v4003_v41  ;;  %v4008_v40 = vsel %vm574_vm0, %v4003_v41, %v3999_v46 }
 0x611   : > { %v4016_v27 = vmul.f32 %v4012_v7, %v4008_v40  ;;  %v4017_v55 = vmul.f32 %v4013_v14, %v4006_v28 }
 0x617   : > { %v4005_v24 = vpop.permute.xlu1 %4004  ;;  %v4138_v57 = vpop.permute.xlu0 %4137 }
 0x618   : > { %v4007_v25 = vsel %vm574_vm0, %v4001_v49, %v4005_v24  ;;  %v4009_v56 = vsel %vm574_vm0, %v4005_v24, %v4001_v49  ;;  %v4144_v35 = vsel %vm921_vm3, %v4138_v57, %v4142_v39  ;;  %v4146_v31 = vsel %vm921_vm3, %v4142_v39, %v4138_v57 }
 0x619   : > { %v4018_v47 = vmul.f32 %v4012_v7, %v4009_v56  ;;  %v4019_v2 = vmul.f32 %v4013_v14, %v4007_v25  ;;  %v4156_v13 = vmul.f32 %v4150_v8, %v4144_v35  ;;  %v4157_v58 = vmul.f32 %v4151_v3, %v4146_v31 }
 0x61b   : > { %v4024_v29 = vpack.c.bf16 %v4018_v47, %v4016_v27  ;;  %v4025_v36 = vpack.c.bf16 %v4019_v2, %v4017_v55 }
 0x61d   : > { %4050 = vmatpush.bf16.msrb.mxu0 %v4024_v29  ;;  %4069 = vmatpush.bf16.msrb.mxu1 %v4025_v36  ;;  %v4106_v32 = vpop.f32.mrf.mxu2 }
 0x61f   : > { %v4140_v62 = vpop.permute.xlu1 %4139  ;;  %v4234_v5 = vpop.permute.xlu0 %4233 }
 0x620   : > { %v4143_v23 = vsel %vm921_vm3, %v4136_v19, %v4140_v62  ;;  %v4145_v52 = vsel %vm921_vm3, %v4140_v62, %v4136_v19  ;;  %5942 = vmatmul.msk.bf16.vlgmr.msrb.gmra.mxu0 %vm4036_vm6, %v6368_v26  ;;  %5944 = vmatmul.msk.bf16.vlgmr.msrb.gmra.mxu1 %vm4036_vm6, %v6368_v26 }
 0x621   : > { %v4154_v45 = vmul.f32 %v4150_v8, %v4143_v23  ;;  %v4155_v61 = vmul.f32 %v4151_v3, %v4145_v52  ;;  %v4244_v8 = vpop.permute.xlu2 %4243 }
 0x623   : > { %v4163_v59 = vpack.c.bf16 %v4156_v13, %v4154_v45  ;;  %v4164_v54 = vpack.c.bf16 %v4157_v58, %v4155_v61 }
 0x625   : > { %4188 = vmatpush.bf16.msra.mxu0 %v4163_v59  ;;  %4207 = vmatpush.bf16.msra.mxu1 %v4164_v54  ;;  %v4108_v12 = vpop.f32.mrf.mxu2 }
 0x627   : > { %v4239_v11 = vpop.permute.xlu1 %4238  ;;  %v4249_v45 = vpop.permute.xlu0 %4248 }
 0x62d   : > { %v4125_v53 = vpop.f32.mrf.mxu3  ;;  %v4111_v19 = vpop.f32.mrf.mxu2 }
 0x630   : > { %5943 = vmatmul.msk.bf16.gmra.mxu0 %vm4036_vm6, %v6369_v6  ;;  %5945 = vmatmul.msk.bf16.gmra.mxu1 %vm4036_vm6, %v6369_v6 }
 0x635   : > { %v4127_v4 = vpop.f32.mrf.mxu3  ;;  %v4113_v36 = vpop.f32.mrf.mxu2 }
 0x63d   : > { %v4130_v7 = vpop.f32.mrf.mxu3 }
 0x640   : > { %5971 = vmatmul.msk.bf16.vlgmr.msra.gmra.mxu0 %vm4036_vm6, %v6370_v63  ;;  %5973 = vmatmul.msk.bf16.vlgmr.msra.gmra.mxu1 %vm4036_vm6, %v6370_v63 }
 0x645   : > { %v4132_v57 = vpop.f32.mrf.mxu3 }
 0x650   : > { %5972 = vmatmul.msk.bf16.gmra.mxu0 %vm4036_vm6, %v6371_v44  ;;  %5974 = vmatmul.msk.bf16.gmra.mxu1 %vm4036_vm6, %v6371_v44 }
 0x69d   : > { %v4052_v1 = vpop.f32.mrf.mxu0  ;;  %v4071_v34 = vpop.f32.mrf.mxu1 }
 0x69e   : > { %v4107_v16 = vadd.f32 %v4106_v32, %v4052_v1  ;;  %v4126_v17 = vadd.f32 %v4125_v53, %v4071_v34  ;;  %v6379_v34 = vld [vmem:[#allocation7 + $0x38] sm:$0xff]  ;;  %v6385_v32 = vld [vmem:[#allocation7 + $0x68] sm:$0xff]  ;;  %v6376_v53 = vld [vmem:[#allocation7 + $0x20] sm:$0xff] }
 0x69f   : > { %4431 = vmatpush.bf16.msra.mxu2 %v6379_v34 }
 0x6a5   : > { %v4054_v50 = vpop.f32.mrf.mxu0  ;;  %v4073_v51 = vpop.f32.mrf.mxu1 }
 0x6a6   : > { %v4109_v22 = vadd.f32 %v4108_v12, %v4054_v50  ;;  %v4128_v33 = vadd.f32 %v4127_v4, %v4073_v51  ;;  %v6387_v50 = vld [vmem:[#allocation7 + $0x78] sm:$0xff]  ;;  %v6378_v51 = vld [vmem:[#allocation7 + $0x30] sm:$0xff] }
 0x6a7   : > { %4450 = vmatpush.bf16.msra.mxu3 %v6387_v50  ;;  %4432 = vmatpush.bf16.msra.mxu2 %v6378_v51  ;;  %v6383_v12 = vld [vmem:[#allocation7 + $0x58] sm:$0xff]  ;;  %v6374_v4 = vld [vmem:[#allocation7 + $0x10] sm:$0xff] }
 0x6ad   : > { %v4057_v9 = vpop.f32.mrf.mxu0  ;;  %v4076_v60 = vpop.f32.mrf.mxu1 }
 0x6ae   : > { %v4112_v10 = vadd.f32 %v4111_v19, %v4057_v9  ;;  %v4131_v29 = vadd.f32 %v4130_v7, %v4076_v60  ;;  %v6386_v9 = vld [vmem:[#allocation7 + $0x70] sm:$0xff]  ;;  %v6377_v60 = vld [vmem:[#allocation7 + $0x28] sm:$0xff] }
 0x6af   : > { %4451 = vmatpush.bf16.msra.mxu3 %v6386_v9  ;;  %4433 = vmatpush.bf16.msra.mxu2 %v6377_v60 }
 0x6b3   : > { %4452 = vmatpush.bf16.msra.mxu3 %v6385_v32  ;;  %4434 = vmatpush.bf16.msra.mxu2 %v6376_v53 }
 0x6b5   : > { %v4059_v38 = vpop.f32.mrf.mxu0  ;;  %v4078_v0 = vpop.f32.mrf.mxu1 }
 0x6b6   : > { %v4114_v3 = vadd.f32 %v4113_v36, %v4059_v38  ;;  %v4133_v35 = vadd.f32 %v4132_v57, %v4078_v0  ;;  %v6384_v38 = vld [vmem:[#allocation7 + $0x60] sm:$0xff]  ;;  %v6375_v0 = vld [vmem:[#allocation7 + $0x18] sm:$0xff] }
 0x6b7   : > { %4453 = vmatpush.bf16.msra.mxu3 %v6384_v38  ;;  %4435 = vmatpush.bf16.msra.mxu2 %v6375_v0 }
 0x6bb   : > { %4454 = vmatpush.bf16.msra.mxu3 %v6383_v12  ;;  %4436 = vmatpush.bf16.msra.mxu2 %v6374_v4 }
 0x6bd   : > { %v4190_v15 = vpop.f32.mrf.mxu0  ;;  %v4209_v42 = vpop.f32.mrf.mxu1 }
 0x6be   : > { %v4219_v18 = vadd.f32 %v4190_v15, %v4107_v16  ;;  %v4220_v20 = vadd.f32 %v4209_v42, %v4126_v17  ;;  %v6382_v15 = vld [vmem:[#allocation7 + $0x50] sm:$0xff]  ;;  %v6373_v42 = vld [vmem:[#allocation7 + $0x8] sm:$0xff]  ;;  %v6372_v17 = vld [vmem:[#allocation7] sm:$0xff] }
 0x6bf   : > { %4455 = vmatpush.bf16.msra.mxu3 %v6382_v15  ;;  %v6381_v16 = vld [vmem:[#allocation7 + $0x48] sm:$0xff]  ;;  %4437 = vmatpush.bf16.msra.mxu2 %v6373_v42 }
 0x6c0   : > { %v7520_v49 = vadd.f32 %v4234_v5, %v4219_v18  ;;  %v7522_v46 = vadd.f32 %v4234_v5, %v4220_v20  ;;  %v6380_v18 = vld [vmem:[#allocation7 + $0x40] sm:$0xff] }
 0x6c2   : > { %v4259_v40 = vmax.f32 %v7520_v49, 0.0  ;;  %v4260_v24 = vmax.f32 %v7522_v46, 0.0 }
 0x6c3   : > { %4456 = vmatpush.bf16.msra.mxu3 %v6381_v16  ;;  %4438 = vmatpush.bf16.msra.mxu2 %v6372_v17 }
 0x6c5   : > { %v4192_v48 = vpop.f32.mrf.mxu0  ;;  %v4211_v21 = vpop.f32.mrf.mxu1 }
 0x6c6   : > { %v4221_v41 = vadd.f32 %v4192_v48, %v4109_v22  ;;  %v4222_v43 = vadd.f32 %v4211_v21, %v4128_v33 }
 0x6c7   : > { %4457 = vmatpush.bf16.msra.mxu3 %v6380_v18 }
 0x6c8   : > { %v7524_v14 = vadd.f32 %v4239_v11, %v4221_v41  ;;  %v7526_v28 = vadd.f32 %v4239_v11, %v4222_v43 }
 0x6ca   : > { %v4261_v25 = vmax.f32 %v7524_v14, 0.0  ;;  %v4262_v56 = vmax.f32 %v7526_v28, 0.0 }
 0x6cc   : > { %v6513_v27 = vpack.i.bf16 %v4262_v56, %v4260_v24  ;;  %v6508_v55 = vpack.i.bf16 %v4261_v25, %v4259_v40 }
 0x6cd   : > { %v4195_v47 = vpop.f32.mrf.mxu0  ;;  %v4214_v2 = vpop.f32.mrf.mxu1 }
 0x6ce   : > { %6514 = vrot.lane.b32.xlu2 %v6513_v27, %s6700_s14  ;;  %6509 = vrot.lane.b32.xlu1 %v6508_v55, %s6700_s14  ;;  %v4223_v26 = vadd.f32 %v4195_v47, %v4112_v10  ;;  %v4224_v39 = vadd.f32 %v4214_v2, %v4131_v29 }
 0x6d0   : > { %v7542_v23 = vadd.f32 %v4244_v8, %v4223_v26  ;;  %v7544_v52 = vadd.f32 %v4244_v8, %v4224_v39 }
 0x6d2   : > { %v4263_v54 = vmax.f32 %v7542_v23, 0.0  ;;  %v4264_v6 = vmax.f32 %v7544_v52, 0.0 }
 0x6d5   : > { %v4197_v31 = vpop.f32.mrf.mxu0  ;;  %v4216_v62 = vpop.f32.mrf.mxu1 }
 0x6d6   : > { %v4225_v13 = vadd.f32 %v4197_v31, %v4114_v3  ;;  %v4226_v58 = vadd.f32 %v4216_v62, %v4133_v35 }
 0x6d8   : > { %v7546_v61 = vadd.f32 %v4249_v45, %v4225_v13  ;;  %v7548_v59 = vadd.f32 %v4249_v45, %v4226_v58 }
 0x6da   : > { %v4265_v37 = vmax.f32 %v7546_v61, 0.0  ;;  %v4266_v63 = vmax.f32 %v7548_v59, 0.0 }
 0x6dc   : > { %v6518_v44 = vpack.i.bf16 %v4265_v37, %v4263_v54  ;;  %v6523_v1 = vpack.i.bf16 %v4266_v63, %v4264_v6 }
 0x6de   : > { %6519 = vrot.lane.b32.xlu0 %v6518_v44, %s6700_s14  ;;  %6524 = vrot.lane.b32.xlu1 %v6523_v1, %s6700_s14  ;;  %s482_s14 = sand.u32 1, %s6680_s26  }
 0x6df   : > { %s4591_s18 = sshll.u32 %s482_s14, 5  ;;  %s4474_s17 = scalar_lea.sflag [#allocation4], %s482_s14 }
 0x6e0   : > { %s484_s19 = scalar_lea.vmem [#allocation8], %s4591_s18 }
 0x6e1   : > { %s4485_s22 = sshll.u32 %s484_s19, 4  ;;  %s4486_s22 = int_to_ptr.vmem [resolvable:$true] %s4485_s22 }
 0x728   : > { %v6515_v20 = vpop.permute.xlu2 %6514 }
 0x729   : > { %v6517_v22 = vunpack.i.h.bf16 %v6515_v20  ;;  %v6516_v33 = vunpack.i.l.bf16 %v6515_v20 }
 0x740   : > { %v6510_v5 = vpop.permute.xlu1 %6509 }
 0x741   : > { %v6512_v48 = vunpack.i.h.bf16 %v6510_v5  ;;  %v6511_v21 = vunpack.i.l.bf16 %v6510_v5 }
 0x743   : > { %v4284_v11 = vsel %vm921_vm3, %v6512_v48, %v6517_v22  ;;  %v4288_v41 = vsel %vm921_vm3, %v6517_v22, %v6512_v48  ;;  %v4283_v43 = vsel %vm921_vm3, %v6511_v21, %v6516_v33  ;;  %v4287_v19 = vsel %vm921_vm3, %v6516_v33, %v6511_v21 }
 0x744   : > { %v4293_v7 = vmax.f32 %v4261_v25, %v4284_v11  ;;  %v4294_v27 = vmax.f32 %v4262_v56, %v4288_v41  ;;  %v4291_v55 = vmax.f32 %v4259_v40, %v4283_v43  ;;  %v4292_v47 = vmax.f32 %v4260_v24, %v4287_v19 }
 0x746   : > { %v4299_v2 = vpack.c.bf16 %v4293_v7, %v4291_v55  ;;  %v4300_v10 = vpack.c.bf16 %v4294_v27, %v4292_v47 }
 0x748   : > { %4439 = vmatmul.bf16.vlgmr.msra.gmra.mxu2 %v4299_v2  ;;  %4458 = vmatmul.bf16.vlgmr.msra.gmra.mxu3 %v4300_v10 }
 0x750   : > { %v6520_v29 = vpop.permute.xlu0 %6519  ;;  %v6525_v36 = vpop.permute.xlu1 %6524 }
 0x751   : > { %v6522_v57 = vunpack.i.h.bf16 %v6520_v29  ;;  %v6521_v26 = vunpack.i.l.bf16 %v6520_v29  ;;  %v6527_v14 = vunpack.i.h.bf16 %v6525_v36  ;;  %v6526_v25 = vunpack.i.l.bf16 %v6525_v36 }
 0x753   : > { %v4286_v28 = vsel %vm921_vm3, %v6522_v57, %v6527_v14  ;;  %v4290_v49 = vsel %vm921_vm3, %v6527_v14, %v6522_v57  ;;  %v4285_v46 = vsel %vm921_vm3, %v6521_v26, %v6526_v25  ;;  %v4289_v40 = vsel %vm921_vm3, %v6526_v25, %v6521_v26 }
 0x754   : > { %v4295_v24 = vmax.f32 %v4263_v54, %v4285_v46  ;;  %v4297_v56 = vmax.f32 %v4265_v37, %v4286_v28  ;;  %v4296_v39 = vmax.f32 %v4264_v6, %v4289_v40  ;;  %v4298_v8 = vmax.f32 %v4266_v63, %v4290_v49 }
 0x756   : > { %v4301_v3 = vpack.c.bf16 %v4297_v56, %v4295_v24  ;;  %v4302_v35 = vpack.c.bf16 %v4298_v8, %v4296_v39 }
 0x758   : > { %4444 = vmatmul.bf16.gmra.mxu2 %v4301_v3  ;;  %4463 = vmatmul.bf16.gmra.mxu3 %v4302_v35 }
 0x7cb   : > { %v4440_v30 = vpop.f32.mrf.mxu2  ;;  %v4459_v31 = vpop.f32.mrf.mxu3 }
 0x7cc   : > { %v4460_v62 = vadd.f32 %v4459_v31, %v4440_v30 }
 0x7ce   : > { %4469 = vst [vmem:[%s484_s19] sm:$0xff] %v4460_v62 }
 0x7d3   : > { %v4442_v23 = vpop.f32.mrf.mxu2  ;;  %v4461_v13 = vpop.f32.mrf.mxu3 }
 0x7d4   : > { %v4462_v58 = vadd.f32 %v4461_v13, %v4442_v23 }
 0x7d6   : > { %4470 = vst [vmem:[%s484_s19 + $0x8] sm:$0xff] %v4462_v58 }
 0x7db   : > { %v4445_v52 = vpop.f32.mrf.mxu2  ;;  %v4464_v45 = vpop.f32.mrf.mxu3 }
 0x7dc   : > { %v4465_v61 = vadd.f32 %v4464_v45, %v4445_v52 }
 0x7de   : > { %4471 = vst [vmem:[%s484_s19 + $0x10] sm:$0xff] %v4465_v61 }
 0x7e3   : > { %v4447_v59 = vpop.f32.mrf.mxu2  ;;  %v4466_v54 = vpop.f32.mrf.mxu3 }
 0x7e4   : > { %v4467_v6 = vadd.f32 %v4466_v54, %v4447_v59 }
 0x7e6   : > { %4472 = vst [vmem:[%s484_s19 + $0x18] sm:$0xff] %v4467_v6 }
 0x7e7   : > { %6645 = shalt.err (!%p6642_p8)
}
 0x7e8   : > { %s6702_s29 = smov 128   ;;  %s6703_s14 = smov 256  }
 0x7e9   : > { %s6704_s18 = smov 8  }
 0x7ea   : > { %6400 = dma.vmem_to_hbm [thread:$0]  (%p6813_p5), %s4486_s22, 512, %s4488_s24, %s4474_s17, %s6702_s29, %s6703_s14, %s6704_s18  }
 0x7eb PF: > { %s7669_s19 = sld [smem:[#allocation14_spill]] }
 0x7ec   : > { %s7670_s20 = sld [smem:[#allocation12_spill]] }
 0x7f1   : > { %p6422_p9 = scmp.ge.s32.totalorder %s7669_s19, 2 }
 0x7f2   : > { %s4502_s21 = sand.u32 1, %s7670_s20  }
 0x7f3   : > { %p6413_p10 = pnand %p6422_p9, %p6817_p6  ;;  %s4503_s16 = scalar_lea.sflag [#allocation4], %s4502_s21 }
 0x7f5   : > { %p6414_p11 = pneg %p6413_p10 }
 0x7f7   : > { %6671 = dma.done.wait (%p6414_p11), %s4503_s16, 512  }
 0x7f8   : > { %6673 = vsyncadd (%p6414_p11), %s4503_s16, 4294966784  ;;  %s7672_s28 = sld [smem:[#allocation15_spill]]  ;;  %s7675_s25 = smov %s6680_s26 }
 0x7f9   : > { %s7673_s4 = sld [smem:[#allocation13_spill]] }
 0x7fa   : > { %s7674_s27 = sld [smem:[#allocation16_spill]] }
 0x7fe   : > { %p25_p12 = scmp.ge.s32.totalorder %s7672_s28, 4  }
 0x7ff   : > { %s7676_s26 = smov %s7673_s4 }
 0x800   :  { %27 = sbr.rel (!%p25_p12) target bundleno = 9 (0x9), region = 138 }
 0x805   :  { %4509 = vsyncpa [#allocation3], 1 }
 0x806   :  { %4511 = vsyncpa [#allocation3 + $0x1], 1 }
 0x807   :  { %4512 = vsyncpa [#allocation6], 1 }
 0x808   :  { %4513 = vsyncpa [#allocation4], 1 }
 0x809   :  { %4515 = vsyncpa [#allocation4 + $0x1], 1 }

</bundles_post_ra>
